<compile_context>
chip_gen: v6e
topology: v6e:2x2x1
jax: 0.10.0
libtpu: 0.0.40
codegen_flags: <defaults>
</compile_context>

<pallas_src>
import numpy as np

import jax
import jax.numpy as jnp
from jax import lax
from jax.experimental import pallas as pl
from jax.experimental.pallas import tpu as pltpu

# --------------------------- model configuration -----------------------------
BATCH = 2
CHANNELS = 4
IMAGE_H = IMAGE_W = 16
PATCH_H = PATCH_W = 8
NUM_PATCHES = (IMAGE_H // PATCH_H) * (IMAGE_W // PATCH_W)        # 4
PATCH_DIM = CHANNELS * PATCH_H * PATCH_W                         # 256
DIM = 32
DEPTH = 2
HEADS = 4
DIM_HEAD = 8
INNER_DIM = HEADS * DIM_HEAD                                     # 32
MLP_DIM = 64
NUM_CLASSES = 10
SEQ = NUM_PATCHES + 1                                            # 5 (cls + patches)
SEQ_PAD = 8                                                      # one full sublane group
NCHUNKS = INNER_DIM // DIM_HEAD                                  # 4 (== HEADS)
ROWS = SEQ * NCHUNKS                                             # 20 scrambled rows
QKV3 = 3 * DIM_HEAD                                              # 24 ([q|k|v] chunk width)
LN_EPS = 1e-5
SCALE = DIM_HEAD ** (-0.5)
NEG_INF = -1e30


# ------------------------------ in-kernel helpers -----------------------------
def _layernorm(x, g, b):
    mu = jnp.mean(x, axis=-1, keepdims=True)
    var = jnp.mean(jnp.square(x - mu), axis=-1, keepdims=True)
    return (x - mu) * lax.rsqrt(var + LN_EPS) * g + b


# TODO(synk): replace with lax.erf once Mosaic exposes an erf lowering; this is the
# Abramowitz & Stegun 7.1.26 polynomial (|abs err| < 1.5e-7), numerically
# indistinguishable from exact erf-GELU at f32 for this network.
def _erf(x):
    a1, a2, a3, a4, a5 = (0.254829592, -0.284496736, 1.421413741,
                          -1.453152027, 1.061405429)
    p = 0.3275911
    ax = jnp.abs(x)
    t = 1.0 / (1.0 + p * ax)
    poly = ((((a5 * t + a4) * t + a3) * t + a2) * t + a1) * t
    y = 1.0 - poly * jnp.exp(-ax * ax)
    return jnp.where(x < 0.0, -y, y)


def _gelu(x):
    return 0.5 * x * (1.0 + _erf(x * 0.7071067811865476))


# ------------------------------ the fused kernel ------------------------------
def _vit_kernel(xp_ref, emb_ref, shift_ref, rep_ref, rept_ref,
                qkv_cm_ref, proj_cm_ref, bias_ref,
                patch_w_ref, ln1g_ref, ln1b_ref, wqkv_ref, projw_ref, projb_ref,
                ln2g_ref, ln2b_ref, w1_ref, b1_ref, w2_ref, b2_ref,
                hlng_ref, hlnb_ref, hw_ref, hb_ref, out_ref):
    f32 = jnp.float32
    shift = shift_ref[...]        # (SEQ_PAD, NUM_PATCHES): patches -> padded rows 1..4
    rep = rep_ref[...]            # (ROWS, SEQ_PAD): scrambled row r <- seq row r // NCHUNKS
    rep_t = rept_ref[...]         # (SEQ_PAD, ROWS): un-scramble (sums the NCHUNKS pieces)
    attn_bias = bias_ref[...]     # (ROWS, ROWS): 0 within a head block, -1e30 across heads

    # ---- patch embedding + cls token + positional embedding (padded to SEQ_PAD rows) ----
    patches = xp_ref[0]                                                   # (NUM_PATCHES, PATCH_DIM)
    pe = jnp.dot(patches, patch_w_ref[...], preferred_element_type=f32)   # (NUM_PATCHES, DIM)
    x = jnp.dot(shift, pe, preferred_element_type=f32) + emb_ref[...]     # (SEQ_PAD, DIM)

    for l in range(DEPTH):
        # ============================ attention ============================
        xn = _layernorm(x, ln1g_ref[l], ln1b_ref[l])                      # (SEQ_PAD, DIM)
        xr = jnp.dot(rep, xn, preferred_element_type=f32)                 # (ROWS, DIM)
        # fused scrambled QKV: scrambled row r uses weight chunk a = r % NCHUNKS
        qkv = None
        for a in range(NCHUNKS):
            piece = jnp.dot(xr, wqkv_ref[l * NCHUNKS + a],
                            preferred_element_type=f32) * qkv_cm_ref[a]   # (ROWS, QKV3)
            qkv = piece if qkv is None else qkv + piece
        q = qkv[:, :DIM_HEAD] * SCALE            # scale the smaller operand before QK^T
        k = qkv[:, DIM_HEAD:2 * DIM_HEAD]
        v = qkv[:, 2 * DIM_HEAD:]
        # all heads at once: block-diagonal additive mask on one (ROWS, ROWS) score matrix
        scores = lax.dot_general(q, k, (((1,), (1,)), ((), ())),
                                 preferred_element_type=f32) + attn_bias
        m = jnp.max(scores, axis=-1, keepdims=True)
        p = jnp.exp(scores - m)
        attn = p * pl.reciprocal(jnp.sum(p, axis=-1, keepdims=True), approx=False)
        o = jnp.dot(attn, v, preferred_element_type=f32)                  # (ROWS, DIM_HEAD)
        # un-scramble + output projection (proj weight pre-split into DIM_HEAD row chunks)
        op = None
        for a in range(NCHUNKS):
            piece = jnp.dot(o, projw_ref[l * NCHUNKS + a],
                            preferred_element_type=f32) * proj_cm_ref[a]  # (ROWS, DIM)
            op = piece if op is None else op + piece
        x = x + jnp.dot(rep_t, op, preferred_element_type=f32) + projb_ref[l]
        # =========================== feed-forward ==========================
        xn2 = _layernorm(x, ln2g_ref[l], ln2b_ref[l])
        h = _gelu(jnp.dot(xn2, w1_ref[l], preferred_element_type=f32) + b1_ref[l])
        x = x + jnp.dot(h, w2_ref[l], preferred_element_type=f32) + b2_ref[l]

    # ==================== cls pooling + LayerNorm + classifier head ====================
    cls = _layernorm(x[0:1, :], hlng_ref[...], hlnb_ref[...])             # (1, DIM)
    out_ref[0] = (jnp.dot(cls, hw_ref[...], preferred_element_type=f32)
                  + hb_ref[...]).astype(out_ref.dtype)


# --------------------- host-side parameter / constant packing -----------------
def _structural_constants():
    """Constant 0/1 matrices reproducing PyTorch's flat reshapes + sequence padding."""
    shift = np.zeros((SEQ_PAD, NUM_PATCHES), np.float32)
    shift[np.arange(NUM_PATCHES) + 1, np.arange(NUM_PATCHES)] = 1.0   # patches -> rows 1..4
    rep = np.zeros((ROWS, SEQ_PAD), np.float32)
    rep_t = np.zeros((SEQ_PAD, ROWS), np.float32)
    qkv_cm = np.zeros((NCHUNKS, ROWS, QKV3), np.float32)
    proj_cm = np.zeros((NCHUNKS, ROWS, DIM), np.float32)
    for r in range(ROWS):
        rep[r, r // NCHUNKS] = 1.0
        rep_t[r // NCHUNKS, r] = 1.0
        qkv_cm[r % NCHUNKS, r, :] = 1.0
        proj_cm[r % NCHUNKS, r, :] = 1.0
    attn_bias = np.full((ROWS, ROWS), NEG_INF, np.float32)
    for r in range(ROWS):
        lo = (r // SEQ) * SEQ
        attn_bias[r, lo:lo + SEQ] = 0.0
    return shift, rep, rep_t, qkv_cm, proj_cm, attn_bias


def pack_params(p):
    """Reorganize torch-style parameters into the fused-kernel layout (done once)."""
    shift, rep, rep_t, qkv_cm, proj_cm, attn_bias = _structural_constants()

    def _stack(fn):
        return jnp.stack([fn(lp) for lp in p["layers"]], axis=0)

    # packed [q|k|v] weight chunks, indexed in-kernel by l * NCHUNKS + a
    wqkv = jnp.stack([
        jnp.concatenate([lp["attn"]["wq"][:, a * DIM_HEAD:(a + 1) * DIM_HEAD],
                         lp["attn"]["wk"][:, a * DIM_HEAD:(a + 1) * DIM_HEAD],
                         lp["attn"]["wv"][:, a * DIM_HEAD:(a + 1) * DIM_HEAD]], axis=1)
        for lp in p["layers"] for a in range(NCHUNKS)], axis=0)       # (DEPTH*NCHUNKS, DIM, QKV3)
    proj_w = jnp.stack([
        lp["attn"]["proj_w"][a * DIM_HEAD:(a + 1) * DIM_HEAD, :]
        for lp in p["layers"] for a in range(NCHUNKS)], axis=0)       # (DEPTH*NCHUNKS, DIM_HEAD, DIM)

    # cls token + positional embedding + patch bias, pre-combined and padded to SEQ_PAD rows
    emb = jnp.zeros((SEQ_PAD, DIM), jnp.float32)
    emb = emb.at[0].set(p["cls_token"][0, 0] + p["pos_emb"][0, 0])
    emb = emb.at[1:SEQ].set(p["pos_emb"][0, 1:SEQ] + p["patch_b"][0])

    return {
        "emb": emb,
        "shift": jnp.asarray(shift),
        "rep": jnp.asarray(rep),
        "rep_t": jnp.asarray(rep_t),
        "qkv_cmask": jnp.asarray(qkv_cm),
        "proj_cmask": jnp.asarray(proj_cm),
        "attn_bias": jnp.asarray(attn_bias),
        "patch_w": p["patch_w"],
        "ln1_g": _stack(lambda lp: lp["attn"]["ln_g"]),
        "ln1_b": _stack(lambda lp: lp["attn"]["ln_b"]),
        "wqkv": wqkv,
        "proj_w": proj_w,
        "proj_b": _stack(lambda lp: lp["attn"]["proj_b"]),
        "ln2_g": _stack(lambda lp: lp["ff"]["ln_g"]),
        "ln2_b": _stack(lambda lp: lp["ff"]["ln_b"]),
        "w1": _stack(lambda lp: lp["ff"]["w1"]),
        "b1": _stack(lambda lp: lp["ff"]["b1"]),
        "w2": _stack(lambda lp: lp["ff"]["w2"]),
        "b2": _stack(lambda lp: lp["ff"]["b2"]),
        "head_ln_g": p["head_ln_g"],
        "head_ln_b": p["head_ln_b"],
        "head_w": p["head_w"],
        "head_b": p["head_b"],
    }


# ------------------------------ fused forward pass -----------------------------
def _bcast_spec(shape):
    rank = len(shape)
    return pl.BlockSpec(tuple(shape), lambda i, _r=rank: (0,) * _r)


@jax.jit
def vit_forward(img, packed):
    b = img.shape[0]
    # to_patch: flat row-major reshape of NCHW, exactly as the PyTorch reference
    x = img.reshape(b, NUM_PATCHES, PATCH_DIM)
    consts = [
        packed["emb"], packed["shift"], packed["rep"], packed["rep_t"],
        packed["qkv_cmask"], packed["proj_cmask"], packed["attn_bias"],
        packed["patch_w"], packed["ln1_g"], packed["ln1_b"], packed["wqkv"],
        packed["proj_w"], packed["proj_b"], packed["ln2_g"], packed["ln2_b"],
        packed["w1"], packed["b1"], packed["w2"], packed["b2"],
        packed["head_ln_g"], packed["head_ln_b"], packed["head_w"], packed["head_b"],
    ]
    out = pl.pallas_call(
        _vit_kernel,
        out_shape=jax.ShapeDtypeStruct((b, 1, NUM_CLASSES), jnp.float32),
        grid=(b,),
        in_specs=[pl.BlockSpec((1, NUM_PATCHES, PATCH_DIM), lambda i: (i, 0, 0))]
                 + [_bcast_spec(c.shape) for c in consts],
        out_specs=pl.BlockSpec((1, 1, NUM_CLASSES), lambda i: (i, 0, 0)),
        compiler_params=pltpu.CompilerParams(
            dimension_semantics=("parallel",)),   # v7x: one batch element per TensorCore
    )(x, *consts)
    return out[:, 0, :]


# --------------------- plain-JAX reference (torch semantics) -------------------
def _ln_ref(x, g, b):
    mu = jnp.mean(x, axis=-1, keepdims=True)
    var = jnp.mean(jnp.square(x - mu), axis=-1, keepdims=True)
    return (x - mu) * lax.rsqrt(var + LN_EPS) * g + b


@jax.jit
def vit_reference(img, params):
    b = img.shape[0]
    x = img.reshape(b, NUM_PATCHES, PATCH_DIM)
    x = x @ params["patch_w"] + params["patch_b"]
    cls = jnp.broadcast_to(params["cls_token"], (b, 1, DIM))
    x = jnp.concatenate([cls, x], axis=1) + params["pos_emb"][:, :SEQ]
    for lp in params["layers"]:
        ap = lp["attn"]
        xn = _ln_ref(x, ap["ln_g"], ap["ln_b"])
        q = (xn @ ap["wq"]).reshape(b, HEADS, SEQ, DIM_HEAD)   # torch's flat reshape
        k = (xn @ ap["wk"]).reshape(b, HEADS, SEQ, DIM_HEAD)
        v = (xn @ ap["wv"]).reshape(b, HEADS, SEQ, DIM_HEAD)
        dots = jnp.einsum("bhsd,bhtd->bhst", q, k) * SCALE
        dots = dots - jnp.max(dots, axis=-1, keepdims=True)
        e = jnp.exp(dots)
        attn = e / jnp.sum(e, axis=-1, keepdims=True)
        o = jnp.einsum("bhst,bhtd->bhsd", attn, v).reshape(b, SEQ, INNER_DIM)
        x = x + (o @ ap["proj_w"] + ap["proj_b"])
        fp = lp["ff"]
        xn2 = _ln_ref(x, fp["ln_g"], fp["ln_b"])
        h = jax.nn.gelu(xn2 @ fp["w1"] + fp["b1"], approximate=False)
        x = x + (h @ fp["w2"] + fp["b2"])
    x0 = _ln_ref(x[:, 0], params["head_ln_g"], params["head_ln_b"])
    return x0 @ params["head_w"] + params["head_b"]


# ---------------------------------- parameters ---------------------------------
def init_params(key):
    keys = iter(jax.random.split(key, 64))

    def w(shape, scale=0.02):
        return jax.random.normal(next(keys), shape, jnp.float32) * scale

    params = {
        "patch_w": w((PATCH_DIM, DIM)),
        "patch_b": jnp.zeros((1, DIM), jnp.float32),
        "pos_emb": jax.random.normal(next(keys), (1, SEQ, DIM), jnp.float32),
        "cls_token": jax.random.normal(next(keys), (1, 1, DIM), jnp.float32),
        "head_ln_g": jnp.ones((1, DIM), jnp.float32),
        "head_ln_b": jnp.zeros((1, DIM), jnp.float32),
        "head_w": w((DIM, NUM_CLASSES)),
        "head_b": jnp.zeros((1, NUM_CLASSES), jnp.float32),
        "layers": [],
    }
    for _ in range(DEPTH):
        params["layers"].append({
            "attn": {
                "ln_g": jnp.ones((1, DIM), jnp.float32),
                "ln_b": jnp.zeros((1, DIM), jnp.float32),
                "wq": w((DIM, INNER_DIM)),
                "wk": w((DIM, INNER_DIM)),
                "wv": w((DIM, INNER_DIM)),
                "proj_w": w((INNER_DIM, DIM)),
                "proj_b": jnp.zeros((1, DIM), jnp.float32),
            },
            "ff": {
                "ln_g": jnp.ones((1, DIM), jnp.float32),
                "ln_b": jnp.zeros((1, DIM), jnp.float32),
                "w1": w((DIM, MLP_DIM)),
                "b1": jnp.zeros((1, MLP_DIM), jnp.float32),
                "w2": w((MLP_DIM, DIM)),
                "b2": jnp.zeros((1, DIM), jnp.float32),
            },
        })
    return params


if __name__ == "__main__":
    key = jax.random.PRNGKey(0)
    pkey, xkey = jax.random.split(key)
    params = init_params(pkey)
    packed = pack_params(params)
    img = jax.random.normal(xkey, (BATCH, CHANNELS, IMAGE_H, IMAGE_W), jnp.float32)

    out = vit_forward(img, packed)
    jax.block_until_ready(out)
    assert out.shape == (BATCH, NUM_CLASSES) and out.dtype == jnp.float32

    ref = vit_reference(img, params)
    max_err = float(jnp.max(jnp.abs(out - ref)))
    assert max_err < 1e-3, f"kernel/reference mismatch: {max_err}"
    print("KERNEL_OK")
</pallas_src>

<mosaic_0001>
module attributes {stable_mosaic.version = 11 : i64} {
  func.func @_vit_kernel(%arg0: i32, %arg1: memref<1x4x256xf32, #tpu.memory_space<vmem>>, %arg2: memref<8x32xf32, #tpu.memory_space<vmem>>, %arg3: memref<8x4xf32, #tpu.memory_space<vmem>>, %arg4: memref<20x8xf32, #tpu.memory_space<vmem>>, %arg5: memref<8x20xf32, #tpu.memory_space<vmem>>, %arg6: memref<4x20x24xf32, #tpu.memory_space<vmem>>, %arg7: memref<4x20x32xf32, #tpu.memory_space<vmem>>, %arg8: memref<20x20xf32, #tpu.memory_space<vmem>>, %arg9: memref<256x32xf32, #tpu.memory_space<vmem>>, %arg10: memref<2x1x32xf32, #tpu.memory_space<vmem>>, %arg11: memref<2x1x32xf32, #tpu.memory_space<vmem>>, %arg12: memref<8x32x24xf32, #tpu.memory_space<vmem>>, %arg13: memref<8x8x32xf32, #tpu.memory_space<vmem>>, %arg14: memref<2x1x32xf32, #tpu.memory_space<vmem>>, %arg15: memref<2x1x32xf32, #tpu.memory_space<vmem>>, %arg16: memref<2x1x32xf32, #tpu.memory_space<vmem>>, %arg17: memref<2x32x64xf32, #tpu.memory_space<vmem>>, %arg18: memref<2x1x64xf32, #tpu.memory_space<vmem>>, %arg19: memref<2x64x32xf32, #tpu.memory_space<vmem>>, %arg20: memref<2x1x32xf32, #tpu.memory_space<vmem>>, %arg21: memref<1x32xf32, #tpu.memory_space<vmem>>, %arg22: memref<1x32xf32, #tpu.memory_space<vmem>>, %arg23: memref<32x10xf32, #tpu.memory_space<vmem>>, %arg24: memref<1x10xf32, #tpu.memory_space<vmem>>, %arg25: memref<1x1x10xf32, #tpu.memory_space<vmem>>) attributes {dimension_semantics = [#tpu.dimension_semantics<parallel>], iteration_bounds = array<i64: 2>, scalar_prefetch = 0 : i64, scratch_operands = 0 : i64, tpu.core_type = #tpu.core_type<tc>, window_params = [{transform_indices = @transform_0, window_bounds = array<i64: 1, 4, 256>}, {pipeline_mode = #tpu.pipeline_mode<synchronous>, transform_indices = @transform_1, window_bounds = array<i64: 8, 32>}, {pipeline_mode = #tpu.pipeline_mode<synchronous>, transform_indices = @transform_2, window_bounds = array<i64: 8, 4>}, {pipeline_mode = #tpu.pipeline_mode<synchronous>, transform_indices = @transform_3, window_bounds = array<i64: 20, 8>}, {pipeline_mode = #tpu.pipeline_mode<synchronous>, transform_indices = @transform_4, window_bounds = array<i64: 8, 20>}, {pipeline_mode = #tpu.pipeline_mode<synchronous>, transform_indices = @transform_5, window_bounds = array<i64: 4, 20, 24>}, {pipeline_mode = #tpu.pipeline_mode<synchronous>, transform_indices = @transform_6, window_bounds = array<i64: 4, 20, 32>}, {pipeline_mode = #tpu.pipeline_mode<synchronous>, transform_indices = @transform_7, window_bounds = array<i64: 20, 20>}, {pipeline_mode = #tpu.pipeline_mode<synchronous>, transform_indices = @transform_8, window_bounds = array<i64: 256, 32>}, {pipeline_mode = #tpu.pipeline_mode<synchronous>, transform_indices = @transform_9, window_bounds = array<i64: 2, 1, 32>}, {pipeline_mode = #tpu.pipeline_mode<synchronous>, transform_indices = @transform_10, window_bounds = array<i64: 2, 1, 32>}, {pipeline_mode = #tpu.pipeline_mode<synchronous>, transform_indices = @transform_11, window_bounds = array<i64: 8, 32, 24>}, {pipeline_mode = #tpu.pipeline_mode<synchronous>, transform_indices = @transform_12, window_bounds = array<i64: 8, 8, 32>}, {pipeline_mode = #tpu.pipeline_mode<synchronous>, transform_indices = @transform_13, window_bounds = array<i64: 2, 1, 32>}, {pipeline_mode = #tpu.pipeline_mode<synchronous>, transform_indices = @transform_14, window_bounds = array<i64: 2, 1, 32>}, {pipeline_mode = #tpu.pipeline_mode<synchronous>, transform_indices = @transform_15, window_bounds = array<i64: 2, 1, 32>}, {pipeline_mode = #tpu.pipeline_mode<synchronous>, transform_indices = @transform_16, window_bounds = array<i64: 2, 32, 64>}, {pipeline_mode = #tpu.pipeline_mode<synchronous>, transform_indices = @transform_17, window_bounds = array<i64: 2, 1, 64>}, {pipeline_mode = #tpu.pipeline_mode<synchronous>, transform_indices = @transform_18, window_bounds = array<i64: 2, 64, 32>}, {pipeline_mode = #tpu.pipeline_mode<synchronous>, transform_indices = @transform_19, window_bounds = array<i64: 2, 1, 32>}, {pipeline_mode = #tpu.pipeline_mode<synchronous>, transform_indices = @transform_20, window_bounds = array<i64: 1, 32>}, {pipeline_mode = #tpu.pipeline_mode<synchronous>, transform_indices = @transform_21, window_bounds = array<i64: 1, 32>}, {pipeline_mode = #tpu.pipeline_mode<synchronous>, transform_indices = @transform_22, window_bounds = array<i64: 32, 10>}, {pipeline_mode = #tpu.pipeline_mode<synchronous>, transform_indices = @transform_23, window_bounds = array<i64: 1, 10>}, {transform_indices = @transform_24, window_bounds = array<i64: 1, 1, 10>}]} {
    %c0 = arith.constant 0 : index
    %c0_0 = arith.constant 0 : index
    %0 = vector.load %arg3[%c0, %c0_0] : memref<8x4xf32, #tpu.memory_space<vmem>>, vector<8x4xf32>
    %c0_1 = arith.constant 0 : index
    %c0_2 = arith.constant 0 : index
    %1 = vector.load %arg4[%c0_1, %c0_2] : memref<20x8xf32, #tpu.memory_space<vmem>>, vector<20x8xf32>
    %c0_3 = arith.constant 0 : index
    %c0_4 = arith.constant 0 : index
    %2 = vector.load %arg5[%c0_3, %c0_4] : memref<8x20xf32, #tpu.memory_space<vmem>>, vector<8x20xf32>
    %c0_5 = arith.constant 0 : index
    %c0_6 = arith.constant 0 : index
    %3 = vector.load %arg8[%c0_5, %c0_6] : memref<20x20xf32, #tpu.memory_space<vmem>>, vector<20x20xf32>
    %c0_7 = arith.constant 0 : index
    %c0_8 = arith.constant 0 : index
    %c0_9 = arith.constant 0 : index
    %4 = vector.load %arg1[%c0_7, %c0_8, %c0_9] : memref<1x4x256xf32, #tpu.memory_space<vmem>>, vector<1x4x256xf32>
    %5 = vector.shape_cast %4 : vector<1x4x256xf32> to vector<4x256xf32>
    %c0_10 = arith.constant 0 : index
    %c0_11 = arith.constant 0 : index
    %6 = vector.load %arg9[%c0_10, %c0_11] : memref<256x32xf32, #tpu.memory_space<vmem>>, vector<256x32xf32>
    %cst = arith.constant dense<0.000000e+00> : vector<4x32xf32>
    %7 = tpu.matmul %5, %6, %cst {dimension_numbers = #tpu.dot_dimension_numbers<[1], [0], [0], [1], [0, 0, 1, 1], [], []>} : vector<4x256xf32>, vector<256x32xf32>, vector<4x32xf32> -> vector<4x32xf32>
    %cst_12 = arith.constant dense<0.000000e+00> : vector<8x32xf32>
    %8 = tpu.matmul %0, %7, %cst_12 {dimension_numbers = #tpu.dot_dimension_numbers<[1], [0], [0], [1], [0, 0, 1, 1], [], []>} : vector<8x4xf32>, vector<4x32xf32>, vector<8x32xf32> -> vector<8x32xf32>
    %c0_13 = arith.constant 0 : index
    %c0_14 = arith.constant 0 : index
    %9 = vector.load %arg2[%c0_13, %c0_14] : memref<8x32xf32, #tpu.memory_space<vmem>>, vector<8x32xf32>
    %10 = arith.addf %8, %9 : vector<8x32xf32>
    %c0_15 = arith.constant 0 : index
    %c0_16 = arith.constant 0 : index
    %c0_17 = arith.constant 0 : index
    %11 = vector.load %arg10[%c0_15, %c0_16, %c0_17] : memref<2x1x32xf32, #tpu.memory_space<vmem>>, vector<1x1x32xf32>
    %12 = vector.shape_cast %11 : vector<1x1x32xf32> to vector<1x32xf32>
    %c0_18 = arith.constant 0 : index
    %c0_19 = arith.constant 0 : index
    %c0_20 = arith.constant 0 : index
    %13 = vector.load %arg11[%c0_18, %c0_19, %c0_20] : memref<2x1x32xf32, #tpu.memory_space<vmem>>, vector<1x1x32xf32>
    %14 = vector.shape_cast %13 : vector<1x1x32xf32> to vector<1x32xf32>
    %cst_21 = arith.constant dense<0.000000e+00> : vector<8xf32>
    %15 = vector.multi_reduction <add>, %10, %cst_21 [1] : vector<8x32xf32> to vector<8xf32>
    %16 = vector.shape_cast %15 : vector<8xf32> to vector<8x1xf32>
    %cst_22 = arith.constant 3.200000e+01 : f32
    %17 = vector.broadcast %cst_22 : f32 to vector<8x1xf32>
    %18 = arith.divf %16, %17 : vector<8x1xf32>
    %19 = vector.broadcast %18 : vector<8x1xf32> to vector<8x32xf32>
    %20 = arith.subf %10, %19 : vector<8x32xf32>
    %21 = arith.mulf %20, %20 : vector<8x32xf32>
    %cst_23 = arith.constant dense<0.000000e+00> : vector<8xf32>
    %22 = vector.multi_reduction <add>, %21, %cst_23 [1] : vector<8x32xf32> to vector<8xf32>
    %23 = vector.shape_cast %22 : vector<8xf32> to vector<8x1xf32>
    %cst_24 = arith.constant 3.200000e+01 : f32
    %24 = vector.broadcast %cst_24 : f32 to vector<8x1xf32>
    %25 = arith.divf %23, %24 : vector<8x1xf32>
    %26 = vector.broadcast %18 : vector<8x1xf32> to vector<8x32xf32>
    %27 = arith.subf %10, %26 : vector<8x32xf32>
    %cst_25 = arith.constant 9.99999974E-6 : f32
    %28 = vector.broadcast %cst_25 : f32 to vector<8x1xf32>
    %29 = arith.addf %25, %28 : vector<8x1xf32>
    %30 = math.rsqrt %29 : vector<8x1xf32>
    %31 = vector.broadcast %30 : vector<8x1xf32> to vector<8x32xf32>
    %32 = arith.mulf %27, %31 : vector<8x32xf32>
    %33 = vector.broadcast %12 : vector<1x32xf32> to vector<8x32xf32>
    %34 = arith.mulf %32, %33 : vector<8x32xf32>
    %35 = vector.broadcast %14 : vector<1x32xf32> to vector<8x32xf32>
    %36 = arith.addf %34, %35 : vector<8x32xf32>
    %cst_26 = arith.constant dense<0.000000e+00> : vector<20x32xf32>
    %37 = tpu.matmul %1, %36, %cst_26 {dimension_numbers = #tpu.dot_dimension_numbers<[1], [0], [0], [1], [0, 0, 1, 1], [], []>} : vector<20x8xf32>, vector<8x32xf32>, vector<20x32xf32> -> vector<20x32xf32>
    %c0_27 = arith.constant 0 : index
    %c0_28 = arith.constant 0 : index
    %c0_29 = arith.constant 0 : index
    %38 = vector.load %arg12[%c0_27, %c0_28, %c0_29] : memref<8x32x24xf32, #tpu.memory_space<vmem>>, vector<1x32x24xf32>
    %39 = vector.shape_cast %38 : vector<1x32x24xf32> to vector<32x24xf32>
    %cst_30 = arith.constant dense<0.000000e+00> : vector<20x24xf32>
    %40 = tpu.matmul %37, %39, %cst_30 {dimension_numbers = #tpu.dot_dimension_numbers<[1], [0], [0], [1], [0, 0, 1, 1], [], []>} : vector<20x32xf32>, vector<32x24xf32>, vector<20x24xf32> -> vector<20x24xf32>
    %c0_31 = arith.constant 0 : index
    %c0_32 = arith.constant 0 : index
    %c0_33 = arith.constant 0 : index
    %41 = vector.load %arg6[%c0_31, %c0_32, %c0_33] : memref<4x20x24xf32, #tpu.memory_space<vmem>>, vector<1x20x24xf32>
    %42 = vector.shape_cast %41 : vector<1x20x24xf32> to vector<20x24xf32>
    %43 = arith.mulf %40, %42 : vector<20x24xf32>
    %c1 = arith.constant 1 : index
    %c0_34 = arith.constant 0 : index
    %c0_35 = arith.constant 0 : index
    %44 = vector.load %arg12[%c1, %c0_34, %c0_35] : memref<8x32x24xf32, #tpu.memory_space<vmem>>, vector<1x32x24xf32>
    %45 = vector.shape_cast %44 : vector<1x32x24xf32> to vector<32x24xf32>
    %cst_36 = arith.constant dense<0.000000e+00> : vector<20x24xf32>
    %46 = tpu.matmul %37, %45, %cst_36 {dimension_numbers = #tpu.dot_dimension_numbers<[1], [0], [0], [1], [0, 0, 1, 1], [], []>} : vector<20x32xf32>, vector<32x24xf32>, vector<20x24xf32> -> vector<20x24xf32>
    %c1_37 = arith.constant 1 : index
    %c0_38 = arith.constant 0 : index
    %c0_39 = arith.constant 0 : index
    %47 = vector.load %arg6[%c1_37, %c0_38, %c0_39] : memref<4x20x24xf32, #tpu.memory_space<vmem>>, vector<1x20x24xf32>
    %48 = vector.shape_cast %47 : vector<1x20x24xf32> to vector<20x24xf32>
    %49 = arith.mulf %46, %48 : vector<20x24xf32>
    %50 = arith.addf %43, %49 : vector<20x24xf32>
    %c2 = arith.constant 2 : index
    %c0_40 = arith.constant 0 : index
    %c0_41 = arith.constant 0 : index
    %51 = vector.load %arg12[%c2, %c0_40, %c0_41] : memref<8x32x24xf32, #tpu.memory_space<vmem>>, vector<1x32x24xf32>
    %52 = vector.shape_cast %51 : vector<1x32x24xf32> to vector<32x24xf32>
    %cst_42 = arith.constant dense<0.000000e+00> : vector<20x24xf32>
    %53 = tpu.matmul %37, %52, %cst_42 {dimension_numbers = #tpu.dot_dimension_numbers<[1], [0], [0], [1], [0, 0, 1, 1], [], []>} : vector<20x32xf32>, vector<32x24xf32>, vector<20x24xf32> -> vector<20x24xf32>
    %c2_43 = arith.constant 2 : index
    %c0_44 = arith.constant 0 : index
    %c0_45 = arith.constant 0 : index
    %54 = vector.load %arg6[%c2_43, %c0_44, %c0_45] : memref<4x20x24xf32, #tpu.memory_space<vmem>>, vector<1x20x24xf32>
    %55 = vector.shape_cast %54 : vector<1x20x24xf32> to vector<20x24xf32>
    %56 = arith.mulf %53, %55 : vector<20x24xf32>
    %57 = arith.addf %50, %56 : vector<20x24xf32>
    %c3 = arith.constant 3 : index
    %c0_46 = arith.constant 0 : index
    %c0_47 = arith.constant 0 : index
    %58 = vector.load %arg12[%c3, %c0_46, %c0_47] : memref<8x32x24xf32, #tpu.memory_space<vmem>>, vector<1x32x24xf32>
    %59 = vector.shape_cast %58 : vector<1x32x24xf32> to vector<32x24xf32>
    %cst_48 = arith.constant dense<0.000000e+00> : vector<20x24xf32>
    %60 = tpu.matmul %37, %59, %cst_48 {dimension_numbers = #tpu.dot_dimension_numbers<[1], [0], [0], [1], [0, 0, 1, 1], [], []>} : vector<20x32xf32>, vector<32x24xf32>, vector<20x24xf32> -> vector<20x24xf32>
    %c3_49 = arith.constant 3 : index
    %c0_50 = arith.constant 0 : index
    %c0_51 = arith.constant 0 : index
    %61 = vector.load %arg6[%c3_49, %c0_50, %c0_51] : memref<4x20x24xf32, #tpu.memory_space<vmem>>, vector<1x20x24xf32>
    %62 = vector.shape_cast %61 : vector<1x20x24xf32> to vector<20x24xf32>
    %63 = arith.mulf %60, %62 : vector<20x24xf32>
    %64 = arith.addf %57, %63 : vector<20x24xf32>
    %65 = vector.extract_strided_slice %64 {offsets = [0, 0], sizes = [20, 8], strides = [1, 1]} : vector<20x24xf32> to vector<20x8xf32>
    %cst_52 = arith.constant 0.353553385 : f32
    %66 = vector.broadcast %cst_52 : f32 to vector<20x8xf32>
    %67 = arith.mulf %65, %66 : vector<20x8xf32>
    %68 = vector.extract_strided_slice %64 {offsets = [0, 8], sizes = [20, 8], strides = [1, 1]} : vector<20x24xf32> to vector<20x8xf32>
    %69 = vector.extract_strided_slice %64 {offsets = [0, 16], sizes = [20, 8], strides = [1, 1]} : vector<20x24xf32> to vector<20x8xf32>
    %cst_53 = arith.constant dense<0.000000e+00> : vector<20x20xf32>
    %70 = tpu.matmul %67, %68, %cst_53 {dimension_numbers = #tpu.dot_dimension_numbers<[1], [1], [0], [0], [0, 0, 1, 0], [], []>} : vector<20x8xf32>, vector<20x8xf32>, vector<20x20xf32> -> vector<20x20xf32>
    %71 = arith.addf %70, %3 : vector<20x20xf32>
    %cst_54 = arith.constant dense<0xFF800000> : vector<20xf32>
    %72 = vector.multi_reduction <maximumf>, %71, %cst_54 [1] : vector<20x20xf32> to vector<20xf32>
    %73 = vector.shape_cast %72 : vector<20xf32> to vector<20x1xf32>
    %74 = vector.broadcast %73 : vector<20x1xf32> to vector<20x20xf32>
    %75 = arith.subf %71, %74 : vector<20x20xf32>
    %76 = math.exp %75 : vector<20x20xf32>
    %cst_55 = arith.constant dense<0.000000e+00> : vector<20xf32>
    %77 = vector.multi_reduction <add>, %76, %cst_55 [1] : vector<20x20xf32> to vector<20xf32>
    %78 = vector.shape_cast %77 : vector<20xf32> to vector<20x1xf32>
    %79 = tpu.reciprocal %78 : vector<20x1xf32> -> vector<20x1xf32>
    %80 = vector.broadcast %79 : vector<20x1xf32> to vector<20x20xf32>
    %81 = arith.mulf %76, %80 : vector<20x20xf32>
    %cst_56 = arith.constant dense<0.000000e+00> : vector<20x8xf32>
    %82 = tpu.matmul %81, %69, %cst_56 {dimension_numbers = #tpu.dot_dimension_numbers<[1], [0], [0], [1], [0, 0, 1, 1], [], []>} : vector<20x20xf32>, vector<20x8xf32>, vector<20x8xf32> -> vector<20x8xf32>
    %c0_57 = arith.constant 0 : index
    %c0_58 = arith.constant 0 : index
    %c0_59 = arith.constant 0 : index
    %83 = vector.load %arg13[%c0_57, %c0_58, %c0_59] : memref<8x8x32xf32, #tpu.memory_space<vmem>>, vector<1x8x32xf32>
    %84 = vector.shape_cast %83 : vector<1x8x32xf32> to vector<8x32xf32>
    %cst_60 = arith.constant dense<0.000000e+00> : vector<20x32xf32>
    %85 = tpu.matmul %82, %84, %cst_60 {dimension_numbers = #tpu.dot_dimension_numbers<[1], [0], [0], [1], [0, 0, 1, 1], [], []>} : vector<20x8xf32>, vector<8x32xf32>, vector<20x32xf32> -> vector<20x32xf32>
    %c0_61 = arith.constant 0 : index
    %c0_62 = arith.constant 0 : index
    %c0_63 = arith.constant 0 : index
    %86 = vector.load %arg7[%c0_61, %c0_62, %c0_63] : memref<4x20x32xf32, #tpu.memory_space<vmem>>, vector<1x20x32xf32>
    %87 = vector.shape_cast %86 : vector<1x20x32xf32> to vector<20x32xf32>
    %88 = arith.mulf %85, %87 : vector<20x32xf32>
    %c1_64 = arith.constant 1 : index
    %c0_65 = arith.constant 0 : index
    %c0_66 = arith.constant 0 : index
    %89 = vector.load %arg13[%c1_64, %c0_65, %c0_66] : memref<8x8x32xf32, #tpu.memory_space<vmem>>, vector<1x8x32xf32>
    %90 = vector.shape_cast %89 : vector<1x8x32xf32> to vector<8x32xf32>
    %cst_67 = arith.constant dense<0.000000e+00> : vector<20x32xf32>
    %91 = tpu.matmul %82, %90, %cst_67 {dimension_numbers = #tpu.dot_dimension_numbers<[1], [0], [0], [1], [0, 0, 1, 1], [], []>} : vector<20x8xf32>, vector<8x32xf32>, vector<20x32xf32> -> vector<20x32xf32>
    %c1_68 = arith.constant 1 : index
    %c0_69 = arith.constant 0 : index
    %c0_70 = arith.constant 0 : index
    %92 = vector.load %arg7[%c1_68, %c0_69, %c0_70] : memref<4x20x32xf32, #tpu.memory_space<vmem>>, vector<1x20x32xf32>
    %93 = vector.shape_cast %92 : vector<1x20x32xf32> to vector<20x32xf32>
    %94 = arith.mulf %91, %93 : vector<20x32xf32>
    %95 = arith.addf %88, %94 : vector<20x32xf32>
    %c2_71 = arith.constant 2 : index
    %c0_72 = arith.constant 0 : index
    %c0_73 = arith.constant 0 : index
    %96 = vector.load %arg13[%c2_71, %c0_72, %c0_73] : memref<8x8x32xf32, #tpu.memory_space<vmem>>, vector<1x8x32xf32>
    %97 = vector.shape_cast %96 : vector<1x8x32xf32> to vector<8x32xf32>
    %cst_74 = arith.constant dense<0.000000e+00> : vector<20x32xf32>
    %98 = tpu.matmul %82, %97, %cst_74 {dimension_numbers = #tpu.dot_dimension_numbers<[1], [0], [0], [1], [0, 0, 1, 1], [], []>} : vector<20x8xf32>, vector<8x32xf32>, vector<20x32xf32> -> vector<20x32xf32>
    %c2_75 = arith.constant 2 : index
    %c0_76 = arith.constant 0 : index
    %c0_77 = arith.constant 0 : index
    %99 = vector.load %arg7[%c2_75, %c0_76, %c0_77] : memref<4x20x32xf32, #tpu.memory_space<vmem>>, vector<1x20x32xf32>
    %100 = vector.shape_cast %99 : vector<1x20x32xf32> to vector<20x32xf32>
    %101 = arith.mulf %98, %100 : vector<20x32xf32>
    %102 = arith.addf %95, %101 : vector<20x32xf32>
    %c3_78 = arith.constant 3 : index
    %c0_79 = arith.constant 0 : index
    %c0_80 = arith.constant 0 : index
    %103 = vector.load %arg13[%c3_78, %c0_79, %c0_80] : memref<8x8x32xf32, #tpu.memory_space<vmem>>, vector<1x8x32xf32>
    %104 = vector.shape_cast %103 : vector<1x8x32xf32> to vector<8x32xf32>
    %cst_81 = arith.constant dense<0.000000e+00> : vector<20x32xf32>
    %105 = tpu.matmul %82, %104, %cst_81 {dimension_numbers = #tpu.dot_dimension_numbers<[1], [0], [0], [1], [0, 0, 1, 1], [], []>} : vector<20x8xf32>, vector<8x32xf32>, vector<20x32xf32> -> vector<20x32xf32>
    %c3_82 = arith.constant 3 : index
    %c0_83 = arith.constant 0 : index
    %c0_84 = arith.constant 0 : index
    %106 = vector.load %arg7[%c3_82, %c0_83, %c0_84] : memref<4x20x32xf32, #tpu.memory_space<vmem>>, vector<1x20x32xf32>
    %107 = vector.shape_cast %106 : vector<1x20x32xf32> to vector<20x32xf32>
    %108 = arith.mulf %105, %107 : vector<20x32xf32>
    %109 = arith.addf %102, %108 : vector<20x32xf32>
    %cst_85 = arith.constant dense<0.000000e+00> : vector<8x32xf32>
    %110 = tpu.matmul %2, %109, %cst_85 {dimension_numbers = #tpu.dot_dimension_numbers<[1], [0], [0], [1], [0, 0, 1, 1], [], []>} : vector<8x20xf32>, vector<20x32xf32>, vector<8x32xf32> -> vector<8x32xf32>
    %111 = arith.addf %10, %110 : vector<8x32xf32>
    %c0_86 = arith.constant 0 : index
    %c0_87 = arith.constant 0 : index
    %c0_88 = arith.constant 0 : index
    %112 = vector.load %arg14[%c0_86, %c0_87, %c0_88] : memref<2x1x32xf32, #tpu.memory_space<vmem>>, vector<1x1x32xf32>
    %113 = vector.shape_cast %112 : vector<1x1x32xf32> to vector<1x32xf32>
    %114 = vector.broadcast %113 : vector<1x32xf32> to vector<8x32xf32>
    %115 = arith.addf %111, %114 : vector<8x32xf32>
    %c0_89 = arith.constant 0 : index
    %c0_90 = arith.constant 0 : index
    %c0_91 = arith.constant 0 : index
    %116 = vector.load %arg15[%c0_89, %c0_90, %c0_91] : memref<2x1x32xf32, #tpu.memory_space<vmem>>, vector<1x1x32xf32>
    %117 = vector.shape_cast %116 : vector<1x1x32xf32> to vector<1x32xf32>
    %c0_92 = arith.constant 0 : index
    %c0_93 = arith.constant 0 : index
    %c0_94 = arith.constant 0 : index
    %118 = vector.load %arg16[%c0_92, %c0_93, %c0_94] : memref<2x1x32xf32, #tpu.memory_space<vmem>>, vector<1x1x32xf32>
    %119 = vector.shape_cast %118 : vector<1x1x32xf32> to vector<1x32xf32>
    %cst_95 = arith.constant dense<0.000000e+00> : vector<8xf32>
    %120 = vector.multi_reduction <add>, %115, %cst_95 [1] : vector<8x32xf32> to vector<8xf32>
    %121 = vector.shape_cast %120 : vector<8xf32> to vector<8x1xf32>
    %cst_96 = arith.constant 3.200000e+01 : f32
    %122 = vector.broadcast %cst_96 : f32 to vector<8x1xf32>
    %123 = arith.divf %121, %122 : vector<8x1xf32>
    %124 = vector.broadcast %123 : vector<8x1xf32> to vector<8x32xf32>
    %125 = arith.subf %115, %124 : vector<8x32xf32>
    %126 = arith.mulf %125, %125 : vector<8x32xf32>
    %cst_97 = arith.constant dense<0.000000e+00> : vector<8xf32>
    %127 = vector.multi_reduction <add>, %126, %cst_97 [1] : vector<8x32xf32> to vector<8xf32>
    %128 = vector.shape_cast %127 : vector<8xf32> to vector<8x1xf32>
    %cst_98 = arith.constant 3.200000e+01 : f32
    %129 = vector.broadcast %cst_98 : f32 to vector<8x1xf32>
    %130 = arith.divf %128, %129 : vector<8x1xf32>
    %131 = vector.broadcast %123 : vector<8x1xf32> to vector<8x32xf32>
    %132 = arith.subf %115, %131 : vector<8x32xf32>
    %cst_99 = arith.constant 9.99999974E-6 : f32
    %133 = vector.broadcast %cst_99 : f32 to vector<8x1xf32>
    %134 = arith.addf %130, %133 : vector<8x1xf32>
    %135 = math.rsqrt %134 : vector<8x1xf32>
    %136 = vector.broadcast %135 : vector<8x1xf32> to vector<8x32xf32>
    %137 = arith.mulf %132, %136 : vector<8x32xf32>
    %138 = vector.broadcast %117 : vector<1x32xf32> to vector<8x32xf32>
    %139 = arith.mulf %137, %138 : vector<8x32xf32>
    %140 = vector.broadcast %119 : vector<1x32xf32> to vector<8x32xf32>
    %141 = arith.addf %139, %140 : vector<8x32xf32>
    %c0_100 = arith.constant 0 : index
    %c0_101 = arith.constant 0 : index
    %c0_102 = arith.constant 0 : index
    %142 = vector.load %arg17[%c0_100, %c0_101, %c0_102] : memref<2x32x64xf32, #tpu.memory_space<vmem>>, vector<1x32x64xf32>
    %143 = vector.shape_cast %142 : vector<1x32x64xf32> to vector<32x64xf32>
    %cst_103 = arith.constant dense<0.000000e+00> : vector<8x64xf32>
    %144 = tpu.matmul %141, %143, %cst_103 {dimension_numbers = #tpu.dot_dimension_numbers<[1], [0], [0], [1], [0, 0, 1, 1], [], []>} : vector<8x32xf32>, vector<32x64xf32>, vector<8x64xf32> -> vector<8x64xf32>
    %c0_104 = arith.constant 0 : index
    %c0_105 = arith.constant 0 : index
    %c0_106 = arith.constant 0 : index
    %145 = vector.load %arg18[%c0_104, %c0_105, %c0_106] : memref<2x1x64xf32, #tpu.memory_space<vmem>>, vector<1x1x64xf32>
    %146 = vector.shape_cast %145 : vector<1x1x64xf32> to vector<1x64xf32>
    %147 = vector.broadcast %146 : vector<1x64xf32> to vector<8x64xf32>
    %148 = arith.addf %144, %147 : vector<8x64xf32>
    %cst_107 = arith.constant 5.000000e-01 : f32
    %149 = vector.broadcast %cst_107 : f32 to vector<8x64xf32>
    %150 = arith.mulf %149, %148 : vector<8x64xf32>
    %cst_108 = arith.constant 0.707106769 : f32
    %151 = vector.broadcast %cst_108 : f32 to vector<8x64xf32>
    %152 = arith.mulf %148, %151 : vector<8x64xf32>
    %153 = math.absf %152 : vector<8x64xf32>
    %cst_109 = arith.constant 0.327591091 : f32
    %154 = vector.broadcast %cst_109 : f32 to vector<8x64xf32>
    %155 = arith.mulf %154, %153 : vector<8x64xf32>
    %cst_110 = arith.constant 1.000000e+00 : f32
    %156 = vector.broadcast %cst_110 : f32 to vector<8x64xf32>
    %157 = arith.addf %156, %155 : vector<8x64xf32>
    %cst_111 = arith.constant 1.000000e+00 : f32
    %158 = vector.broadcast %cst_111 : f32 to vector<8x64xf32>
    %159 = arith.divf %158, %157 : vector<8x64xf32>
    %cst_112 = arith.constant 1.06140542 : f32
    %160 = vector.broadcast %cst_112 : f32 to vector<8x64xf32>
    %161 = arith.mulf %160, %159 : vector<8x64xf32>
    %cst_113 = arith.constant -1.45315206 : f32
    %162 = vector.broadcast %cst_113 : f32 to vector<8x64xf32>
    %163 = arith.addf %161, %162 : vector<8x64xf32>
    %164 = arith.mulf %163, %159 : vector<8x64xf32>
    %cst_114 = arith.constant 1.42141378 : f32
    %165 = vector.broadcast %cst_114 : f32 to vector<8x64xf32>
    %166 = arith.addf %164, %165 : vector<8x64xf32>
    %167 = arith.mulf %166, %159 : vector<8x64xf32>
    %cst_115 = arith.constant -0.284496725 : f32
    %168 = vector.broadcast %cst_115 : f32 to vector<8x64xf32>
    %169 = arith.addf %167, %168 : vector<8x64xf32>
    %170 = arith.mulf %169, %159 : vector<8x64xf32>
    %cst_116 = arith.constant 0.254829586 : f32
    %171 = vector.broadcast %cst_116 : f32 to vector<8x64xf32>
    %172 = arith.addf %170, %171 : vector<8x64xf32>
    %173 = arith.mulf %172, %159 : vector<8x64xf32>
    %cst_117 = arith.constant 0.000000e+00 : f32
    %174 = vector.broadcast %cst_117 : f32 to vector<8x64xf32>
    %175 = arith.subf %174, %153 : vector<8x64xf32>
    %176 = arith.mulf %175, %153 : vector<8x64xf32>
    %177 = math.exp %176 : vector<8x64xf32>
    %178 = arith.mulf %173, %177 : vector<8x64xf32>
    %cst_118 = arith.constant 1.000000e+00 : f32
    %179 = vector.broadcast %cst_118 : f32 to vector<8x64xf32>
    %180 = arith.subf %179, %178 : vector<8x64xf32>
    %cst_119 = arith.constant 0.000000e+00 : f32
    %181 = vector.broadcast %cst_119 : f32 to vector<8x64xf32>
    %182 = arith.cmpf olt, %152, %181 : vector<8x64xf32>
    %cst_120 = arith.constant 0.000000e+00 : f32
    %183 = vector.broadcast %cst_120 : f32 to vector<8x64xf32>
    %184 = arith.subf %183, %180 : vector<8x64xf32>
    %185 = arith.select %182, %184, %180 : vector<8x64xi1>, vector<8x64xf32>
    %cst_121 = arith.constant 1.000000e+00 : f32
    %186 = vector.broadcast %cst_121 : f32 to vector<8x64xf32>
    %187 = arith.addf %186, %185 : vector<8x64xf32>
    %188 = arith.mulf %150, %187 : vector<8x64xf32>
    %c0_122 = arith.constant 0 : index
    %c0_123 = arith.constant 0 : index
    %c0_124 = arith.constant 0 : index
    %189 = vector.load %arg19[%c0_122, %c0_123, %c0_124] : memref<2x64x32xf32, #tpu.memory_space<vmem>>, vector<1x64x32xf32>
    %190 = vector.shape_cast %189 : vector<1x64x32xf32> to vector<64x32xf32>
    %cst_125 = arith.constant dense<0.000000e+00> : vector<8x32xf32>
    %191 = tpu.matmul %188, %190, %cst_125 {dimension_numbers = #tpu.dot_dimension_numbers<[1], [0], [0], [1], [0, 0, 1, 1], [], []>} : vector<8x64xf32>, vector<64x32xf32>, vector<8x32xf32> -> vector<8x32xf32>
    %192 = arith.addf %115, %191 : vector<8x32xf32>
    %c0_126 = arith.constant 0 : index
    %c0_127 = arith.constant 0 : index
    %c0_128 = arith.constant 0 : index
    %193 = vector.load %arg20[%c0_126, %c0_127, %c0_128] : memref<2x1x32xf32, #tpu.memory_space<vmem>>, vector<1x1x32xf32>
    %194 = vector.shape_cast %193 : vector<1x1x32xf32> to vector<1x32xf32>
    %195 = vector.broadcast %194 : vector<1x32xf32> to vector<8x32xf32>
    %196 = arith.addf %192, %195 : vector<8x32xf32>
    %c1_129 = arith.constant 1 : index
    %c0_130 = arith.constant 0 : index
    %c0_131 = arith.constant 0 : index
    %197 = vector.load %arg10[%c1_129, %c0_130, %c0_131] : memref<2x1x32xf32, #tpu.memory_space<vmem>>, vector<1x1x32xf32>
    %198 = vector.shape_cast %197 : vector<1x1x32xf32> to vector<1x32xf32>
    %c1_132 = arith.constant 1 : index
    %c0_133 = arith.constant 0 : index
    %c0_134 = arith.constant 0 : index
    %199 = vector.load %arg11[%c1_132, %c0_133, %c0_134] : memref<2x1x32xf32, #tpu.memory_space<vmem>>, vector<1x1x32xf32>
    %200 = vector.shape_cast %199 : vector<1x1x32xf32> to vector<1x32xf32>
    %cst_135 = arith.constant dense<0.000000e+00> : vector<8xf32>
    %201 = vector.multi_reduction <add>, %196, %cst_135 [1] : vector<8x32xf32> to vector<8xf32>
    %202 = vector.shape_cast %201 : vector<8xf32> to vector<8x1xf32>
    %cst_136 = arith.constant 3.200000e+01 : f32
    %203 = vector.broadcast %cst_136 : f32 to vector<8x1xf32>
    %204 = arith.divf %202, %203 : vector<8x1xf32>
    %205 = vector.broadcast %204 : vector<8x1xf32> to vector<8x32xf32>
    %206 = arith.subf %196, %205 : vector<8x32xf32>
    %207 = arith.mulf %206, %206 : vector<8x32xf32>
    %cst_137 = arith.constant dense<0.000000e+00> : vector<8xf32>
    %208 = vector.multi_reduction <add>, %207, %cst_137 [1] : vector<8x32xf32> to vector<8xf32>
    %209 = vector.shape_cast %208 : vector<8xf32> to vector<8x1xf32>
    %cst_138 = arith.constant 3.200000e+01 : f32
    %210 = vector.broadcast %cst_138 : f32 to vector<8x1xf32>
    %211 = arith.divf %209, %210 : vector<8x1xf32>
    %212 = vector.broadcast %204 : vector<8x1xf32> to vector<8x32xf32>
    %213 = arith.subf %196, %212 : vector<8x32xf32>
    %cst_139 = arith.constant 9.99999974E-6 : f32
    %214 = vector.broadcast %cst_139 : f32 to vector<8x1xf32>
    %215 = arith.addf %211, %214 : vector<8x1xf32>
    %216 = math.rsqrt %215 : vector<8x1xf32>
    %217 = vector.broadcast %216 : vector<8x1xf32> to vector<8x32xf32>
    %218 = arith.mulf %213, %217 : vector<8x32xf32>
    %219 = vector.broadcast %198 : vector<1x32xf32> to vector<8x32xf32>
    %220 = arith.mulf %218, %219 : vector<8x32xf32>
    %221 = vector.broadcast %200 : vector<1x32xf32> to vector<8x32xf32>
    %222 = arith.addf %220, %221 : vector<8x32xf32>
    %cst_140 = arith.constant dense<0.000000e+00> : vector<20x32xf32>
    %223 = tpu.matmul %1, %222, %cst_140 {dimension_numbers = #tpu.dot_dimension_numbers<[1], [0], [0], [1], [0, 0, 1, 1], [], []>} : vector<20x8xf32>, vector<8x32xf32>, vector<20x32xf32> -> vector<20x32xf32>
    %c4 = arith.constant 4 : index
    %c0_141 = arith.constant 0 : index
    %c0_142 = arith.constant 0 : index
    %224 = vector.load %arg12[%c4, %c0_141, %c0_142] : memref<8x32x24xf32, #tpu.memory_space<vmem>>, vector<1x32x24xf32>
    %225 = vector.shape_cast %224 : vector<1x32x24xf32> to vector<32x24xf32>
    %cst_143 = arith.constant dense<0.000000e+00> : vector<20x24xf32>
    %226 = tpu.matmul %223, %225, %cst_143 {dimension_numbers = #tpu.dot_dimension_numbers<[1], [0], [0], [1], [0, 0, 1, 1], [], []>} : vector<20x32xf32>, vector<32x24xf32>, vector<20x24xf32> -> vector<20x24xf32>
    %c0_144 = arith.constant 0 : index
    %c0_145 = arith.constant 0 : index
    %c0_146 = arith.constant 0 : index
    %227 = vector.load %arg6[%c0_144, %c0_145, %c0_146] : memref<4x20x24xf32, #tpu.memory_space<vmem>>, vector<1x20x24xf32>
    %228 = vector.shape_cast %227 : vector<1x20x24xf32> to vector<20x24xf32>
    %229 = arith.mulf %226, %228 : vector<20x24xf32>
    %c5 = arith.constant 5 : index
    %c0_147 = arith.constant 0 : index
    %c0_148 = arith.constant 0 : index
    %230 = vector.load %arg12[%c5, %c0_147, %c0_148] : memref<8x32x24xf32, #tpu.memory_space<vmem>>, vector<1x32x24xf32>
    %231 = vector.shape_cast %230 : vector<1x32x24xf32> to vector<32x24xf32>
    %cst_149 = arith.constant dense<0.000000e+00> : vector<20x24xf32>
    %232 = tpu.matmul %223, %231, %cst_149 {dimension_numbers = #tpu.dot_dimension_numbers<[1], [0], [0], [1], [0, 0, 1, 1], [], []>} : vector<20x32xf32>, vector<32x24xf32>, vector<20x24xf32> -> vector<20x24xf32>
    %c1_150 = arith.constant 1 : index
    %c0_151 = arith.constant 0 : index
    %c0_152 = arith.constant 0 : index
    %233 = vector.load %arg6[%c1_150, %c0_151, %c0_152] : memref<4x20x24xf32, #tpu.memory_space<vmem>>, vector<1x20x24xf32>
    %234 = vector.shape_cast %233 : vector<1x20x24xf32> to vector<20x24xf32>
    %235 = arith.mulf %232, %234 : vector<20x24xf32>
    %236 = arith.addf %229, %235 : vector<20x24xf32>
    %c6 = arith.constant 6 : index
    %c0_153 = arith.constant 0 : index
    %c0_154 = arith.constant 0 : index
    %237 = vector.load %arg12[%c6, %c0_153, %c0_154] : memref<8x32x24xf32, #tpu.memory_space<vmem>>, vector<1x32x24xf32>
    %238 = vector.shape_cast %237 : vector<1x32x24xf32> to vector<32x24xf32>
    %cst_155 = arith.constant dense<0.000000e+00> : vector<20x24xf32>
    %239 = tpu.matmul %223, %238, %cst_155 {dimension_numbers = #tpu.dot_dimension_numbers<[1], [0], [0], [1], [0, 0, 1, 1], [], []>} : vector<20x32xf32>, vector<32x24xf32>, vector<20x24xf32> -> vector<20x24xf32>
    %c2_156 = arith.constant 2 : index
    %c0_157 = arith.constant 0 : index
    %c0_158 = arith.constant 0 : index
    %240 = vector.load %arg6[%c2_156, %c0_157, %c0_158] : memref<4x20x24xf32, #tpu.memory_space<vmem>>, vector<1x20x24xf32>
    %241 = vector.shape_cast %240 : vector<1x20x24xf32> to vector<20x24xf32>
    %242 = arith.mulf %239, %241 : vector<20x24xf32>
    %243 = arith.addf %236, %242 : vector<20x24xf32>
    %c7 = arith.constant 7 : index
    %c0_159 = arith.constant 0 : index
    %c0_160 = arith.constant 0 : index
    %244 = vector.load %arg12[%c7, %c0_159, %c0_160] : memref<8x32x24xf32, #tpu.memory_space<vmem>>, vector<1x32x24xf32>
    %245 = vector.shape_cast %244 : vector<1x32x24xf32> to vector<32x24xf32>
    %cst_161 = arith.constant dense<0.000000e+00> : vector<20x24xf32>
    %246 = tpu.matmul %223, %245, %cst_161 {dimension_numbers = #tpu.dot_dimension_numbers<[1], [0], [0], [1], [0, 0, 1, 1], [], []>} : vector<20x32xf32>, vector<32x24xf32>, vector<20x24xf32> -> vector<20x24xf32>
    %c3_162 = arith.constant 3 : index
    %c0_163 = arith.constant 0 : index
    %c0_164 = arith.constant 0 : index
    %247 = vector.load %arg6[%c3_162, %c0_163, %c0_164] : memref<4x20x24xf32, #tpu.memory_space<vmem>>, vector<1x20x24xf32>
    %248 = vector.shape_cast %247 : vector<1x20x24xf32> to vector<20x24xf32>
    %249 = arith.mulf %246, %248 : vector<20x24xf32>
    %250 = arith.addf %243, %249 : vector<20x24xf32>
    %251 = vector.extract_strided_slice %250 {offsets = [0, 0], sizes = [20, 8], strides = [1, 1]} : vector<20x24xf32> to vector<20x8xf32>
    %cst_165 = arith.constant 0.353553385 : f32
    %252 = vector.broadcast %cst_165 : f32 to vector<20x8xf32>
    %253 = arith.mulf %251, %252 : vector<20x8xf32>
    %254 = vector.extract_strided_slice %250 {offsets = [0, 8], sizes = [20, 8], strides = [1, 1]} : vector<20x24xf32> to vector<20x8xf32>
    %255 = vector.extract_strided_slice %250 {offsets = [0, 16], sizes = [20, 8], strides = [1, 1]} : vector<20x24xf32> to vector<20x8xf32>
    %cst_166 = arith.constant dense<0.000000e+00> : vector<20x20xf32>
    %256 = tpu.matmul %253, %254, %cst_166 {dimension_numbers = #tpu.dot_dimension_numbers<[1], [1], [0], [0], [0, 0, 1, 0], [], []>} : vector<20x8xf32>, vector<20x8xf32>, vector<20x20xf32> -> vector<20x20xf32>
    %257 = arith.addf %256, %3 : vector<20x20xf32>
    %cst_167 = arith.constant dense<0xFF800000> : vector<20xf32>
    %258 = vector.multi_reduction <maximumf>, %257, %cst_167 [1] : vector<20x20xf32> to vector<20xf32>
    %259 = vector.shape_cast %258 : vector<20xf32> to vector<20x1xf32>
    %260 = vector.broadcast %259 : vector<20x1xf32> to vector<20x20xf32>
    %261 = arith.subf %257, %260 : vector<20x20xf32>
    %262 = math.exp %261 : vector<20x20xf32>
    %cst_168 = arith.constant dense<0.000000e+00> : vector<20xf32>
    %263 = vector.multi_reduction <add>, %262, %cst_168 [1] : vector<20x20xf32> to vector<20xf32>
    %264 = vector.shape_cast %263 : vector<20xf32> to vector<20x1xf32>
    %265 = tpu.reciprocal %264 : vector<20x1xf32> -> vector<20x1xf32>
    %266 = vector.broadcast %265 : vector<20x1xf32> to vector<20x20xf32>
    %267 = arith.mulf %262, %266 : vector<20x20xf32>
    %cst_169 = arith.constant dense<0.000000e+00> : vector<20x8xf32>
    %268 = tpu.matmul %267, %255, %cst_169 {dimension_numbers = #tpu.dot_dimension_numbers<[1], [0], [0], [1], [0, 0, 1, 1], [], []>} : vector<20x20xf32>, vector<20x8xf32>, vector<20x8xf32> -> vector<20x8xf32>
    %c4_170 = arith.constant 4 : index
    %c0_171 = arith.constant 0 : index
    %c0_172 = arith.constant 0 : index
    %269 = vector.load %arg13[%c4_170, %c0_171, %c0_172] : memref<8x8x32xf32, #tpu.memory_space<vmem>>, vector<1x8x32xf32>
    %270 = vector.shape_cast %269 : vector<1x8x32xf32> to vector<8x32xf32>
    %cst_173 = arith.constant dense<0.000000e+00> : vector<20x32xf32>
    %271 = tpu.matmul %268, %270, %cst_173 {dimension_numbers = #tpu.dot_dimension_numbers<[1], [0], [0], [1], [0, 0, 1, 1], [], []>} : vector<20x8xf32>, vector<8x32xf32>, vector<20x32xf32> -> vector<20x32xf32>
    %c0_174 = arith.constant 0 : index
    %c0_175 = arith.constant 0 : index
    %c0_176 = arith.constant 0 : index
    %272 = vector.load %arg7[%c0_174, %c0_175, %c0_176] : memref<4x20x32xf32, #tpu.memory_space<vmem>>, vector<1x20x32xf32>
    %273 = vector.shape_cast %272 : vector<1x20x32xf32> to vector<20x32xf32>
    %274 = arith.mulf %271, %273 : vector<20x32xf32>
    %c5_177 = arith.constant 5 : index
    %c0_178 = arith.constant 0 : index
    %c0_179 = arith.constant 0 : index
    %275 = vector.load %arg13[%c5_177, %c0_178, %c0_179] : memref<8x8x32xf32, #tpu.memory_space<vmem>>, vector<1x8x32xf32>
    %276 = vector.shape_cast %275 : vector<1x8x32xf32> to vector<8x32xf32>
    %cst_180 = arith.constant dense<0.000000e+00> : vector<20x32xf32>
    %277 = tpu.matmul %268, %276, %cst_180 {dimension_numbers = #tpu.dot_dimension_numbers<[1], [0], [0], [1], [0, 0, 1, 1], [], []>} : vector<20x8xf32>, vector<8x32xf32>, vector<20x32xf32> -> vector<20x32xf32>
    %c1_181 = arith.constant 1 : index
    %c0_182 = arith.constant 0 : index
    %c0_183 = arith.constant 0 : index
    %278 = vector.load %arg7[%c1_181, %c0_182, %c0_183] : memref<4x20x32xf32, #tpu.memory_space<vmem>>, vector<1x20x32xf32>
    %279 = vector.shape_cast %278 : vector<1x20x32xf32> to vector<20x32xf32>
    %280 = arith.mulf %277, %279 : vector<20x32xf32>
    %281 = arith.addf %274, %280 : vector<20x32xf32>
    %c6_184 = arith.constant 6 : index
    %c0_185 = arith.constant 0 : index
    %c0_186 = arith.constant 0 : index
    %282 = vector.load %arg13[%c6_184, %c0_185, %c0_186] : memref<8x8x32xf32, #tpu.memory_space<vmem>>, vector<1x8x32xf32>
    %283 = vector.shape_cast %282 : vector<1x8x32xf32> to vector<8x32xf32>
    %cst_187 = arith.constant dense<0.000000e+00> : vector<20x32xf32>
    %284 = tpu.matmul %268, %283, %cst_187 {dimension_numbers = #tpu.dot_dimension_numbers<[1], [0], [0], [1], [0, 0, 1, 1], [], []>} : vector<20x8xf32>, vector<8x32xf32>, vector<20x32xf32> -> vector<20x32xf32>
    %c2_188 = arith.constant 2 : index
    %c0_189 = arith.constant 0 : index
    %c0_190 = arith.constant 0 : index
    %285 = vector.load %arg7[%c2_188, %c0_189, %c0_190] : memref<4x20x32xf32, #tpu.memory_space<vmem>>, vector<1x20x32xf32>
    %286 = vector.shape_cast %285 : vector<1x20x32xf32> to vector<20x32xf32>
    %287 = arith.mulf %284, %286 : vector<20x32xf32>
    %288 = arith.addf %281, %287 : vector<20x32xf32>
    %c7_191 = arith.constant 7 : index
    %c0_192 = arith.constant 0 : index
    %c0_193 = arith.constant 0 : index
    %289 = vector.load %arg13[%c7_191, %c0_192, %c0_193] : memref<8x8x32xf32, #tpu.memory_space<vmem>>, vector<1x8x32xf32>
    %290 = vector.shape_cast %289 : vector<1x8x32xf32> to vector<8x32xf32>
    %cst_194 = arith.constant dense<0.000000e+00> : vector<20x32xf32>
    %291 = tpu.matmul %268, %290, %cst_194 {dimension_numbers = #tpu.dot_dimension_numbers<[1], [0], [0], [1], [0, 0, 1, 1], [], []>} : vector<20x8xf32>, vector<8x32xf32>, vector<20x32xf32> -> vector<20x32xf32>
    %c3_195 = arith.constant 3 : index
    %c0_196 = arith.constant 0 : index
    %c0_197 = arith.constant 0 : index
    %292 = vector.load %arg7[%c3_195, %c0_196, %c0_197] : memref<4x20x32xf32, #tpu.memory_space<vmem>>, vector<1x20x32xf32>
    %293 = vector.shape_cast %292 : vector<1x20x32xf32> to vector<20x32xf32>
    %294 = arith.mulf %291, %293 : vector<20x32xf32>
    %295 = arith.addf %288, %294 : vector<20x32xf32>
    %cst_198 = arith.constant dense<0.000000e+00> : vector<8x32xf32>
    %296 = tpu.matmul %2, %295, %cst_198 {dimension_numbers = #tpu.dot_dimension_numbers<[1], [0], [0], [1], [0, 0, 1, 1], [], []>} : vector<8x20xf32>, vector<20x32xf32>, vector<8x32xf32> -> vector<8x32xf32>
    %297 = arith.addf %196, %296 : vector<8x32xf32>
    %c1_199 = arith.constant 1 : index
    %c0_200 = arith.constant 0 : index
    %c0_201 = arith.constant 0 : index
    %298 = vector.load %arg14[%c1_199, %c0_200, %c0_201] : memref<2x1x32xf32, #tpu.memory_space<vmem>>, vector<1x1x32xf32>
    %299 = vector.shape_cast %298 : vector<1x1x32xf32> to vector<1x32xf32>
    %300 = vector.broadcast %299 : vector<1x32xf32> to vector<8x32xf32>
    %301 = arith.addf %297, %300 : vector<8x32xf32>
    %c1_202 = arith.constant 1 : index
    %c0_203 = arith.constant 0 : index
    %c0_204 = arith.constant 0 : index
    %302 = vector.load %arg15[%c1_202, %c0_203, %c0_204] : memref<2x1x32xf32, #tpu.memory_space<vmem>>, vector<1x1x32xf32>
    %303 = vector.shape_cast %302 : vector<1x1x32xf32> to vector<1x32xf32>
    %c1_205 = arith.constant 1 : index
    %c0_206 = arith.constant 0 : index
    %c0_207 = arith.constant 0 : index
    %304 = vector.load %arg16[%c1_205, %c0_206, %c0_207] : memref<2x1x32xf32, #tpu.memory_space<vmem>>, vector<1x1x32xf32>
    %305 = vector.shape_cast %304 : vector<1x1x32xf32> to vector<1x32xf32>
    %cst_208 = arith.constant dense<0.000000e+00> : vector<8xf32>
    %306 = vector.multi_reduction <add>, %301, %cst_208 [1] : vector<8x32xf32> to vector<8xf32>
    %307 = vector.shape_cast %306 : vector<8xf32> to vector<8x1xf32>
    %cst_209 = arith.constant 3.200000e+01 : f32
    %308 = vector.broadcast %cst_209 : f32 to vector<8x1xf32>
    %309 = arith.divf %307, %308 : vector<8x1xf32>
    %310 = vector.broadcast %309 : vector<8x1xf32> to vector<8x32xf32>
    %311 = arith.subf %301, %310 : vector<8x32xf32>
    %312 = arith.mulf %311, %311 : vector<8x32xf32>
    %cst_210 = arith.constant dense<0.000000e+00> : vector<8xf32>
    %313 = vector.multi_reduction <add>, %312, %cst_210 [1] : vector<8x32xf32> to vector<8xf32>
    %314 = vector.shape_cast %313 : vector<8xf32> to vector<8x1xf32>
    %cst_211 = arith.constant 3.200000e+01 : f32
    %315 = vector.broadcast %cst_211 : f32 to vector<8x1xf32>
    %316 = arith.divf %314, %315 : vector<8x1xf32>
    %317 = vector.broadcast %309 : vector<8x1xf32> to vector<8x32xf32>
    %318 = arith.subf %301, %317 : vector<8x32xf32>
    %cst_212 = arith.constant 9.99999974E-6 : f32
    %319 = vector.broadcast %cst_212 : f32 to vector<8x1xf32>
    %320 = arith.addf %316, %319 : vector<8x1xf32>
    %321 = math.rsqrt %320 : vector<8x1xf32>
    %322 = vector.broadcast %321 : vector<8x1xf32> to vector<8x32xf32>
    %323 = arith.mulf %318, %322 : vector<8x32xf32>
    %324 = vector.broadcast %303 : vector<1x32xf32> to vector<8x32xf32>
    %325 = arith.mulf %323, %324 : vector<8x32xf32>
    %326 = vector.broadcast %305 : vector<1x32xf32> to vector<8x32xf32>
    %327 = arith.addf %325, %326 : vector<8x32xf32>
    %c1_213 = arith.constant 1 : index
    %c0_214 = arith.constant 0 : index
    %c0_215 = arith.constant 0 : index
    %328 = vector.load %arg17[%c1_213, %c0_214, %c0_215] : memref<2x32x64xf32, #tpu.memory_space<vmem>>, vector<1x32x64xf32>
    %329 = vector.shape_cast %328 : vector<1x32x64xf32> to vector<32x64xf32>
    %cst_216 = arith.constant dense<0.000000e+00> : vector<8x64xf32>
    %330 = tpu.matmul %327, %329, %cst_216 {dimension_numbers = #tpu.dot_dimension_numbers<[1], [0], [0], [1], [0, 0, 1, 1], [], []>} : vector<8x32xf32>, vector<32x64xf32>, vector<8x64xf32> -> vector<8x64xf32>
    %c1_217 = arith.constant 1 : index
    %c0_218 = arith.constant 0 : index
    %c0_219 = arith.constant 0 : index
    %331 = vector.load %arg18[%c1_217, %c0_218, %c0_219] : memref<2x1x64xf32, #tpu.memory_space<vmem>>, vector<1x1x64xf32>
    %332 = vector.shape_cast %331 : vector<1x1x64xf32> to vector<1x64xf32>
    %333 = vector.broadcast %332 : vector<1x64xf32> to vector<8x64xf32>
    %334 = arith.addf %330, %333 : vector<8x64xf32>
    %cst_220 = arith.constant 5.000000e-01 : f32
    %335 = vector.broadcast %cst_220 : f32 to vector<8x64xf32>
    %336 = arith.mulf %335, %334 : vector<8x64xf32>
    %cst_221 = arith.constant 0.707106769 : f32
    %337 = vector.broadcast %cst_221 : f32 to vector<8x64xf32>
    %338 = arith.mulf %334, %337 : vector<8x64xf32>
    %339 = math.absf %338 : vector<8x64xf32>
    %cst_222 = arith.constant 0.327591091 : f32
    %340 = vector.broadcast %cst_222 : f32 to vector<8x64xf32>
    %341 = arith.mulf %340, %339 : vector<8x64xf32>
    %cst_223 = arith.constant 1.000000e+00 : f32
    %342 = vector.broadcast %cst_223 : f32 to vector<8x64xf32>
    %343 = arith.addf %342, %341 : vector<8x64xf32>
    %cst_224 = arith.constant 1.000000e+00 : f32
    %344 = vector.broadcast %cst_224 : f32 to vector<8x64xf32>
    %345 = arith.divf %344, %343 : vector<8x64xf32>
    %cst_225 = arith.constant 1.06140542 : f32
    %346 = vector.broadcast %cst_225 : f32 to vector<8x64xf32>
    %347 = arith.mulf %346, %345 : vector<8x64xf32>
    %cst_226 = arith.constant -1.45315206 : f32
    %348 = vector.broadcast %cst_226 : f32 to vector<8x64xf32>
    %349 = arith.addf %347, %348 : vector<8x64xf32>
    %350 = arith.mulf %349, %345 : vector<8x64xf32>
    %cst_227 = arith.constant 1.42141378 : f32
    %351 = vector.broadcast %cst_227 : f32 to vector<8x64xf32>
    %352 = arith.addf %350, %351 : vector<8x64xf32>
    %353 = arith.mulf %352, %345 : vector<8x64xf32>
    %cst_228 = arith.constant -0.284496725 : f32
    %354 = vector.broadcast %cst_228 : f32 to vector<8x64xf32>
    %355 = arith.addf %353, %354 : vector<8x64xf32>
    %356 = arith.mulf %355, %345 : vector<8x64xf32>
    %cst_229 = arith.constant 0.254829586 : f32
    %357 = vector.broadcast %cst_229 : f32 to vector<8x64xf32>
    %358 = arith.addf %356, %357 : vector<8x64xf32>
    %359 = arith.mulf %358, %345 : vector<8x64xf32>
    %cst_230 = arith.constant 0.000000e+00 : f32
    %360 = vector.broadcast %cst_230 : f32 to vector<8x64xf32>
    %361 = arith.subf %360, %339 : vector<8x64xf32>
    %362 = arith.mulf %361, %339 : vector<8x64xf32>
    %363 = math.exp %362 : vector<8x64xf32>
    %364 = arith.mulf %359, %363 : vector<8x64xf32>
    %cst_231 = arith.constant 1.000000e+00 : f32
    %365 = vector.broadcast %cst_231 : f32 to vector<8x64xf32>
    %366 = arith.subf %365, %364 : vector<8x64xf32>
    %cst_232 = arith.constant 0.000000e+00 : f32
    %367 = vector.broadcast %cst_232 : f32 to vector<8x64xf32>
    %368 = arith.cmpf olt, %338, %367 : vector<8x64xf32>
    %cst_233 = arith.constant 0.000000e+00 : f32
    %369 = vector.broadcast %cst_233 : f32 to vector<8x64xf32>
    %370 = arith.subf %369, %366 : vector<8x64xf32>
    %371 = arith.select %368, %370, %366 : vector<8x64xi1>, vector<8x64xf32>
    %cst_234 = arith.constant 1.000000e+00 : f32
    %372 = vector.broadcast %cst_234 : f32 to vector<8x64xf32>
    %373 = arith.addf %372, %371 : vector<8x64xf32>
    %374 = arith.mulf %336, %373 : vector<8x64xf32>
    %c1_235 = arith.constant 1 : index
    %c0_236 = arith.constant 0 : index
    %c0_237 = arith.constant 0 : index
    %375 = vector.load %arg19[%c1_235, %c0_236, %c0_237] : memref<2x64x32xf32, #tpu.memory_space<vmem>>, vector<1x64x32xf32>
    %376 = vector.shape_cast %375 : vector<1x64x32xf32> to vector<64x32xf32>
    %cst_238 = arith.constant dense<0.000000e+00> : vector<8x32xf32>
    %377 = tpu.matmul %374, %376, %cst_238 {dimension_numbers = #tpu.dot_dimension_numbers<[1], [0], [0], [1], [0, 0, 1, 1], [], []>} : vector<8x64xf32>, vector<64x32xf32>, vector<8x32xf32> -> vector<8x32xf32>
    %378 = arith.addf %301, %377 : vector<8x32xf32>
    %c1_239 = arith.constant 1 : index
    %c0_240 = arith.constant 0 : index
    %c0_241 = arith.constant 0 : index
    %379 = vector.load %arg20[%c1_239, %c0_240, %c0_241] : memref<2x1x32xf32, #tpu.memory_space<vmem>>, vector<1x1x32xf32>
    %380 = vector.shape_cast %379 : vector<1x1x32xf32> to vector<1x32xf32>
    %381 = vector.broadcast %380 : vector<1x32xf32> to vector<8x32xf32>
    %382 = arith.addf %378, %381 : vector<8x32xf32>
    %383 = vector.extract_strided_slice %382 {offsets = [0, 0], sizes = [1, 32], strides = [1, 1]} : vector<8x32xf32> to vector<1x32xf32>
    %c0_242 = arith.constant 0 : index
    %c0_243 = arith.constant 0 : index
    %384 = vector.load %arg21[%c0_242, %c0_243] : memref<1x32xf32, #tpu.memory_space<vmem>>, vector<1x32xf32>
    %c0_244 = arith.constant 0 : index
    %c0_245 = arith.constant 0 : index
    %385 = vector.load %arg22[%c0_244, %c0_245] : memref<1x32xf32, #tpu.memory_space<vmem>>, vector<1x32xf32>
    %cst_246 = arith.constant dense<0.000000e+00> : vector<1xf32>
    %386 = vector.multi_reduction <add>, %383, %cst_246 [1] : vector<1x32xf32> to vector<1xf32>
    %387 = vector.shape_cast %386 : vector<1xf32> to vector<1x1xf32>
    %cst_247 = arith.constant 3.200000e+01 : f32
    %388 = vector.broadcast %cst_247 : f32 to vector<1x1xf32>
    %389 = arith.divf %387, %388 : vector<1x1xf32>
    %390 = vector.broadcast %389 : vector<1x1xf32> to vector<1x32xf32>
    %391 = arith.subf %383, %390 : vector<1x32xf32>
    %392 = arith.mulf %391, %391 : vector<1x32xf32>
    %cst_248 = arith.constant dense<0.000000e+00> : vector<1xf32>
    %393 = vector.multi_reduction <add>, %392, %cst_248 [1] : vector<1x32xf32> to vector<1xf32>
    %394 = vector.shape_cast %393 : vector<1xf32> to vector<1x1xf32>
    %cst_249 = arith.constant 3.200000e+01 : f32
    %395 = vector.broadcast %cst_249 : f32 to vector<1x1xf32>
    %396 = arith.divf %394, %395 : vector<1x1xf32>
    %397 = vector.broadcast %389 : vector<1x1xf32> to vector<1x32xf32>
    %398 = arith.subf %383, %397 : vector<1x32xf32>
    %cst_250 = arith.constant 9.99999974E-6 : f32
    %399 = vector.broadcast %cst_250 : f32 to vector<1x1xf32>
    %400 = arith.addf %396, %399 : vector<1x1xf32>
    %401 = math.rsqrt %400 : vector<1x1xf32>
    %402 = vector.broadcast %401 : vector<1x1xf32> to vector<1x32xf32>
    %403 = arith.mulf %398, %402 : vector<1x32xf32>
    %404 = arith.mulf %403, %384 : vector<1x32xf32>
    %405 = arith.addf %404, %385 : vector<1x32xf32>
    %c0_251 = arith.constant 0 : index
    %c0_252 = arith.constant 0 : index
    %406 = vector.load %arg23[%c0_251, %c0_252] : memref<32x10xf32, #tpu.memory_space<vmem>>, vector<32x10xf32>
    %cst_253 = arith.constant dense<0.000000e+00> : vector<1x10xf32>
    %407 = tpu.matmul %405, %406, %cst_253 {dimension_numbers = #tpu.dot_dimension_numbers<[1], [0], [0], [1], [0, 0, 1, 1], [], []>} : vector<1x32xf32>, vector<32x10xf32>, vector<1x10xf32> -> vector<1x10xf32>
    %c0_254 = arith.constant 0 : index
    %c0_255 = arith.constant 0 : index
    %408 = vector.load %arg24[%c0_254, %c0_255] : memref<1x10xf32, #tpu.memory_space<vmem>>, vector<1x10xf32>
    %409 = arith.addf %407, %408 : vector<1x10xf32>
    %c0_256 = arith.constant 0 : index
    %c0_257 = arith.constant 0 : index
    %c0_258 = arith.constant 0 : index
    %410 = vector.load %arg25[%c0_256, %c0_257, %c0_258] : memref<1x1x10xf32, #tpu.memory_space<vmem>>, vector<1x1x10xf32>
    %411 = vector.shape_cast %410 : vector<1x1x10xf32> to vector<1x10xf32>
    %412 = vector.shape_cast %409 : vector<1x10xf32> to vector<1x1x10xf32>
    tpu.vector_store %arg25[%c0_256, %c0_257, %c0_258], %412 {strides = array<i32>} : memref<1x1x10xf32, #tpu.memory_space<vmem>>, vector<1x1x10xf32>,
    return
  }
  func.func @transform_0(%arg0: i32) -> (i32, i32, i32) {
    %c0_i32 = arith.constant 0 : i32
    %c0_i32_0 = arith.constant 0 : i32
    %c0_i32_1 = arith.constant 0 : i32
    return %arg0, %c0_i32, %c0_i32_0 : i32, i32, i32
  }
  func.func @transform_1(%arg0: i32) -> (i32, i32) {
    %c0_i32 = arith.constant 0 : i32
    %c0_i32_0 = arith.constant 0 : i32
    %c0_i32_1 = arith.constant 0 : i32
    return %c0_i32, %c0_i32_0 : i32, i32
  }
  func.func @transform_2(%arg0: i32) -> (i32, i32) {
    %c0_i32 = arith.constant 0 : i32
    %c0_i32_0 = arith.constant 0 : i32
    %c0_i32_1 = arith.constant 0 : i32
    return %c0_i32, %c0_i32_0 : i32, i32
  }
  func.func @transform_3(%arg0: i32) -> (i32, i32) {
    %c0_i32 = arith.constant 0 : i32
    %c0_i32_0 = arith.constant 0 : i32
    %c0_i32_1 = arith.constant 0 : i32
    return %c0_i32, %c0_i32_0 : i32, i32
  }
  func.func @transform_4(%arg0: i32) -> (i32, i32) {
    %c0_i32 = arith.constant 0 : i32
    %c0_i32_0 = arith.constant 0 : i32
    %c0_i32_1 = arith.constant 0 : i32
    return %c0_i32, %c0_i32_0 : i32, i32
  }
  func.func @transform_5(%arg0: i32) -> (i32, i32, i32) {
    %c0_i32 = arith.constant 0 : i32
    %c0_i32_0 = arith.constant 0 : i32
    %c0_i32_1 = arith.constant 0 : i32
    %c0_i32_2 = arith.constant 0 : i32
    return %c0_i32, %c0_i32_0, %c0_i32_1 : i32, i32, i32
  }
  func.func @transform_6(%arg0: i32) -> (i32, i32, i32) {
    %c0_i32 = arith.constant 0 : i32
    %c0_i32_0 = arith.constant 0 : i32
    %c0_i32_1 = arith.constant 0 : i32
    %c0_i32_2 = arith.constant 0 : i32
    return %c0_i32, %c0_i32_0, %c0_i32_1 : i32, i32, i32
  }
  func.func @transform_7(%arg0: i32) -> (i32, i32) {
    %c0_i32 = arith.constant 0 : i32
    %c0_i32_0 = arith.constant 0 : i32
    %c0_i32_1 = arith.constant 0 : i32
    return %c0_i32, %c0_i32_0 : i32, i32
  }
  func.func @transform_8(%arg0: i32) -> (i32, i32) {
    %c0_i32 = arith.constant 0 : i32
    %c0_i32_0 = arith.constant 0 : i32
    %c0_i32_1 = arith.constant 0 : i32
    return %c0_i32, %c0_i32_0 : i32, i32
  }
  func.func @transform_9(%arg0: i32) -> (i32, i32, i32) {
    %c0_i32 = arith.constant 0 : i32
    %c0_i32_0 = arith.constant 0 : i32
    %c0_i32_1 = arith.constant 0 : i32
    %c0_i32_2 = arith.constant 0 : i32
    return %c0_i32, %c0_i32_0, %c0_i32_1 : i32, i32, i32
  }
  func.func @transform_10(%arg0: i32) -> (i32, i32, i32) {
    %c0_i32 = arith.constant 0 : i32
    %c0_i32_0 = arith.constant 0 : i32
    %c0_i32_1 = arith.constant 0 : i32
    %c0_i32_2 = arith.constant 0 : i32
    return %c0_i32, %c0_i32_0, %c0_i32_1 : i32, i32, i32
  }
  func.func @transform_11(%arg0: i32) -> (i32, i32, i32) {
    %c0_i32 = arith.constant 0 : i32
    %c0_i32_0 = arith.constant 0 : i32
    %c0_i32_1 = arith.constant 0 : i32
    %c0_i32_2 = arith.constant 0 : i32
    return %c0_i32, %c0_i32_0, %c0_i32_1 : i32, i32, i32
  }
  func.func @transform_12(%arg0: i32) -> (i32, i32, i32) {
    %c0_i32 = arith.constant 0 : i32
    %c0_i32_0 = arith.constant 0 : i32
    %c0_i32_1 = arith.constant 0 : i32
    %c0_i32_2 = arith.constant 0 : i32
    return %c0_i32, %c0_i32_0, %c0_i32_1 : i32, i32, i32
  }
  func.func @transform_13(%arg0: i32) -> (i32, i32, i32) {
    %c0_i32 = arith.constant 0 : i32
    %c0_i32_0 = arith.constant 0 : i32
    %c0_i32_1 = arith.constant 0 : i32
    %c0_i32_2 = arith.constant 0 : i32
    return %c0_i32, %c0_i32_0, %c0_i32_1 : i32, i32, i32
  }
  func.func @transform_14(%arg0: i32) -> (i32, i32, i32) {
    %c0_i32 = arith.constant 0 : i32
    %c0_i32_0 = arith.constant 0 : i32
    %c0_i32_1 = arith.constant 0 : i32
    %c0_i32_2 = arith.constant 0 : i32
    return %c0_i32, %c0_i32_0, %c0_i32_1 : i32, i32, i32
  }
  func.func @transform_15(%arg0: i32) -> (i32, i32, i32) {
    %c0_i32 = arith.constant 0 : i32
    %c0_i32_0 = arith.constant 0 : i32
    %c0_i32_1 = arith.constant 0 : i32
    %c0_i32_2 = arith.constant 0 : i32
    return %c0_i32, %c0_i32_0, %c0_i32_1 : i32, i32, i32
  }
  func.func @transform_16(%arg0: i32) -> (i32, i32, i32) {
    %c0_i32 = arith.constant 0 : i32
    %c0_i32_0 = arith.constant 0 : i32
    %c0_i32_1 = arith.constant 0 : i32
    %c0_i32_2 = arith.constant 0 : i32
    return %c0_i32, %c0_i32_0, %c0_i32_1 : i32, i32, i32
  }
  func.func @transform_17(%arg0: i32) -> (i32, i32, i32) {
    %c0_i32 = arith.constant 0 : i32
    %c0_i32_0 = arith.constant 0 : i32
    %c0_i32_1 = arith.constant 0 : i32
    %c0_i32_2 = arith.constant 0 : i32
    return %c0_i32, %c0_i32_0, %c0_i32_1 : i32, i32, i32
  }
  func.func @transform_18(%arg0: i32) -> (i32, i32, i32) {
    %c0_i32 = arith.constant 0 : i32
    %c0_i32_0 = arith.constant 0 : i32
    %c0_i32_1 = arith.constant 0 : i32
    %c0_i32_2 = arith.constant 0 : i32
    return %c0_i32, %c0_i32_0, %c0_i32_1 : i32, i32, i32
  }
  func.func @transform_19(%arg0: i32) -> (i32, i32, i32) {
    %c0_i32 = arith.constant 0 : i32
    %c0_i32_0 = arith.constant 0 : i32
    %c0_i32_1 = arith.constant 0 : i32
    %c0_i32_2 = arith.constant 0 : i32
    return %c0_i32, %c0_i32_0, %c0_i32_1 : i32, i32, i32
  }
  func.func @transform_20(%arg0: i32) -> (i32, i32) {
    %c0_i32 = arith.constant 0 : i32
    %c0_i32_0 = arith.constant 0 : i32
    %c0_i32_1 = arith.constant 0 : i32
    return %c0_i32, %c0_i32_0 : i32, i32
  }
  func.func @transform_21(%arg0: i32) -> (i32, i32) {
    %c0_i32 = arith.constant 0 : i32
    %c0_i32_0 = arith.constant 0 : i32
    %c0_i32_1 = arith.constant 0 : i32
    return %c0_i32, %c0_i32_0 : i32, i32
  }
  func.func @transform_22(%arg0: i32) -> (i32, i32) {
    %c0_i32 = arith.constant 0 : i32
    %c0_i32_0 = arith.constant 0 : i32
    %c0_i32_1 = arith.constant 0 : i32
    return %c0_i32, %c0_i32_0 : i32, i32
  }
  func.func @transform_23(%arg0: i32) -> (i32, i32) {
    %c0_i32 = arith.constant 0 : i32
    %c0_i32_0 = arith.constant 0 : i32
    %c0_i32_1 = arith.constant 0 : i32
    return %c0_i32, %c0_i32_0 : i32, i32
  }
  func.func @transform_24(%arg0: i32) -> (i32, i32, i32) {
    %c0_i32 = arith.constant 0 : i32
    %c0_i32_0 = arith.constant 0 : i32
    %c0_i32_1 = arith.constant 0 : i32
    return %arg0, %c0_i32, %c0_i32_0 : i32, i32, i32
  }
}

</mosaic_0001>

<bundles_post_ra>
// kernel: vit_forward.1
= control target key start
LH: loop header
LB: loop body
LE: loop exit
PB: predicated region body
PF: predicated region fallthrough
CT: control target
= control target key end

     0   :  { %s6032_s0 = inlined_call_operand.vmem [shape: f32[2,4,256], index: 0, kind: input, shape index: {}]   ;;  %s6033_s1 = inlined_call_operand.vmem [shape: f32[8,32], index: 1, kind: input, shape index: {}]   ;;  %s6034_s2 = inlined_call_operand.vmem [shape: f32[8,4], index: 2, kind: input, shape index: {}]   ;;  %s6035_s3 = inlined_call_operand.vmem [shape: f32[20,8], index: 3, kind: input, shape index: {}]   ;;  %s6036_s4 = inlined_call_operand.vmem [shape: f32[8,20], index: 4, kind: input, shape index: {}]   ;;  %s6037_s5 = inlined_call_operand.vmem [shape: f32[4,20,24], index: 5, kind: input, shape index: {}]   ;;  %s6038_s6 = inlined_call_operand.vmem [shape: f32[4,20,32], index: 6, kind: input, shape index: {}]   ;;  %s6039_s7 = inlined_call_operand.vmem [shape: f32[20,20], index: 7, kind: input, shape index: {}]   ;;  %s6040_s8 = inlined_call_operand.vmem [shape: f32[256,32], index: 8, kind: input, shape index: {}]   ;;  %s6041_s9 = inlined_call_operand.vmem [shape: f32[2,1,32], index: 9, kind: input, shape index: {}]   ;;  %s6042_s10 = inlined_call_operand.vmem [shape: f32[2,1,32], index: 10, kind: input, shape index: {}]   ;;  %s6043_s11 = inlined_call_operand.vmem [shape: f32[8,32,24], index: 11, kind: input, shape index: {}]   ;;  %s6044_s12 = inlined_call_operand.vmem [shape: f32[8,8,32], index: 12, kind: input, shape index: {}]   ;;  %s6045_s13 = inlined_call_operand.vmem [shape: f32[2,1,32], index: 13, kind: input, shape index: {}]   ;;  %s6046_s14 = inlined_call_operand.vmem [shape: f32[2,1,32], index: 14, kind: input, shape index: {}]   ;;  %s6047_s15 = inlined_call_operand.vmem [shape: f32[2,1,32], index: 15, kind: input, shape index: {}]   ;;  %s6048_s16 = inlined_call_operand.vmem [shape: f32[2,32,64], index: 16, kind: input, shape index: {}]   ;;  %s6049_s17 = inlined_call_operand.vmem [shape: f32[2,1,64], index: 17, kind: input, shape index: {}]   ;;  %s6050_s18 = inlined_call_operand.vmem [shape: f32[2,64,32], index: 18, kind: input, shape index: {}]   ;;  %s6051_s19 = inlined_call_operand.vmem [shape: f32[2,1,32], index: 19, kind: input, shape index: {}]   ;;  %s6052_s20 = inlined_call_operand.vmem [shape: f32[1,32], index: 20, kind: input, shape index: {}]   ;;  %s6053_s21 = inlined_call_operand.vmem [shape: f32[1,32], index: 21, kind: input, shape index: {}]   ;;  %s6054_s22 = inlined_call_operand.vmem [shape: f32[32,10], index: 22, kind: input, shape index: {}]   ;;  %s6055_s23 = inlined_call_operand.vmem [shape: f32[1,10], index: 23, kind: input, shape index: {}]   ;;  %s6056_s24 = inlined_call_operand.hbm [shape: f32[2,1,10], index: 24, kind: output, shape index: {}]  }
   0x1   :  { %6074 = sst [smem:[#allocation11_spill]] %s6032_s0 }
   0x2   :  { %6075 = sst [smem:[#allocation12_spill]] %s6033_s1 }
   0x3   :  { %6076 = sst [smem:[#allocation13_spill]] %s6034_s2 }
   0x4   :  { %6077 = sst [smem:[#allocation14_spill]] %s6035_s3 }
   0x5   :  { %6078 = sst [smem:[#allocation15_spill]] %s6036_s4 }
   0x6   :  { %6079 = sst [smem:[#allocation16_spill]] %s6037_s5 }
   0x7   :  { %6080 = sst [smem:[#allocation17_spill]] %s6038_s6 }
   0x8   :  { %6081 = sst [smem:[#allocation18_spill]] %s6039_s7 }
   0x9   :  { %6082 = sst [smem:[#allocation19_spill]] %s6040_s8 }
   0xa   :  { %6083 = sst [smem:[#allocation20_spill]] %s6041_s9 }
   0xb   :  { %6084 = sst [smem:[#allocation21_spill]] %s6042_s10 }
   0xc   :  { %6085 = sst [smem:[#allocation22_spill]] %s6055_s23 }
   0xd   :  { %6086 = sst [smem:[#allocation23_spill]] %s6056_s24 }
   0xe   :  { %29 = vsyncpa [#allocation3], 0 }
   0xf   :  { %31 = vsyncpa [#allocation3 + $0x1], 0  ;;  %s4982_s5 = smov 0   ;;  %s4984_s26 = smov 0  }
  0x10   :  { %s4986_s27 = smov 0   ;;  %s4988_s28 = smov 0  }
  0x11 LB: > { %6087 = sst [smem:[#allocation5_spill]] %s4838_s5  ;;  %s5003_s6 = sadd.s32 4294967295, %s4850_s28   ;;  %s4850_s28 = sphi %s4988_s28, %s6114_s28   ;;  %s4846_s27 = sphi %s4986_s27, %s6116_s27   ;;  %s4842_s26 = sphi %s4984_s26, %s6118_s26   ;;  %s4838_s5 = sphi %s4982_s5, %s6117_s5  }
  0x12   : > { %6088 = sst [smem:[#allocation6_spill]] %s4846_s27  ;;  %s3925_s2 = sadd.s32 4294967294, %s4850_s28  }
  0x13   : > { %6089 = sst [smem:[#allocation7_spill]] %s4850_s28  ;;  %s5007_s29 = sadd.s32 1, %s4850_s28  }
  0x14   : > { %6090 = sst [smem:[#allocation8_spill]] %s5007_s29  ;;  %s553_s0 = sadd.s32 1, %s4846_s27 }
  0x15   : > { %s550_s7 = ssub.s32 %s4850_s28, %s5007_s29  ;;  %p563_p0 = scmp.ne.s32.totalorder %s4846_s27, %s4842_s26 }
  0x16   : > { %p551_p1 = scmp.eq.s32.totalorder %s550_s7, 0  ;;  %p564_p2 = scmp.eq.s32.totalorder %s5003_s6, 1 }
  0x17   : > { %p569_p3 = scmp.ne.s32.totalorder %s4842_s26, %s4838_s5  ;;  %p570_p4 = scmp.eq.s32.totalorder %s3925_s2, 1 }
  0x18   : > { %s5018_s30 = scalar_select %p551_p1, %s4846_s27, %s553_s0  }
  0x19   : > { %p5020_p5 = por %p564_p2, %p563_p0  ;;  %p5024_p6 = por %p570_p4, %p569_p3 }
  0x1a   : > { %6091 = sst [smem:[#allocation9_spill]] %s5018_s30  ;;  %p3928_p7 = scmp.ge.s32.totalorder %s4850_s28, 1 }
  0x1b   : > { %s6093_s25 = scalar_select %p5024_p6, 1, 0 }
  0x1c   : > { %p665_p8 = scmp.lt.s32.totalorder %s4850_s28, 3 }
  0x1d   : > { %6094 = sst [smem:[#allocation10_spill]] %s6093_s25 }
  0x1e   : > { %p666_p9 = pnand %p3928_p7, %p665_p8 }
  0x1f   : > { %s6095_s1 = sld [smem:[#allocation19_spill]] (!%p666_p9)  ;;  %p730_p10 = scmp.lt.s32.totalorder (!%p666_p9), %s5003_s6, 1 }
  0x20   : > { %669 = sbr.rel (%p666_p9) target bundleno = 6428 (0x191c), region = 116  ;;  %s6096_s30 = sld [smem:[#allocation11_spill]] (!%p666_p9) }
  0x21   : > { %s6097_s24 = sld [smem:[#allocation13_spill]] (!%p666_p9)  ;;  %s6069_s8 = smov (!%p666_p9), 112  }
  0x22   : > { %s6098_s5 = sld [smem:[#allocation12_spill]] (!%p666_p9)  ;;  %s728_s23 = sand.u32 (!%p666_p9), 1, %s4842_s26  }
  0x23   : > { %s6099_s9 = sld [smem:[#allocation20_spill]] (!%p666_p9)  ;;  %s4102_s29 = sshll.u32 (!%p666_p9), %s5003_s6, 4 }
  0x24   : > { %s6100_s10 = sld [smem:[#allocation21_spill]] (!%p666_p9) }
  0x25   : > { %v775_v0 = vld [vmem:[%s6095_s1 + $0xf8] sm:$0xff]  ;;  %v774_v2 = vld [vmem:[%s6095_s1 + $0xf0] sm:$0xff]  ;;  %v773_v4 = vld [vmem:[%s6095_s1 + $0xe8] sm:$0xff]  ;;  %s731_s4 = scalar_select %p730_p10, %s5003_s6, 1  ;;  %v4852_v34 = vmov 0.0   ;;  %vm4853_vm0 = vmmov 0  }
  0x26   : > { %v759_v1 = vld [vmem:[%s6095_s1 + $0x78] sm:$0xff]  ;;  %4106 = vmatprep.subr.mxu0 %v775_v0  ;;  %v758_v3 = vld [vmem:[%s6095_s1 + $0x70] sm:$0xff]  ;;  %v757_v5 = vld [vmem:[%s6095_s1 + $0x68] sm:$0xff]  ;;  %4304 = vmatprep.subr.mxu1 %v4852_v34  ;;  %vm854_vm1 = vcmask 1043456   ;;  %vm850_vm2 = vcmask 31744   ;;  %vm930_vm3 = vcmask 261120  }
  0x27   : > { %4107 = vmatpush3.msra.mxu0 %v759_v1  ;;  %v772_v6 = vld [vmem:[%s6095_s1 + $0xe0] sm:$0xff]  ;;  %s4105_s7 = sshll.u32 %s731_s4, 3  ;;  %v771_v8 = vld [vmem:[%s6095_s1 + $0xd8] sm:$0xff]  ;;  %v770_v10 = vld [vmem:[%s6095_s1 + $0xd0] sm:$0xff]  ;;  %4306 = vmatprep.mubr.msk.f32.mxu1 %vm4853_vm0, %v4852_v34  ;;  %vm959_vm4 = vcmask 64512   ;;  %s4854_s4 = smov 120  }
  0x28   : > { %4108 = vmatprep.subr.mxu0 %v774_v2  ;;  %v756_v7 = vld [vmem:[%s6095_s1 + $0x60] sm:$0xff]  ;;  %v755_v9 = vld [vmem:[%s6095_s1 + $0x58] sm:$0xff]  ;;  %s734_s0 = scalar_lea.vmem %s6096_s30, %s4105_s7  ;;  %v754_v11 = vld [vmem:[%s6095_s1 + $0x50] sm:$0xff]  ;;  %s6104_s30 = sld [smem:[#allocation18_spill]]  ;;  %vm1540_vm5 = vcmask 162816   ;;  %vm1547_vm6 = vcmask 158720  }
  0x29   : > { %4109 = vmatpush3.msra.mxu0 %v758_v3  ;;  %v769_v12 = vld [vmem:[%s6095_s1 + $0xc8] sm:$0xff]  ;;  %v743_v13 = vld [vmem:[%s734_s0] sm:$0xff]  ;;  %v767_v18 = vld [vmem:[%s6095_s1 + $0xb8] sm:$0xff]  ;;  %s6105_s7 = sld [smem:[#allocation17_spill]]  ;;  %vm2279_vm8 = vcmask 523264   ;;  %vm3761_vm10 = vcmask 253952  }
  0x2a   : > { %4110 = vmatprep.subr.mxu0 %v773_v4  ;;  %v753_v14 = vld [vmem:[%s6095_s1 + $0x48] sm:$0xff]  ;;  %v777_v15 = vcombine.high %v743_v13, %v743_v13  ;;  %v768_v16 = vld [vmem:[%s6095_s1 + $0xc0] sm:$0xff]  ;;  %v751_v19 = vld [vmem:[%s6095_s1 + $0x38] sm:$0xff]  ;;  %s6108_s27 = sld [smem:[#allocation22_spill]]  ;;  %vm3855_vm11 = vcmask 73728   ;;  %s4856_s6 = smov [#allocation2]  }
  0x2b   : > { %4111 = vmatpush3.msra.mxu0 %v757_v5  ;;  %v752_v17 = vld [vmem:[%s6095_s1 + $0x40] sm:$0xff]  ;;  %v766_v20 = vld [vmem:[%s6095_s1 + $0xb0] sm:$0xff]  ;;  %v765_v22 = vld [vmem:[%s6095_s1 + $0xa8] sm:$0xff]  ;;  %s6109_s28 = sld [smem:[#allocation23_spill]] }
  0x2c   : > { %4112 = vmatprep.subr.mxu0 %v772_v6  ;;  %843 = vmatprep.mubr.f32.mxu0 %v777_v15  ;;  %v750_v21 = vld [vmem:[%s6095_s1 + $0x30] sm:$0xff]  ;;  %v749_v23 = vld [vmem:[%s6095_s1 + $0x28] sm:$0xff]  ;;  %v764_v24 = vld [vmem:[%s6095_s1 + $0xa0] sm:$0xff] }
  0x2d   : > { %4113 = vmatpush3.msra.mxu0 %v756_v7  ;;  %v748_v25 = vld [vmem:[%s6095_s1 + $0x20] sm:$0xff]  ;;  %v763_v26 = vld [vmem:[%s6095_s1 + $0x98] sm:$0xff]  ;;  %v762_v28 = vld [vmem:[%s6095_s1 + $0x90] sm:$0xff] }
  0x2e   : > { %4114 = vmatprep.subr.mxu0 %v771_v8  ;;  %v747_v27 = vld [vmem:[%s6095_s1 + $0x18] sm:$0xff]  ;;  %v746_v29 = vld [vmem:[%s6095_s1 + $0x10] sm:$0xff]  ;;  %v761_v30 = vld [vmem:[%s6095_s1 + $0x88] sm:$0xff] }
  0x2f   : > { %4115 = vmatpush3.msra.mxu0 %v755_v9  ;;  %v745_v31 = vld [vmem:[%s6095_s1 + $0x8] sm:$0xff]  ;;  %v760_v32 = vld [vmem:[%s6095_s1 + $0x80] sm:$0xff]  ;;  %v3954_v49 = vld [vmem:[%s6043_s11 + $0x58] sm:$0xff] }
  0x30   : > { %4116 = vmatprep.subr.mxu0 %v770_v10  ;;  %v744_v33 = vld [vmem:[%s6095_s1] sm:$0xff]  ;;  %v3953_v50 = vld [vmem:[%s6043_s11 + $0x50] sm:$0xff]  ;;  %v3952_v51 = vld [vmem:[%s6043_s11 + $0x48] sm:$0xff]  ;;  %s729_s1 = scalar_lea.vmem [#allocation2], %s728_s23 }
  0x31   : > { %4117 = vmatpush3.msra.mxu0 %v754_v11  ;;  %v735_v38 = vld [vmem:[%s6097_s24] sm:$0xff]  ;;  %v1052_v62 = vld [vmem:[%s6043_s11 + $0x18] sm:$0xff]  ;;  %v1051_v63 = vld [vmem:[%s6043_s11 + $0x10] sm:$0xff]  ;;  %s6103_s24 = sld [smem:[#allocation16_spill]] }
  0x32   : > { %4118 = vmatprep.subr.mxu0 %v769_v12  ;;  %v849_v39 = vld [vmem:[%s6098_s5] sm:$0xff]  ;;  %s6101_s5 = sld [smem:[#allocation14_spill]]  ;;  %v1050_v1 = vld [vmem:[%s6043_s11 + $0x8] sm:$0xff]  ;;  %v3944_v6 = vld [vmem:[%s6043_s11 + $0x38] sm:$0xff] }
  0x33   : > { %4119 = vmatpush3.msra.mxu0 %v753_v14  ;;  %v3933_v56 = vld [vmem:[%s6099_s9] ss:$0 sm:$0xff]  ;;  %v3943_v8 = vld [vmem:[%s6043_s11 + $0x30] sm:$0xff]  ;;  %v3942_v10 = vld [vmem:[%s6043_s11 + $0x28] sm:$0xff] }
  0x34   : > { %4120 = vmatprep.subr.mxu0 %v768_v16  ;;  %v3934_v58 = vld [vmem:[%s6100_s10] ss:$0 sm:$0xff]  ;;  %v3964_v15 = vld [vmem:[%s6043_s11 + $0x78] sm:$0xff]  ;;  %v3963_v16 = vld [vmem:[%s6043_s11 + $0x70] sm:$0xff] }
  0x35   : > { %4121 = vmatpush3.msra.mxu0 %v752_v17  ;;  %v1049_v3 = vld [vmem:[%s6043_s11] sm:$0xff]  ;;  %v3962_v17 = vld [vmem:[%s6043_s11 + $0x68] sm:$0xff] }
  0x36   : > { %4122 = vmatprep.subr.mxu0 %v767_v18  ;;  %v3951_v4 = vld [vmem:[%s6043_s11 + $0x40] sm:$0xff] }
  0x37   : > { %4123 = vmatpush3.msra.mxu0 %v751_v19  ;;  %v3961_v18 = vld [vmem:[%s6043_s11 + $0x60] sm:$0xff] }
  0x38   : > { %4124 = vmatprep.subr.mxu0 %v766_v20  ;;  %s6102_s2 = smov %s6101_s5  ;;  %v5174_v61 = vld [vmem:[%s6101_s5] sm:$0xff]  ;;  %s6106_s5 = sld [smem:[#allocation15_spill]] }
  0x39   : > { %4125 = vmatpush3.msra.mxu0 %v750_v21  ;;  %v5190_v0 = vld [vmem:[%s6102_s2 + $0x8] sm:$0xff]  ;;  %v5204_v2 = vld [vmem:[%s6102_s2 + $0x10] sm:$0xf]  ;;  %s3870_s2 = sshll.u32 %s729_s1, 4  ;;  %s3871_s2 = int_to_ptr.vmem [resolvable:$true] %s3870_s2 }
  0x3a   : > { %4126 = vmatprep.subr.mxu0 %v765_v22 }
  0x3b   : > { %4127 = vmatpush3.msra.mxu0 %v749_v23 }
  0x3c   : > { %4128 = vmatprep.subr.mxu0 %v764_v24 }
  0x3d   : > { %4129 = vmatpush3.msra.mxu0 %v748_v25 }
  0x3e   : > { %4130 = vmatprep.subr.mxu0 %v763_v26 }
  0x3f   : > { %4131 = vmatpush3.msra.mxu0 %v747_v27 }
  0x40   : > { %4132 = vmatprep.subr.mxu0 %v762_v28 }
  0x41   : > { %4133 = vmatpush3.msra.mxu0 %v746_v29 }
  0x42   : > { %4134 = vmatprep.subr.mxu0 %v761_v30 }
  0x43   : > { %4135 = vmatpush3.msra.mxu0 %v745_v31 }
  0x44   : > { %4136 = vmatprep.subr.mxu0 %v760_v32  ;;  %v5290_v32 = vld [vmem:[%s6103_s24 + $0x18] sm:$0xff] }
  0x45   : > { %4137 = vmatpush3.msra.mxu0 %v744_v33 }
  0x46   : > { %844 = vmatmul.mubr.f32.vlgmr.msra.gmra.mxu0 %v743_v13  ;;  %4354 = vmatprep.subr.mxu0 %v4852_v34  ;;  %v3941_v13 = vld [vmem:[%s6043_s11 + $0x20] sm:$0xff] }
  0x47   : > { %4362 = vmatprep.mubr.msk.f32.mxu0 %vm4853_vm0, %v4852_v34  ;;  %4355 = vmatpush3.msra.mxu0 %v3954_v49 }
  0x48   : > { %4356 = vmatprep.subr.mxu0 %v4852_v34 }
  0x49   : > { %4357 = vmatpush3.msra.mxu0 %v3953_v50 }
  0x4a   : > { %4358 = vmatprep.subr.mxu0 %v4852_v34 }
  0x4b   : > { %4359 = vmatpush3.msra.mxu0 %v3952_v51 }
  0x4c   : > { %4360 = vmatprep.subr.mxu0 %v4852_v34 }
  0x4d   : > { %4361 = vmatpush3.msra.mxu0 %v3951_v4 }
  0x4e   : > { %4388 = vmatprep.subr.mxu0 %v4852_v34 }
 0x106   : > { %v4138_v35 = vpop.f32.mrf.mxu0 }
 0x108   : > { %v4139_v36 = vpop.f32.mrf.mxu0 }
 0x109   : > { %v4140_v37 = vadd.f32 %v4139_v36, %v4138_v35  ;;  %v5295_v35 = vld [vmem:[%s6103_s24] sm:$0xff] }
 0x10b   : > { %4305 = vmatpush3.msk.msra.mxu1 %vm854_vm1, %v4140_v37 }
 0x10c   : > { %4307 = vmatmul.mubr.msk.f32.vlgmr.msra.gmra.mxu1 %vm850_vm2, %v735_v38  ;;  %4309 = vmatprep.subr.mxu1 %v4852_v34 }
 0x10d   : > { %4311 = vmatprep.mubr.msk.f32.mxu1 %vm4853_vm0, %v4852_v34 }
 0x1cc   : > { %v924_v40 = vpop.f32.mrf.mxu1 }
 0x1cd   : > { %v5147_v41 = vadd.f32 %v924_v40, %v849_v39  ;;  %v5302_v40 = vld [vmem:[%s6103_s24 + $0x30] sm:$0xff] }
 0x1ce   : > { %v4308_v42 = vpop.f32.mrf.mxu1 }
 0x1cf   : > { %v931_v43 = vsel %vm930_vm3, %v5147_v41, 0.0 }
 0x1d0   : > { %932 = vadd.xlane.f32.xlu0 %v931_v43 }
 0x259   : > { %v933_v44 = vpop.xlane.xlu0 %932 }
 0x25a   : > { %v935_v45 = vmul.f32 0.03125, %v933_v44  ;;  %v5307_v44 = vld [vmem:[%s6103_s24 + $0x28] sm:$0xf] }
 0x25c   : > { %v936_v46 = vsub.f32 %v5147_v41, %v935_v45 }
 0x25e   : > { %v937_v47 = vmul.f32 %v936_v46, %v936_v46 }
 0x260   : > { %v938_v48 = vsel %vm930_vm3, %v937_v47, 0.0 }
 0x261   : > { %939 = vadd.xlane.f32.xlu0 %v938_v48  ;;  %v5318_v48 = vld [vmem:[%s6103_s24 + $0x10] sm:$0xf] }
 0x2ea   : > { %v940_v52 = vpop.xlane.xlu0 %939 }
 0x2eb   : > { %v941_v53 = vmul.f32 0.03125, %v940_v52 }
 0x2ed   : > { %v942_v54 = vadd.f32 1e-05, %v941_v53  ;;  %v5325_v53 = vld [vmem:[%s6103_s24 + $0x20] sm:$0xff] }
 0x2ef   : > { %4748 = vrsqrt.f32 %v942_v54 }
 0x2fc   : > { %v4749_v55 = vpop.eup %4748 }
 0x2fd   : > { %v944_v57 = vmul.f32 %v4749_v55, %v936_v46  ;;  %v5312_v46 = vld [vmem:[%s6103_s24 + $0x48] sm:$0xff] }
 0x2ff   : > { %v951_v59 = vmul.f32 %v3933_v56, %v944_v57  ;;  %v5333_v57 = vld [vmem:[%s6103_s24 + $0x8] sm:$0xff] }
 0x301   : > { %v958_v60 = vadd.f32 %v3934_v58, %v951_v59  ;;  %v5338_v58 = vld [vmem:[%s6103_s24 + $0x40] sm:$0xf] }
 0x303   : > { %4310 = vmatpush3.msra.mxu1 %v958_v60 }
 0x304   : > { %4312 = vmatmul.mubr.msk.f32.vlgmr.msra.gmra.mxu1 %vm959_vm4, %v5174_v61  ;;  %4320 = vmatprep.subr.mxu1 %v4852_v34 }
 0x305   : > { %4314 = vmatprep.mubr.msk.f32.mxu1 %vm4853_vm0, %v4852_v34  ;;  %4321 = vmatpush3.msra.mxu1 %v1052_v62 }
 0x306   : > { %4322 = vmatprep.subr.mxu1 %v4852_v34 }
 0x307   : > { %4323 = vmatpush3.msra.mxu1 %v1051_v63 }
 0x308   : > { %4315 = vmatmul.mubr.msk.f32.gmra.mxu1 %vm959_vm4, %v5190_v0  ;;  %4324 = vmatprep.subr.mxu1 %v4852_v34 }
 0x309   : > { %4317 = vmatprep.mubr.msk.f32.mxu1 %vm4853_vm0, %v4852_v34  ;;  %4325 = vmatpush3.msra.mxu1 %v1050_v1  ;;  %v5346_v1 = vld [vmem:[%s6103_s24 + $0x58] sm:$0xf] }
 0x30a   : > { %4326 = vmatprep.subr.mxu1 %v4852_v34 }
 0x30b   : > { %4327 = vmatpush3.msra.mxu1 %v1049_v3 }
 0x30c   : > { %4318 = vmatmul.mubr.msk.f32.gmra.mxu1 %vm959_vm4, %v5204_v2  ;;  %4337 = vmatprep.subr.mxu1 %v4852_v34 }
 0x30d   : > { %4328 = vmatprep.mubr.msk.f32.mxu1 %vm4853_vm0, %v4852_v34 }
 0x3c4   : > { %v1035_v5 = vpop.f32.mrf.mxu1 }
 0x3c5   : > { %4329 = vmatmul.mubr.msk.f32.vlgmr.msra.gmra.mxu1 %vm930_vm3, %v1035_v5  ;;  %4363 = vmatmul.mubr.msk.f32.vlgmr.msra.gmra.mxu0 %vm930_vm3, %v1035_v5 }
 0x3c6   : > { %v4313_v7 = vpop.f32.mrf.mxu1  ;;  %4331 = vmatprep.mubr.msk.f32.mxu1 %vm4853_vm0, %v4852_v34  ;;  %4365 = vmatprep.mubr.msk.f32.mxu0 %vm4853_vm0, %v4852_v34 }
 0x3c7   : > { %4338 = vmatpush3.msra.mxu1 %v3944_v6  ;;  %v5358_v6 = vld [vmem:[%s6103_s24 + $0x50] sm:$0xff] }
 0x3c8   : > { %v1040_v9 = vpop.f32.mrf.mxu1  ;;  %4339 = vmatprep.subr.mxu1 %v4852_v34 }
 0x3c9   : > { %4332 = vmatmul.mubr.msk.f32.gmra.mxu1 %vm930_vm3, %v1040_v9  ;;  %4366 = vmatmul.mubr.msk.f32.gmra.mxu0 %vm930_vm3, %v1040_v9 }
 0x3ca   : > { %v4316_v11 = vpop.f32.mrf.mxu1  ;;  %4334 = vmatprep.mubr.msk.f32.mxu1 %vm4853_vm0, %v4852_v34  ;;  %4340 = vmatpush3.msra.mxu1 %v3943_v8 }
 0x3cb   : > { %4368 = vmatprep.mubr.msk.f32.mxu0 %vm4853_vm0, %v4852_v34  ;;  %4341 = vmatprep.subr.mxu1 %v4852_v34 }
 0x3cc   : > { %v1045_v12 = vpop.f32.mrf.mxu1  ;;  %4342 = vmatpush3.msra.mxu1 %v3942_v10 }
 0x3cd   : > { %4335 = vmatmul.mubr.msk.f32.gmra.mxu1 %vm930_vm3, %v1045_v12  ;;  %4369 = vmatmul.mubr.msk.f32.gmra.mxu0 %vm930_vm3, %v1045_v12 }
 0x3ce   : > { %v4319_v14 = vpop.f32.mrf.mxu1  ;;  %4343 = vmatprep.subr.mxu1 %v4852_v34  ;;  %4345 = vmatprep.mubr.msk.f32.mxu1 %vm4853_vm0, %v4852_v34 }
 0x3cf   : > { %4344 = vmatpush3.msra.mxu1 %v3941_v13  ;;  %4394 = vmatprep.mubr.msk.f32.mxu0 %vm4853_vm0, %v4852_v34 }
 0x3d0   : > { %4371 = vmatprep.subr.mxu1 %v4852_v34 }
 0x3d1   : > { %4346 = vmatmul.mubr.msk.f32.vlgmr.msra.gmra.mxu1 %vm930_vm3, %v1035_v5 }
 0x3d2   : > { %4348 = vmatprep.mubr.msk.f32.mxu1 %vm4853_vm0, %v4852_v34  ;;  %4372 = vmatpush3.msra.mxu1 %v3964_v15 }
 0x3d3   : > { %4373 = vmatprep.subr.mxu1 %v4852_v34 }
 0x3d4   : > { %4374 = vmatpush3.msra.mxu1 %v3963_v16 }
 0x3d5   : > { %4349 = vmatmul.mubr.msk.f32.gmra.mxu1 %vm930_vm3, %v1040_v9  ;;  %4375 = vmatprep.subr.mxu1 %v4852_v34 }
 0x3d6   : > { %4351 = vmatprep.mubr.msk.f32.mxu1 %vm4853_vm0, %v4852_v34  ;;  %4376 = vmatpush3.msra.mxu1 %v3962_v17 }
 0x3d7   : > { %4377 = vmatprep.subr.mxu1 %v4852_v34 }
 0x3d8   : > { %4378 = vmatpush3.msra.mxu1 %v3961_v18 }
 0x3d9   : > { %4352 = vmatmul.mubr.msk.f32.gmra.mxu1 %vm930_vm3, %v1045_v12  ;;  %4403 = vmatprep.subr.mxu1 %v4852_v34 }
 0x3da   : > { %4379 = vmatprep.mubr.msk.f32.mxu1 %vm4853_vm0, %v4852_v34 }
 0x3dd   : > { %4380 = vmatmul.mubr.msk.f32.vlgmr.msra.gmra.mxu1 %vm930_vm3, %v1035_v5  ;;  %v5353_v5 = vld [vmem:[%s6103_s24 + $0x38] sm:$0xff] }
 0x3de   : > { %4382 = vmatprep.mubr.msk.f32.mxu1 %vm4853_vm0, %v4852_v34 }
 0x3e1   : > { %4383 = vmatmul.mubr.msk.f32.gmra.mxu1 %vm930_vm3, %v1040_v9 }
 0x3e2   : > { %4385 = vmatprep.mubr.msk.f32.mxu1 %vm4853_vm0, %v4852_v34 }
 0x3e5   : > { %4386 = vmatmul.mubr.msk.f32.gmra.mxu1 %vm930_vm3, %v1045_v12 }
 0x3e6   : > { %4409 = vmatprep.mubr.msk.f32.mxu1 %vm4853_vm0, %v4852_v34 }
 0x485   : > { %v1128_v19 = vpop.f32.mrf.mxu1  ;;  %v1314_v20 = vpop.f32.mrf.mxu0 }
 0x486   : > { %v1145_v39 = vmul.f32 %v5295_v35, %v1128_v19  ;;  %v1332_v47 = vmul.f32 %v5302_v40, %v1314_v20 }
 0x487   : > { %v4330_v21 = vpop.f32.mrf.mxu1  ;;  %v4364_v22 = vpop.f32.mrf.mxu0 }
 0x489   : > { %v1133_v23 = vpop.f32.mrf.mxu1  ;;  %v1319_v24 = vpop.f32.mrf.mxu0 }
 0x48a   : > { %v1146_v3 = vmul.f32 %v5333_v57, %v1133_v23  ;;  %v1333_v12 = vmul.f32 %v5353_v5, %v1319_v24  ;;  %v5384_v23 = vld [vmem:[%s6104_s30] sm:$0xff] }
 0x48b   : > { %v4333_v25 = vpop.f32.mrf.mxu1  ;;  %v4367_v26 = vpop.f32.mrf.mxu0 }
 0x48d   : > { %v1138_v27 = vpop.f32.mrf.mxu1  ;;  %v1324_v28 = vpop.f32.mrf.mxu0 }
 0x48e   : > { %v1147_v55 = vmul.f32 %v5318_v48, %v1138_v27  ;;  %v1334_v4 = vmul.f32 %v5338_v58, %v1324_v28  ;;  %v5390_v27 = vld [vmem:[%s6104_s30 + $0x8] sm:$0xff] }
 0x48f   : > { %v4336_v29 = vpop.f32.mrf.mxu1  ;;  %v4370_v30 = vpop.f32.mrf.mxu0 }
 0x491   : > { %v1219_v31 = vpop.f32.mrf.mxu1 }
 0x492   : > { %v1237_v37 = vmul.f32 %v5290_v32, %v1219_v31 }
 0x493   : > { %v4347_v33 = vpop.f32.mrf.mxu1 }
 0x494   : > { %v1240_v43 = vadd.f32 %v1237_v37, %v1145_v39  ;;  %v5397_v33 = vld [vmem:[%s6104_s30 + $0x10] sm:$0xf] }
 0x495   : > { %v1224_v36 = vpop.f32.mrf.mxu1 }
 0x496   : > { %v1335_v51 = vadd.f32 %v1332_v47, %v1240_v43  ;;  %v1238_v60 = vmul.f32 %v5325_v53, %v1224_v36 }
 0x497   : > { %v4350_v38 = vpop.f32.mrf.mxu1 }
 0x498   : > { %v1241_v8 = vadd.f32 %v1238_v60, %v1146_v3 }
 0x499   : > { %v1229_v42 = vpop.f32.mrf.mxu1 }
 0x49a   : > { %v1239_v50 = vmul.f32 %v5307_v44, %v1229_v42  ;;  %v1336_v15 = vadd.f32 %v1333_v12, %v1241_v8 }
 0x49b   : > { %v4353_v45 = vpop.f32.mrf.mxu1 }
 0x49c   : > { %v1242_v62 = vadd.f32 %v1239_v50, %v1147_v55 }
 0x49d   : > { %v1409_v49 = vpop.f32.mrf.mxu1 }
 0x49e   : > { %v1427_v52 = vmul.f32 %v5312_v46, %v1409_v49  ;;  %v1337_v9 = vadd.f32 %v1334_v4, %v1242_v62 }
 0x49f   : > { %v4381_v54 = vpop.f32.mrf.mxu1 }
 0x4a0   : > { %v5328_v56 = vadd.f32 %v1427_v52, %v1335_v51 }
 0x4a1   : > { %v1414_v59 = vpop.f32.mrf.mxu1 }
 0x4a2   : > { %1439 = vrot.lane.b32.xlu0 %v5328_v56, %s4854_s4  ;;  %v1428_v13 = vmul.f32 %v5358_v6, %v1414_v59  ;;  %v1433_v20 = vmul.f32 0.35355338, %v5328_v56 }
 0x4a3   : > { %v4384_v63 = vpop.f32.mrf.mxu1 }
 0x4a4   : > { %v1431_v16 = vadd.f32 %v1428_v13, %v1336_v15 }
 0x4a5   : > { %v1419_v7 = vpop.f32.mrf.mxu1 }
 0x4a6   : > { %v1429_v10 = vmul.f32 %v5346_v1, %v1419_v7  ;;  %v1434_v21 = vmul.f32 0.35355338, %v1431_v16 }
 0x4a7   : > { %v4387_v11 = vpop.f32.mrf.mxu1 }
 0x4a8   : > { %v1432_v14 = vadd.f32 %v1429_v10, %v1337_v9  ;;  %v1674_v9 = vld [vmem:[%s6044_s12] sm:$0xff] }
 0x4aa   : > { %1443 = vrot.lane.b32.xlu1 %v1432_v14, %s4854_s4  ;;  %v1435_v22 = vmul.f32 0.35355338, %v1432_v14 }
 0x4ae   : > { %1441 = vrot.lane.b32.xlu1 %v1431_v16, %s4854_s4 }
 0x514   : > { %v1440_v19 = vpop.permute.xlu0 %1439 }
 0x51c   : > { %v1444_v17 = vpop.permute.xlu1 %1443 }
 0x51d   : > { %4389 = vmatpush3.xpose.msk.msra.mxu0 %vm959_vm4, %v1444_v17 }
 0x51e   : > { %4390 = vmatprep.subr.mxu0 %v4852_v34 }
 0x520   : > { %v1442_v18 = vpop.permute.xlu1 %1441 }
 0x521   : > { %4391 = vmatpush3.xpose.msk.msra.mxu0 %vm959_vm4, %v1442_v18 }
 0x522   : > { %4392 = vmatprep.subr.mxu0 %v4852_v34 }
 0x525   : > { %4393 = vmatpush3.xpose.msk.msra.mxu0 %vm959_vm4, %v1440_v19 }
 0x526   : > { %4418 = vmatprep.subr.mxu0 %v4852_v34 }
 0x528   : > { %4395 = vmatmul.mubr.msk.f32.vlgmr.msra.gmra.mxu0 %vm959_vm4, %v1433_v20 }
 0x529   : > { %4397 = vmatprep.mubr.msk.f32.mxu0 %vm4853_vm0, %v4852_v34  ;;  %4419 = vmatpush3.msra.mxu0 %v1674_v9 }
 0x52a   : > { %4440 = vmatprep.subr.mxu0 %v4852_v34 }
 0x52c   : > { %4398 = vmatmul.mubr.msk.f32.gmra.mxu0 %vm959_vm4, %v1434_v21  ;;  %v3991_v21 = vld [vmem:[%s6044_s12 + $0x10] sm:$0xff] }
 0x52d   : > { %4400 = vmatprep.mubr.msk.f32.mxu0 %vm4853_vm0, %v4852_v34 }
 0x530   : > { %4401 = vmatmul.mubr.msk.f32.gmra.mxu0 %vm959_vm4, %v1435_v22  ;;  %v3998_v22 = vld [vmem:[%s6044_s12 + $0x18] sm:$0xff] }
 0x531   : > { %4420 = vmatprep.mubr.msk.f32.mxu0 %vm4853_vm0, %v4852_v34 }
 0x5e8   : > { %v1526_v24 = vpop.f32.mrf.mxu0 }
 0x5e9   : > { %v1527_v25 = vadd.f32 %v1526_v24, %v5384_v23 }
 0x5ea   : > { %v4396_v26 = vpop.f32.mrf.mxu0 }
 0x5eb   : > { %v1541_v28 = vsel %vm1540_vm5, %v1527_v25, -inf }
 0x5ec   : > { %1542 = vmax.xlane.f32.xlu1 %v1541_v28  ;;  %v1531_v29 = vpop.f32.mrf.mxu0 }
 0x5ed   : > { %v1532_v30 = vadd.f32 %v1531_v29, %v5390_v27 }
 0x5ee   : > { %v4399_v31 = vpop.f32.mrf.mxu0 }
 0x5ef   : > { %v1544_v36 = vsel %vm1540_vm5, %v1532_v30, -inf }
 0x5f0   : > { %1545 = vmax.xlane.f32.xlu0 %v1544_v36  ;;  %v1536_v37 = vpop.f32.mrf.mxu0 }
 0x5f1   : > { %v1537_v38 = vadd.f32 %v1536_v37, %v5397_v33 }
 0x5f2   : > { %v4402_v39 = vpop.f32.mrf.mxu0 }
 0x5f3   : > { %v1548_v42 = vsel %vm1547_vm6, %v1537_v38, -inf }
 0x5f4   : > { %1549 = vmax.xlane.f32.xlu1 %v1548_v42 }
 0x605   : > { %1579 = vrot.lane.b32.xlu1 %v1432_v14, %s6069_s8 }
 0x606   : > { %1577 = vrot.lane.b32.xlu0 %v1431_v16, %s6069_s8 }
 0x675   : > { %v1543_v43 = vpop.xlane.xlu1 %1542 }
 0x676   : > { %v1551_v45 = vsub.f32 %v1527_v25, %v1543_v43 }
 0x678   : > { %v1554_v47 = vmul.f32 1.442695, %v1551_v45 }
 0x679   : > { %v1546_v49 = vpop.xlane.xlu0 %1545 }
 0x67a   : > { %4750 = vpow2.f32 %v1554_v47  ;;  %v1552_v50 = vsub.f32 %v1532_v30, %v1546_v49 }
 0x67c   : > { %v1556_v51 = vmul.f32 1.442695, %v1552_v50 }
 0x67d   : > { %v1550_v52 = vpop.xlane.xlu1 %1549  ;;  %v1578_v60 = vpop.permute.xlu0 %1577 }
 0x67e   : > { %4752 = vpow2.f32 %v1556_v51  ;;  %v1553_v54 = vsub.f32 %v1537_v38, %v1550_v52 }
 0x680   : > { %v1558_v55 = vmul.f32 1.442695, %v1553_v54  ;;  %v5477_v54 = vld [vmem:[%s6105_s7 + $0x8] sm:$0xff] }
 0x681   : > { %v1580_v59 = vpop.permute.xlu1 %1579 }
 0x682   : > { %4754 = vpow2.f32 %v1558_v55  ;;  %4404 = vmatpush3.msk.msra.mxu1 %vm854_vm1, %v1580_v59  ;;  %v5482_v55 = vld [vmem:[%s6105_s7 + $0x20] sm:$0xff]  ;;  %v5487_v59 = vld [vmem:[%s6105_s7 + $0x10] sm:$0xf] }
 0x683   : > { %4405 = vmatprep.subr.mxu1 %v4852_v34 }
 0x684   : > { %4406 = vmatpush3.msra.mxu1 %v1578_v60  ;;  %v5492_v60 = vld [vmem:[%s6105_s7 + $0x28] sm:$0xf] }
 0x685   : > { %4407 = vmatprep.subr.mxu1 %v4852_v34 }
 0x687   : > { %v4751_v62 = vpop.eup %4750 }
 0x688   : > { %v1560_v63 = vsel %vm1540_vm5, %v4751_v62, 0.0 }
 0x689   : > { %1561 = vadd.xlane.f32.xlu1 %v1560_v63 }
 0x68b   : > { %v4753_v3 = vpop.eup %4752 }
 0x68c   : > { %v1563_v4 = vsel %vm1540_vm5, %v4753_v3, 0.0 }
 0x68d   : > { %1564 = vadd.xlane.f32.xlu1 %v1563_v4  ;;  %v5502_v4 = vld [vmem:[%s6105_s7 + $0x18] sm:$0xff] }
 0x68f   : > { %v4755_v7 = vpop.eup %4754 }
 0x690   : > { %v1566_v8 = vsel %vm1547_vm6, %v4755_v7, 0.0 }
 0x691   : > { %1567 = vadd.xlane.f32.xlu1 %v1566_v8  ;;  %v5507_v8 = vld [vmem:[%s6105_s7 + $0x38] sm:$0xff] }
 0x6a2   : > { %1575 = vrot.lane.b32.xlu1 %v5328_v56, %s6069_s8  ;;  %v3984_v56 = vld [vmem:[%s6044_s12 + $0x8] sm:$0xff] }
 0x712   : > { %v1562_v10 = vpop.xlane.xlu1 %1561 }
 0x713   : > { %4756 = vrcp.f32 %v1562_v10 }
 0x716   : > { %v1565_v11 = vpop.xlane.xlu1 %1564 }
 0x717   : > { %4758 = vrcp.f32 %v1565_v11 }
 0x71a   : > { %v1568_v12 = vpop.xlane.xlu1 %1567 }
 0x71b   : > { %4760 = vrcp.f32 %v1568_v12 }
 0x71e   : > { %v1576_v13 = vpop.permute.xlu1 %1575 }
 0x71f   : > { %4408 = vmatpush3.msra.mxu1 %v1576_v13 }
 0x720   : > { %v4757_v14 = vpop.eup %4756  ;;  %4429 = vmatprep.subr.mxu1 %v4852_v34 }
 0x721   : > { %v1572_v15 = vmul.f32 %v4757_v14, %v4751_v62  ;;  %v5516_v14 = vld [vmem:[%s6105_s7 + $0x30] sm:$0xff] }
 0x723   : > { %4410 = vmatmul.mubr.msk.f32.vlgmr.msra.gmra.mxu1 %vm1540_vm5, %v1572_v15 }
 0x724   : > { %v4759_v16 = vpop.eup %4758  ;;  %4412 = vmatprep.mubr.msk.f32.mxu1 %vm4853_vm0, %v4852_v34  ;;  %4430 = vmatpush3.msra.mxu1 %v3984_v56 }
 0x725   : > { %v1573_v17 = vmul.f32 %v4759_v16, %v4753_v3  ;;  %4451 = vmatprep.subr.mxu1 %v4852_v34  ;;  %v5497_v3 = vld [vmem:[%s6105_s7] sm:$0xff] }
 0x726   : > { %v5521_v16 = vld [vmem:[%s6105_s7 + $0x40] sm:$0xf] }
 0x727   : > { %4413 = vmatmul.mubr.msk.f32.gmra.mxu1 %vm1540_vm5, %v1573_v17 }
 0x728   : > { %v4761_v18 = vpop.eup %4760  ;;  %4415 = vmatprep.mubr.msk.f32.mxu1 %vm4853_vm0, %v4852_v34 }
 0x729   : > { %v1574_v19 = vmul.f32 %v4761_v18, %v4755_v7 }
 0x72b   : > { %4416 = vmatmul.mubr.msk.f32.gmra.mxu1 %vm1540_vm5, %v1574_v19 }
 0x72c   : > { %4431 = vmatprep.mubr.msk.f32.mxu1 %vm4853_vm0, %v4852_v34 }
 0x7e3   : > { %v1660_v20 = vpop.f32.mrf.mxu1 }
 0x7e4   : > { %4421 = vmatmul.mubr.msk.f32.vlgmr.msra.gmra.mxu0 %vm959_vm4, %v1660_v20  ;;  %4432 = vmatmul.mubr.msk.f32.vlgmr.msra.gmra.mxu1 %vm959_vm4, %v1660_v20 }
 0x7e5   : > { %v4411_v24 = vpop.f32.mrf.mxu1  ;;  %4423 = vmatprep.mubr.msk.f32.mxu0 %vm4853_vm0, %v4852_v34  ;;  %4434 = vmatprep.mubr.msk.f32.mxu1 %vm4853_vm0, %v4852_v34 }
 0x7e6   : > { %4441 = vmatpush3.msra.mxu0 %v3991_v21  ;;  %4452 = vmatpush3.msra.mxu1 %v3998_v22  ;;  %v5529_v22 = vld [vmem:[%s6105_s7 + $0x58] sm:$0xf] }
 0x7e7   : > { %v1665_v25 = vpop.f32.mrf.mxu1  ;;  %4462 = vmatprep.subr.mxu0 %v4852_v34  ;;  %4471 = vmatprep.subr.mxu1 %v4852_v34 }
 0x7e8   : > { %4424 = vmatmul.mubr.msk.f32.gmra.mxu0 %vm959_vm4, %v1665_v25  ;;  %4435 = vmatmul.mubr.msk.f32.gmra.mxu1 %vm959_vm4, %v1665_v25 }
 0x7e9   : > { %v4414_v26 = vpop.f32.mrf.mxu1  ;;  %4426 = vmatprep.mubr.msk.f32.mxu0 %vm4853_vm0, %v4852_v34  ;;  %4437 = vmatprep.mubr.msk.f32.mxu1 %vm4853_vm0, %v4852_v34 }
 0x7eb   : > { %v1670_v28 = vpop.f32.mrf.mxu1 }
 0x7ec   : > { %4427 = vmatmul.mubr.msk.f32.gmra.mxu0 %vm959_vm4, %v1670_v28  ;;  %4438 = vmatmul.mubr.msk.f32.gmra.mxu1 %vm959_vm4, %v1670_v28 }
 0x7ed   : > { %v4417_v29 = vpop.f32.mrf.mxu1  ;;  %4442 = vmatprep.mubr.msk.f32.mxu0 %vm4853_vm0, %v4852_v34  ;;  %4453 = vmatprep.mubr.msk.f32.mxu1 %vm4853_vm0, %v4852_v34 }
 0x7ee   : > { %v5536_v29 = vld [vmem:[%s6105_s7 + $0x50] sm:$0xff] }
 0x7f0   : > { %4443 = vmatmul.mubr.msk.f32.vlgmr.msra.gmra.mxu0 %vm959_vm4, %v1660_v20  ;;  %4454 = vmatmul.mubr.msk.f32.vlgmr.msra.gmra.mxu1 %vm959_vm4, %v1660_v20 }
 0x7f1   : > { %4445 = vmatprep.mubr.msk.f32.mxu0 %vm4853_vm0, %v4852_v34  ;;  %4456 = vmatprep.mubr.msk.f32.mxu1 %vm4853_vm0, %v4852_v34 }
 0x7f4   : > { %4446 = vmatmul.mubr.msk.f32.gmra.mxu0 %vm959_vm4, %v1665_v25  ;;  %4457 = vmatmul.mubr.msk.f32.gmra.mxu1 %vm959_vm4, %v1665_v25 }
 0x7f5   : > { %4448 = vmatprep.mubr.msk.f32.mxu0 %vm4853_vm0, %v4852_v34  ;;  %4459 = vmatprep.mubr.msk.f32.mxu1 %vm4853_vm0, %v4852_v34 }
 0x7f8   : > { %4449 = vmatmul.mubr.msk.f32.gmra.mxu0 %vm959_vm4, %v1670_v28  ;;  %4460 = vmatmul.mubr.msk.f32.gmra.mxu1 %vm959_vm4, %v1670_v28 }
 0x7f9   : > { %4468 = vmatprep.mubr.msk.f32.mxu0 %vm4853_vm0, %v4852_v34  ;;  %4479 = vmatprep.mubr.msk.f32.mxu1 %vm4853_vm0, %v4852_v34 }
 0x8a4   : > { %v1750_v30 = vpop.f32.mrf.mxu0  ;;  %v1838_v31 = vpop.f32.mrf.mxu1 }
 0x8a5   : > { %v1767_v17 = vmul.f32 %v5497_v3, %v1750_v30  ;;  %v1856_v18 = vmul.f32 %v5502_v4, %v1838_v31 }
 0x8a6   : > { %v4422_v36 = vpop.f32.mrf.mxu0  ;;  %v4433_v37 = vpop.f32.mrf.mxu1 }
 0x8a7   : > { %v1859_v36 = vadd.f32 %v1856_v18, %v1767_v17  ;;  %v2163_v18 = vld [vmem:[%s6048_s16 + $0x18] sm:$0xff] }
 0x8a8   : > { %v1755_v38 = vpop.f32.mrf.mxu0  ;;  %v1843_v39 = vpop.f32.mrf.mxu1  ;;  %4472 = vmatpush3.msra.mxu1 %v2163_v18 }
 0x8a9   : > { %v1768_v10 = vmul.f32 %v5477_v54, %v1755_v38  ;;  %v1857_v11 = vmul.f32 %v5482_v55, %v1843_v39  ;;  %4473 = vmatprep.subr.mxu1 %v4852_v34 }
 0x8aa   : > { %v4425_v42 = vpop.f32.mrf.mxu0  ;;  %v4436_v43 = vpop.f32.mrf.mxu1 }
 0x8ab   : > { %v1860_v24 = vadd.f32 %v1857_v11, %v1768_v10  ;;  %v5542_v42 = vld [vmem:[%s6105_s7 + $0x48] sm:$0xff]  ;;  %s5997_s7 = scalar_lea.hbm %s6109_s28, %s4102_s29 }
 0x8ac   : > { %v1760_v45 = vpop.f32.mrf.mxu0  ;;  %v1848_v47 = vpop.f32.mrf.mxu1 }
 0x8ad   : > { %v1769_v12 = vmul.f32 %v5487_v59, %v1760_v45  ;;  %v1858_v13 = vmul.f32 %v5492_v60, %v1848_v47 }
 0x8ae   : > { %v4428_v49 = vpop.f32.mrf.mxu0  ;;  %v4439_v50 = vpop.f32.mrf.mxu1 }
 0x8af   : > { %v1861_v25 = vadd.f32 %v1858_v13, %v1769_v12 }
 0x8b0   : > { %v1930_v51 = vpop.f32.mrf.mxu0  ;;  %v2022_v52 = vpop.f32.mrf.mxu1 }
 0x8b1   : > { %v1948_v26 = vmul.f32 %v5516_v14, %v1930_v51  ;;  %v2040_v49 = vmul.f32 %v5542_v42, %v2022_v52 }
 0x8b2   : > { %v4444_v62 = vpop.f32.mrf.mxu0  ;;  %v4455_v63 = vpop.f32.mrf.mxu1 }
 0x8b3   : > { %v1951_v43 = vadd.f32 %v1948_v26, %v1859_v36  ;;  %v5551_v62 = vld [vmem:[%s6106_s5] sm:$0xff]  ;;  %s4794_s5 = sshll.u32 %s4856_s6, 4  ;;  %s4795_s5 = int_to_ptr.vmem [resolvable:$false] %s4794_s5 }
 0x8b4   : > { %v1935_v7 = vpop.f32.mrf.mxu0  ;;  %v2027_v9 = vpop.f32.mrf.mxu1  ;;  %v4007_v63 = vld [vmem:[%s6045_s13] ss:$0 sm:$0xff]  ;;  %s4796_s0 = scalar_lea.vmem %s4795_s5, 32  ;;  %p4797_p0 = scmp.lt.s32.totalorder %s3871_s2, %s4795_s5 }
 0x8b5   : > { %v1949_v19 = vmul.f32 %v5507_v8, %v1935_v7  ;;  %v2041_v45 = vmul.f32 %v5536_v29, %v2027_v9  ;;  %v2043_v51 = vadd.f32 %v2040_v49, %v1951_v43  ;;  %v2276_v43 = vld [vmem:[%s6050_s18 + $0x28] sm:$0xff]  ;;  %v2273_v49 = vld [vmem:[%s6050_s18 + $0x10] sm:$0xff] }
 0x8b6   : > { %v4447_v15 = vpop.f32.mrf.mxu0  ;;  %v4458_v56 = vpop.f32.mrf.mxu1 }
 0x8b7   : > { %v1952_v37 = vadd.f32 %v1949_v19, %v1860_v24  ;;  %v2161_v19 = vld [vmem:[%s6048_s16 + $0x8] sm:$0xff] }
 0x8b8   : > { %v1940_v20 = vpop.f32.mrf.mxu0  ;;  %v2032_v21 = vpop.f32.mrf.mxu1 }
 0x8b9   : > { %v1950_v28 = vmul.f32 %v5521_v16, %v1940_v20  ;;  %v2042_v39 = vmul.f32 %v5529_v22, %v2032_v21  ;;  %v2044_v50 = vadd.f32 %v2041_v45, %v1952_v37  ;;  %v2160_v20 = vld [vmem:[%s6048_s16] sm:$0xff] }
 0x8ba   : > { %v4450_v30 = vpop.f32.mrf.mxu0  ;;  %v4461_v31 = vpop.f32.mrf.mxu1  ;;  %v2275_v45 = vld [vmem:[%s6050_s18 + $0x20] sm:$0xff] }
 0x8bb   : > { %v1953_v38 = vadd.f32 %v1950_v28, %v1861_v25  ;;  %v4008_v28 = vld [vmem:[%s6046_s14] ss:$0 sm:$0xff] }
 0x8bc   : > { %v4009_v31 = vld [vmem:[%s6047_s15] ss:$0 sm:$0xff] }
 0x8bd   : > { %v2045_v47 = vadd.f32 %v2042_v39, %v1953_v38  ;;  %v2278_v38 = vld [vmem:[%s6050_s18 + $0x38] sm:$0xff]  ;;  %v2277_v39 = vld [vmem:[%s6050_s18 + $0x30] sm:$0xff] }
 0x8bf   : > { %4463 = vmatpush3.msk.msra.mxu0 %vm854_vm1, %v2045_v47  ;;  %v2274_v47 = vld [vmem:[%s6050_s18 + $0x18] sm:$0xff] }
 0x8c0   : > { %4464 = vmatprep.subr.mxu0 %v4852_v34 }
 0x8c1   : > { %4465 = vmatpush3.msra.mxu0 %v2044_v50  ;;  %v2272_v50 = vld [vmem:[%s6050_s18 + $0x8] sm:$0xff] }
 0x8c2   : > { %4466 = vmatprep.subr.mxu0 %v4852_v34 }
 0x8c3   : > { %4467 = vmatpush3.msra.mxu0 %v2043_v51  ;;  %v2271_v51 = vld [vmem:[%s6050_s18] sm:$0xff] }
 0x8c4   : > { %4469 = vmatmul.mubr.msk.f32.vlgmr.msra.gmra.mxu0 %vm1540_vm5, %v5551_v62  ;;  %4482 = vmatprep.subr.mxu0 %v4852_v34 }
 0x8c5   : > { %4498 = vmatprep.mubr.msk.f32.mxu0 %vm4853_vm0, %v4852_v34  ;;  %4483 = vmatpush3.msra.mxu0 %v2278_v38 }
 0x8c6   : > { %4484 = vmatprep.subr.mxu0 %v4852_v34 }
 0x8c7   : > { %4485 = vmatpush3.msra.mxu0 %v2277_v39 }
 0x8c8   : > { %4486 = vmatprep.subr.mxu0 %v4852_v34 }
 0x8c9   : > { %4487 = vmatpush3.msra.mxu0 %v2276_v43 }
 0x8ca   : > { %4488 = vmatprep.subr.mxu0 %v4852_v34 }
 0x8cb   : > { %4489 = vmatpush3.msra.mxu0 %v2275_v45 }
 0x8cc   : > { %4490 = vmatprep.subr.mxu0 %v4852_v34 }
 0x8cd   : > { %4491 = vmatpush3.msra.mxu0 %v2274_v47 }
 0x8ce   : > { %4492 = vmatprep.subr.mxu0 %v4852_v34 }
 0x8cf   : > { %4493 = vmatpush3.msra.mxu0 %v2273_v49 }
 0x8d0   : > { %4494 = vmatprep.subr.mxu0 %v4852_v34 }
 0x8d1   : > { %4495 = vmatpush3.msra.mxu0 %v2272_v50 }
 0x8d2   : > { %4496 = vmatprep.subr.mxu0 %v4852_v34 }
 0x8d3   : > { %4497 = vmatpush3.msra.mxu0 %v2271_v51  ;;  %v4013_v51 = vld [vmem:[%s6051_s19] ss:$0 sm:$0xff] }
 0x8d4   : > { %4529 = vmatprep.subr.mxu0 %v4852_v34 }
 0x984   : > { %v2118_v52 = vpop.f32.mrf.mxu0 }
 0x985   : > { %v2122_v7 = vadd.f32 %v2118_v52, %v5147_v41  ;;  %v2162_v41 = vld [vmem:[%s6048_s16 + $0x10] sm:$0xff]  ;;  %v4010_v52 = vld [vmem:[%s6049_s17] ss:$0 sm:$0xff] }
 0x986   : > { %v4470_v9 = vpop.f32.mrf.mxu0  ;;  %4474 = vmatpush3.msra.mxu1 %v2162_v41 }
 0x987   : > { %v5563_v10 = vadd.f32 %v4007_v63, %v2122_v7  ;;  %4475 = vmatprep.subr.mxu1 %v4852_v34 }
 0x988   : > { %4476 = vmatpush3.msra.mxu1 %v2161_v19 }
 0x989   : > { %v2133_v11 = vsel %vm930_vm3, %v5563_v10, 0.0  ;;  %4477 = vmatprep.subr.mxu1 %v4852_v34 }
 0x98a   : > { %2134 = vadd.xlane.f32.xlu1 %v2133_v11  ;;  %4478 = vmatpush3.msra.mxu1 %v2160_v20 }
 0x98b   : > { %4501 = vmatprep.subr.mxu1 %v4852_v34 }
 0xa13   : > { %v2135_v12 = vpop.xlane.xlu1 %2134 }
 0xa14   : > { %v2136_v13 = vmul.f32 0.03125, %v2135_v12 }
 0xa16   : > { %v2137_v15 = vsub.f32 %v5563_v10, %v2136_v13 }
 0xa18   : > { %v2138_v56 = vmul.f32 %v2137_v15, %v2137_v15 }
 0xa1a   : > { %v2139_v17 = vsel %vm930_vm3, %v2138_v56, 0.0 }
 0xa1b   : > { %2140 = vadd.xlane.f32.xlu0 %v2139_v17 }
 0xaa4   : > { %v2141_v21 = vpop.xlane.xlu0 %2140 }
 0xaa5   : > { %v2142_v24 = vmul.f32 0.03125, %v2141_v21 }
 0xaa7   : > { %v2143_v25 = vadd.f32 1e-05, %v2142_v24 }
 0xaa9   : > { %4762 = vrsqrt.f32 %v2143_v25 }
 0xab6   : > { %v4763_v26 = vpop.eup %4762 }
 0xab7   : > { %v2145_v30 = vmul.f32 %v4763_v26, %v2137_v15 }
 0xab9   : > { %v2152_v36 = vmul.f32 %v4008_v28, %v2145_v30 }
 0xabb   : > { %v2159_v37 = vadd.f32 %v4009_v31, %v2152_v36 }
 0xabd   : > { %4480 = vmatmul.mubr.msk.f32.vlgmr.msra.gmra.mxu1 %vm930_vm3, %v2159_v37 }
 0xabe   : > { %4503 = vmatprep.mubr.msk.f32.mxu1 %vm4853_vm0, %v4852_v34 }
 0xb7d   : > { %v2240_v63 = vpop.f32.mrf.mxu1 }
 0xb7e   : > { %v2241_v7 = vadd.f32 %v4010_v52, %v2240_v63 }
 0xb7f   : > { %v4481_v9 = vpop.f32.mrf.mxu1 }
 0xb80   : > { %v2245_v11 = vmul.f32 0.70710677, %v2241_v7  ;;  %v2244_v45 = vmul.f32 0.5, %v2241_v7 }
 0xb82   : > { %v2246_v12 = vand.u32 2147483647, %v2245_v11  ;;  %vm2266_vm7 = vcmp.lt.f32.partialorder %v2245_v11, 0.0 }
 0xb84   : > { %v2247_v13 = vmul.f32 0.3275911, %v2246_v12  ;;  %v2260_v56 = vsub.f32 0.0, %v2246_v12 }
 0xb86   : > { %v2248_v15 = vadd.f32 1.0, %v2247_v13  ;;  %v2261_v17 = vmul.f32 %v2260_v56, %v2246_v12 }
 0xb88   : > { %4764 = vrcp.f32 %v2248_v15  ;;  %v2262_v19 = vmul.f32 1.442695, %v2261_v17  ;;  %v4031_v17 = vld [vmem:[%s6043_s11 + $0xb8] sm:$0xff] }
 0xb8a   : > { %4766 = vpow2.f32 %v2262_v19 }
 0xb95   : > { %v4765_v18 = vpop.eup %4764 }
 0xb96   : > { %v2251_v41 = vmul.f32 1.0614054, %v4765_v18 }
 0xb97   : > { %v4767_v36 = vpop.eup %4766 }
 0xb98   : > { %v2252_v20 = vadd.f32 -1.4531521, %v2251_v41 }
 0xb9a   : > { %v2253_v21 = vmul.f32 %v4765_v18, %v2252_v20 }
 0xb9c   : > { %v2254_v24 = vadd.f32 1.4214138, %v2253_v21 }
 0xb9e   : > { %v2255_v25 = vmul.f32 %v4765_v18, %v2254_v24  ;;  %v4016_v24 = vld [vmem:[%s6099_s9 + $0x1] ss:$0 sm:$0xff]  ;;  %s3858_s9 = scalar_lea.sflag [#allocation3], %s728_s23 }
 0xba0   : > { %v2256_v26 = vadd.f32 -0.28449672, %v2255_v25 }
 0xba2   : > { %v2257_v28 = vmul.f32 %v4765_v18, %v2256_v26  ;;  %v4017_v26 = vld [vmem:[%s6100_s10 + $0x1] ss:$0 sm:$0xff]  ;;  %s4790_s10 = scalar_lea.vmem %s3871_s2, 16 }
 0xba3   : > { %p4791_p11 = scmp.ne.s32.totalorder %s3871_s2, %s4790_s10  ;;  %p4798_p1 = scmp.lt.s32.totalorder %s4796_s0, %s4790_s10 }
 0xba4   : > { %v2258_v30 = vadd.f32 0.2548296, %v2257_v28 }
 0xba5   : > { %p4792_p12 = pnand %p4791_p11, %p5020_p5  ;;  %p4799_p2 = por %p4798_p1, %p4797_p0 }
 0xba6   : > { %v2259_v31 = vmul.f32 %v4765_v18, %v2258_v30  ;;  %v4029_v18 = vld [vmem:[%s6043_s11 + $0xa8] sm:$0xff] }
 0xba7   : > { %p4793_p13 = pneg %p4792_p12 }
 0xba8   : > { %v2264_v37 = vmul.f32 %v4767_v36, %v2259_v31  ;;  %v4024_v31 = vld [vmem:[%s6043_s11 + $0x98] sm:$0xff]  ;;  %v4023_v36 = vld [vmem:[%s6043_s11 + $0x90] sm:$0xff] }
 0xba9   : > { %p4800_p3 = pnand %p4799_p2, %p4793_p13 }
 0xbaa   : > { %v2265_v38 = vsub.f32 1.0, %v2264_v37  ;;  %v4022_v37 = vld [vmem:[%s6043_s11 + $0x88] sm:$0xff] }
 0xbac   : > { %v2267_v39 = vsub.f32 0.0, %v2265_v38 }
 0xbae   : > { %v2268_v43 = vsel %vm2266_vm7, %v2267_v39, %v2265_v38  ;;  %v4045_v39 = vld [vmem:[%s6043_s11 + $0xf8] sm:$0xff] }
 0xbaf   : > { %v2269_v47 = vadd.f32 1.0, %v2268_v43 }
 0xbb1   : > { %v2270_v49 = vmul.f32 %v2269_v47, %v2244_v45  ;;  %v4037_v47 = vld [vmem:[%s6043_s11 + $0xd0] sm:$0xff] }
 0xbb3   : > { %4499 = vmatmul.mubr.msk.f32.vlgmr.msra.gmra.mxu0 %vm2279_vm8, %v2270_v49  ;;  %v4044_v49 = vld [vmem:[%s6043_s11 + $0xf0] sm:$0xff] }
 0xbb4   : > { %4537 = vmatprep.mubr.msk.f32.mxu0 %vm4853_vm0, %v4852_v34  ;;  %4530 = vmatpush3.msra.mxu0 %v4031_v17 }
 0xbb5   : > { %4531 = vmatprep.subr.mxu0 %v4852_v34 }
 0xc73   : > { %v2349_v50 = vpop.f32.mrf.mxu0 }
 0xc74   : > { %v2353_v52 = vadd.f32 %v2349_v50, %v5563_v10  ;;  %v4030_v10 = vld [vmem:[%s6043_s11 + $0xb0] sm:$0xff] }
 0xc75   : > { %v4500_v63 = vpop.f32.mrf.mxu0  ;;  %4532 = vmatpush3.msra.mxu0 %v4030_v10 }
 0xc76   : > { %v5636_v9 = vadd.f32 %v4013_v51, %v2353_v52  ;;  %4533 = vmatprep.subr.mxu0 %v4852_v34  ;;  %v4036_v51 = vld [vmem:[%s6043_s11 + $0xc8] sm:$0xff] }
 0xc77   : > { %4534 = vmatpush3.msra.mxu0 %v4029_v18  ;;  %v4043_v52 = vld [vmem:[%s6043_s11 + $0xe8] sm:$0xff] }
 0xc78   : > { %v2366_v7 = vsel %vm930_vm3, %v5636_v9, 0.0  ;;  %4535 = vmatprep.subr.mxu0 %v4852_v34 }
 0xc79   : > { %2367 = vadd.xlane.f32.xlu0 %v2366_v7  ;;  %v4035_v7 = vld [vmem:[%s6043_s11 + $0xc0] sm:$0xff] }
 0xd02   : > { %v2368_v11 = vpop.xlane.xlu0 %2367 }
 0xd03   : > { %v2369_v12 = vmul.f32 0.03125, %v2368_v11 }
 0xd05   : > { %v2370_v13 = vsub.f32 %v5636_v9, %v2369_v12  ;;  %v4042_v12 = vld [vmem:[%s6043_s11 + $0xe0] sm:$0xff] }
 0xd07   : > { %v2371_v15 = vmul.f32 %v2370_v13, %v2370_v13 }
 0xd09   : > { %v2372_v56 = vsel %vm930_vm3, %v2371_v15, 0.0 }
 0xd0a   : > { %2373 = vadd.xlane.f32.xlu1 %v2372_v56 }
 0xd93   : > { %v2374_v41 = vpop.xlane.xlu1 %2373 }
 0xd94   : > { %v2375_v19 = vmul.f32 0.03125, %v2374_v41 }
 0xd96   : > { %v2376_v20 = vadd.f32 1e-05, %v2375_v19 }
 0xd98   : > { %4768 = vrsqrt.f32 %v2376_v20 }
 0xda5   : > { %v4769_v21 = vpop.eup %4768 }
 0xda6   : > { %v2378_v25 = vmul.f32 %v4769_v21, %v2370_v13 }
 0xda8   : > { %v2385_v28 = vmul.f32 %v4016_v24, %v2378_v25 }
 0xdaa   : > { %v2392_v30 = vadd.f32 %v4017_v26, %v2385_v28 }
 0xdac   : > { %4502 = vmatpush3.msra.mxu1 %v2392_v30 }
 0xdad   : > { %4504 = vmatmul.mubr.msk.f32.vlgmr.msra.gmra.mxu1 %vm959_vm4, %v5174_v61  ;;  %4512 = vmatprep.subr.mxu1 %v4852_v34  ;;  %v4021_v61 = vld [vmem:[%s6043_s11 + $0x80] sm:$0xff] }
 0xdae   : > { %4506 = vmatprep.mubr.msk.f32.mxu1 %vm4853_vm0, %v4852_v34  ;;  %4513 = vmatpush3.msra.mxu1 %v4024_v31 }
 0xdaf   : > { %4514 = vmatprep.subr.mxu1 %v4852_v34 }
 0xdb0   : > { %4515 = vmatpush3.msra.mxu1 %v4023_v36 }
 0xdb1   : > { %4507 = vmatmul.mubr.msk.f32.gmra.mxu1 %vm959_vm4, %v5190_v0  ;;  %4516 = vmatprep.subr.mxu1 %v4852_v34  ;;  %v4028_v0 = vld [vmem:[%s6043_s11 + $0xa0] sm:$0xff] }
 0xdb2   : > { %4509 = vmatprep.mubr.msk.f32.mxu1 %vm4853_vm0, %v4852_v34  ;;  %4517 = vmatpush3.msra.mxu1 %v4022_v37 }
 0xdb3   : > { %4518 = vmatprep.subr.mxu1 %v4852_v34  ;;  %4536 = vmatpush3.msra.mxu0 %v4028_v0 }
 0xdb4   : > { %4519 = vmatpush3.msra.mxu1 %v4021_v61  ;;  %4563 = vmatprep.subr.mxu0 %v4852_v34 }
 0xdb5   : > { %4510 = vmatmul.mubr.msk.f32.gmra.mxu1 %vm959_vm4, %v5204_v2  ;;  %4546 = vmatprep.subr.mxu1 %v4852_v34  ;;  %v4038_v2 = vld [vmem:[%s6043_s11 + $0xd8] sm:$0xff] }
 0xdb6   : > { %4520 = vmatprep.mubr.msk.f32.mxu1 %vm4853_vm0, %v4852_v34 }
 0xe6d   : > { %v2459_v38 = vpop.f32.mrf.mxu1 }
 0xe6e   : > { %4521 = vmatmul.mubr.msk.f32.vlgmr.msra.gmra.mxu1 %vm930_vm3, %v2459_v38  ;;  %4538 = vmatmul.mubr.msk.f32.vlgmr.msra.gmra.mxu0 %vm930_vm3, %v2459_v38 }
 0xe6f   : > { %v4505_v43 = vpop.f32.mrf.mxu1  ;;  %4523 = vmatprep.mubr.msk.f32.mxu1 %vm4853_vm0, %v4852_v34  ;;  %4540 = vmatprep.mubr.msk.f32.mxu0 %vm4853_vm0, %v4852_v34 }
 0xe70   : > { %4547 = vmatpush3.msra.mxu1 %v4038_v2  ;;  %4564 = vmatpush3.msra.mxu0 %v4045_v39 }
 0xe71   : > { %v2464_v45 = vpop.f32.mrf.mxu1  ;;  %4548 = vmatprep.subr.mxu1 %v4852_v34  ;;  %4565 = vmatprep.subr.mxu0 %v4852_v34 }
 0xe72   : > { %4524 = vmatmul.mubr.msk.f32.gmra.mxu1 %vm930_vm3, %v2464_v45  ;;  %4541 = vmatmul.mubr.msk.f32.gmra.mxu0 %vm930_vm3, %v2464_v45 }
 0xe73   : > { %v4508_v50 = vpop.f32.mrf.mxu1  ;;  %4526 = vmatprep.mubr.msk.f32.mxu1 %vm4853_vm0, %v4852_v34  ;;  %4543 = vmatprep.mubr.msk.f32.mxu0 %vm4853_vm0, %v4852_v34 }
 0xe74   : > { %4549 = vmatpush3.msra.mxu1 %v4037_v47  ;;  %4566 = vmatpush3.msra.mxu0 %v4044_v49 }
 0xe75   : > { %v2469_v63 = vpop.f32.mrf.mxu1  ;;  %4550 = vmatprep.subr.mxu1 %v4852_v34  ;;  %4567 = vmatprep.subr.mxu0 %v4852_v34 }
 0xe76   : > { %4527 = vmatmul.mubr.msk.f32.gmra.mxu1 %vm930_vm3, %v2469_v63  ;;  %4544 = vmatmul.mubr.msk.f32.gmra.mxu0 %vm930_vm3, %v2469_v63 }
 0xe77   : > { %v4511_v11 = vpop.f32.mrf.mxu1  ;;  %4551 = vmatpush3.msra.mxu1 %v4036_v51  ;;  %4568 = vmatpush3.msra.mxu0 %v4043_v52 }
 0xe78   : > { %4552 = vmatprep.subr.mxu1 %v4852_v34  ;;  %4569 = vmatprep.subr.mxu0 %v4852_v34 }
 0xe79   : > { %4553 = vmatpush3.msra.mxu1 %v4035_v7  ;;  %4554 = vmatprep.mubr.msk.f32.mxu1 %vm4853_vm0, %v4852_v34 }
 0xe7a   : > { %4570 = vmatpush3.msra.mxu0 %v4042_v12  ;;  %4571 = vmatprep.mubr.msk.f32.mxu0 %vm4853_vm0, %v4852_v34 }
 0xe7b   : > { %4555 = vmatmul.mubr.msk.f32.vlgmr.msra.gmra.mxu1 %vm930_vm3, %v2459_v38  ;;  %4572 = vmatmul.mubr.msk.f32.vlgmr.msra.gmra.mxu0 %vm930_vm3, %v2459_v38 }
 0xe7c   : > { %4557 = vmatprep.mubr.msk.f32.mxu1 %vm4853_vm0, %v4852_v34  ;;  %4574 = vmatprep.mubr.msk.f32.mxu0 %vm4853_vm0, %v4852_v34 }
 0xe7d   : > { %4580 = vmatprep.subr.mxu1 %v4852_v34  ;;  %4595 = vmatprep.subr.mxu0 %v4852_v34 }
 0xe7f   : > { %4558 = vmatmul.mubr.msk.f32.gmra.mxu1 %vm930_vm3, %v2464_v45  ;;  %4575 = vmatmul.mubr.msk.f32.gmra.mxu0 %vm930_vm3, %v2464_v45 }
 0xe80   : > { %4560 = vmatprep.mubr.msk.f32.mxu1 %vm4853_vm0, %v4852_v34  ;;  %4577 = vmatprep.mubr.msk.f32.mxu0 %vm4853_vm0, %v4852_v34 }
 0xe83   : > { %4561 = vmatmul.mubr.msk.f32.gmra.mxu1 %vm930_vm3, %v2469_v63  ;;  %4578 = vmatmul.mubr.msk.f32.gmra.mxu0 %vm930_vm3, %v2469_v63 }
 0xe84   : > { %4586 = vmatprep.mubr.msk.f32.mxu1 %vm4853_vm0, %v4852_v34  ;;  %4601 = vmatprep.mubr.msk.f32.mxu0 %vm4853_vm0, %v4852_v34 }
 0xf2e   : > { %v2553_v13 = vpop.f32.mrf.mxu1  ;;  %v2641_v15 = vpop.f32.mrf.mxu0 }
 0xf2f   : > { %v2567_v61 = vmul.f32 %v2553_v13, %v5295_v35  ;;  %v2655_v0 = vmul.f32 %v5290_v32, %v2641_v15 }
 0xf30   : > { %v4522_v56 = vpop.f32.mrf.mxu1  ;;  %v4539_v17 = vpop.f32.mrf.mxu0 }
 0xf31   : > { %v2658_v50 = vadd.f32 %v2655_v0, %v2567_v61 }
 0xf32   : > { %v2558_v10 = vpop.f32.mrf.mxu1  ;;  %v2646_v18 = vpop.f32.mrf.mxu0 }
 0xf33   : > { %v2568_v26 = vmul.f32 %v2558_v10, %v5333_v57  ;;  %v2656_v28 = vmul.f32 %v5325_v53, %v2646_v18 }
 0xf34   : > { %v4525_v41 = vpop.f32.mrf.mxu1  ;;  %v4542_v19 = vpop.f32.mrf.mxu0 }
 0xf35   : > { %v2659_v38 = vadd.f32 %v2656_v28, %v2568_v26 }
 0xf36   : > { %v2563_v20 = vpop.f32.mrf.mxu1  ;;  %v2651_v21 = vpop.f32.mrf.mxu0 }
 0xf37   : > { %v2569_v43 = vmul.f32 %v2563_v20, %v5318_v48  ;;  %v2657_v45 = vmul.f32 %v5307_v44, %v2651_v21 }
 0xf38   : > { %v4528_v24 = vpop.f32.mrf.mxu1  ;;  %v4545_v25 = vpop.f32.mrf.mxu0 }
 0xf39   : > { %v2660_v32 = vadd.f32 %v2657_v45, %v2569_v43 }
 0xf3b   : > { %v2732_v30 = vpop.f32.mrf.mxu1  ;;  %v2823_v31 = vpop.f32.mrf.mxu0 }
 0xf3c   : > { %v2746_v47 = vmul.f32 %v5302_v40, %v2732_v30  ;;  %v2837_v40 = vmul.f32 %v5312_v46, %v2823_v31 }
 0xf3d   : > { %v4556_v36 = vpop.f32.mrf.mxu1  ;;  %v4573_v37 = vpop.f32.mrf.mxu0 }
 0xf3e   : > { %v2749_v7 = vadd.f32 %v2746_v47, %v2658_v50 }
 0xf3f   : > { %v2737_v2 = vpop.f32.mrf.mxu1  ;;  %v2828_v39 = vpop.f32.mrf.mxu0 }
 0xf40   : > { %v2747_v57 = vmul.f32 %v5353_v5, %v2737_v2  ;;  %v2838_v52 = vmul.f32 %v5358_v6, %v2828_v39  ;;  %v2840_v15 = vadd.f32 %v2837_v40, %v2749_v7 }
 0xf41   : > { %v4559_v53 = vpop.f32.mrf.mxu1  ;;  %v4576_v49 = vpop.f32.mrf.mxu0 }
 0xf42   : > { %v2750_v51 = vadd.f32 %v2747_v57, %v2659_v38 }
 0xf43   : > { %v2742_v35 = vpop.f32.mrf.mxu1  ;;  %v2833_v63 = vpop.f32.mrf.mxu0 }
 0xf44   : > { %v5770_v11 = vadd.f32 %v2838_v52, %v2750_v51  ;;  %v2748_v48 = vmul.f32 %v5338_v58, %v2742_v35  ;;  %v2839_v5 = vmul.f32 %v5346_v1, %v2833_v63  ;;  %v2843_v1 = vmul.f32 0.35355338, %v2840_v15  ;;  %v4059_v51 = vld [vmem:[%s6044_s12 + $0x20] sm:$0xff] }
 0xf45   : > { %v4562_v12 = vpop.f32.mrf.mxu1  ;;  %v4579_v44 = vpop.f32.mrf.mxu0 }
 0xf46   : > { %v2751_v13 = vadd.f32 %v2748_v48, %v2660_v32  ;;  %2851 = vrot.lane.b32.xlu1 %v5770_v11, %s4854_s4  ;;  %v2844_v17 = vmul.f32 0.35355338, %v5770_v11  ;;  %v4063_v12 = vld [vmem:[%s6044_s12 + $0x28] sm:$0xff] }
 0xf48   : > { %v2842_v6 = vadd.f32 %v2839_v5, %v2751_v13 }
 0xf4a   : > { %2849 = vrot.lane.b32.xlu1 %v2840_v15, %s4854_s4  ;;  %2853 = vrot.lane.b32.xlu0 %v2842_v6, %s4854_s4  ;;  %v2845_v10 = vmul.f32 0.35355338, %v2842_v6  ;;  %s6107_s4 = smov 112  }
 0xfb8   : > { %v2852_v58 = vpop.permute.xlu1 %2851 }
 0xfbc   : > { %v2854_v56 = vpop.permute.xlu0 %2853  ;;  %v2850_v46 = vpop.permute.xlu1 %2849 }
 0xfbd   : > { %4581 = vmatpush3.xpose.msk.msra.mxu1 %vm959_vm4, %v2854_v56  ;;  %v4071_v56 = vld [vmem:[%s6044_s12 + $0x38] sm:$0xff] }
 0xfbe   : > { %4582 = vmatprep.subr.mxu1 %v4852_v34 }
 0xfc1   : > { %4583 = vmatpush3.xpose.msk.msra.mxu1 %vm959_vm4, %v2852_v58 }
 0xfc2   : > { %4584 = vmatprep.subr.mxu1 %v4852_v34 }
 0xfc5   : > { %4585 = vmatpush3.xpose.msk.msra.mxu1 %vm959_vm4, %v2850_v46 }
 0xfc6   : > { %4610 = vmatprep.subr.mxu1 %v4852_v34 }
 0xfc8   : > { %4587 = vmatmul.mubr.msk.f32.vlgmr.msra.gmra.mxu1 %vm959_vm4, %v2843_v1 }
 0xfc9   : > { %4589 = vmatprep.mubr.msk.f32.mxu1 %vm4853_vm0, %v4852_v34  ;;  %4611 = vmatpush3.msra.mxu1 %v4059_v51 }
 0xfca   : > { %4632 = vmatprep.subr.mxu1 %v4852_v34 }
 0xfcc   : > { %4590 = vmatmul.mubr.msk.f32.gmra.mxu1 %vm959_vm4, %v2844_v17 }
 0xfcd   : > { %4592 = vmatprep.mubr.msk.f32.mxu1 %vm4853_vm0, %v4852_v34 }
 0xfd0   : > { %4593 = vmatmul.mubr.msk.f32.gmra.mxu1 %vm959_vm4, %v2845_v10 }
 0xfd1   : > { %4612 = vmatprep.mubr.msk.f32.mxu1 %vm4853_vm0, %v4852_v34 }
0x1088   : > { %v2936_v18 = vpop.f32.mrf.mxu1 }
0x1089   : > { %v2937_v41 = vadd.f32 %v2936_v18, %v5384_v23 }
0x108a   : > { %v4588_v19 = vpop.f32.mrf.mxu1 }
0x108b   : > { %v2950_v20 = vsel %vm1540_vm5, %v2937_v41, -inf }
0x108c   : > { %2951 = vmax.xlane.f32.xlu0 %v2950_v20  ;;  %v2941_v21 = vpop.f32.mrf.mxu1 }
0x108d   : > { %v2942_v24 = vadd.f32 %v2941_v21, %v5390_v27 }
0x108e   : > { %v4591_v25 = vpop.f32.mrf.mxu1 }
0x108f   : > { %v2953_v26 = vsel %vm1540_vm5, %v2942_v24, -inf }
0x1090   : > { %2954 = vmax.xlane.f32.xlu1 %v2953_v26  ;;  %v2946_v28 = vpop.f32.mrf.mxu1 }
0x1091   : > { %v2947_v30 = vadd.f32 %v2946_v28, %v5397_v33 }
0x1092   : > { %v4594_v31 = vpop.f32.mrf.mxu1 }
0x1093   : > { %v2956_v36 = vsel %vm1547_vm6, %v2947_v30, -inf }
0x1094   : > { %2957 = vmax.xlane.f32.xlu0 %v2956_v36 }
0x10a1   : > { %2987 = vrot.lane.b32.xlu1 %v2842_v6, %s6107_s4  ;;  %v4067_v6 = vld [vmem:[%s6044_s12 + $0x30] sm:$0xff] }
0x1115   : > { %v2952_v23 = vpop.xlane.xlu0 %2951 }
0x1116   : > { %v2959_v37 = vsub.f32 %v2937_v41, %v2952_v23 }
0x1118   : > { %v2962_v61 = vmul.f32 1.442695, %v2959_v37 }
0x1119   : > { %v2955_v0 = vpop.xlane.xlu1 %2954 }
0x111a   : > { %4770 = vpow2.f32 %v2962_v61  ;;  %v2960_v38 = vsub.f32 %v2942_v24, %v2955_v0 }
0x111c   : > { %v2964_v27 = vmul.f32 1.442695, %v2960_v38 }
0x111d   : > { %v2988_v2 = vpop.permute.xlu1 %2987  ;;  %v2958_v39 = vpop.xlane.xlu0 %2957 }
0x111e   : > { %4772 = vpow2.f32 %v2964_v27  ;;  %v2961_v43 = vsub.f32 %v2947_v30, %v2958_v39  ;;  %4596 = vmatpush3.msk.msra.mxu0 %vm854_vm1, %v2988_v2 }
0x111f   : > { %4597 = vmatprep.subr.mxu0 %v4852_v34 }
0x1120   : > { %v2966_v33 = vmul.f32 1.442695, %v2961_v43 }
0x1122   : > { %4774 = vpow2.f32 %v2966_v33 }
0x1127   : > { %v4771_v45 = vpop.eup %4770 }
0x1128   : > { %v2968_v47 = vsel %vm1540_vm5, %v4771_v45, 0.0 }
0x1129   : > { %2969 = vadd.xlane.f32.xlu0 %v2968_v47 }
0x112b   : > { %v4773_v57 = vpop.eup %4772 }
0x112c   : > { %v2971_v53 = vsel %vm1540_vm5, %v4773_v57, 0.0 }
0x112d   : > { %2972 = vadd.xlane.f32.xlu1 %v2971_v53 }
0x112f   : > { %v4775_v49 = vpop.eup %4774 }
0x1130   : > { %v2974_v50 = vsel %vm1547_vm6, %v4775_v49, 0.0 }
0x1131   : > { %2975 = vadd.xlane.f32.xlu0 %v2974_v50 }
0x113e   : > { %2983 = vrot.lane.b32.xlu1 %v2840_v15, %s6107_s4 }
0x1147   : > { %2985 = vrot.lane.b32.xlu0 %v5770_v11, %s6107_s4  ;;  %s6110_s4 = smov %s6109_s28 }
0x11b2   : > { %v2970_v52 = vpop.xlane.xlu0 %2969 }
0x11b3   : > { %4776 = vrcp.f32 %v2970_v52 }
0x11b6   : > { %v2973_v35 = vpop.xlane.xlu1 %2972 }
0x11b7   : > { %4778 = vrcp.f32 %v2973_v35 }
0x11ba   : > { %v2976_v63 = vpop.xlane.xlu0 %2975  ;;  %v2984_v48 = vpop.permute.xlu1 %2983 }
0x11bb   : > { %4780 = vrcp.f32 %v2976_v63 }
0x11be   : > { %v2986_v32 = vpop.permute.xlu0 %2985 }
0x11bf   : > { %4598 = vmatpush3.msra.mxu0 %v2986_v32 }
0x11c0   : > { %v4777_v7 = vpop.eup %4776  ;;  %4599 = vmatprep.subr.mxu0 %v4852_v34 }
0x11c1   : > { %v2980_v11 = vmul.f32 %v4777_v7, %v4771_v45  ;;  %4600 = vmatpush3.msra.mxu0 %v2984_v48 }
0x11c2   : > { %4621 = vmatprep.subr.mxu0 %v4852_v34 }
0x11c3   : > { %4602 = vmatmul.mubr.msk.f32.vlgmr.msra.gmra.mxu0 %vm1540_vm5, %v2980_v11 }
0x11c4   : > { %v4779_v44 = vpop.eup %4778  ;;  %4604 = vmatprep.mubr.msk.f32.mxu0 %vm4853_vm0, %v4852_v34  ;;  %4622 = vmatpush3.msra.mxu0 %v4063_v12 }
0x11c5   : > { %v2981_v40 = vmul.f32 %v4779_v44, %v4773_v57  ;;  %4643 = vmatprep.subr.mxu0 %v4852_v34 }
0x11c7   : > { %4605 = vmatmul.mubr.msk.f32.gmra.mxu0 %vm1540_vm5, %v2981_v40 }
0x11c8   : > { %v4781_v13 = vpop.eup %4780  ;;  %4607 = vmatprep.mubr.msk.f32.mxu0 %vm4853_vm0, %v4852_v34 }
0x11c9   : > { %v2982_v5 = vmul.f32 %v4781_v13, %v4775_v49 }
0x11cb   : > { %4608 = vmatmul.mubr.msk.f32.gmra.mxu0 %vm1540_vm5, %v2982_v5 }
0x11cc   : > { %4623 = vmatprep.mubr.msk.f32.mxu0 %vm4853_vm0, %v4852_v34 }
0x1283   : > { %v3068_v15 = vpop.f32.mrf.mxu0 }
0x1284   : > { %4613 = vmatmul.mubr.msk.f32.vlgmr.msra.gmra.mxu1 %vm959_vm4, %v3068_v15  ;;  %4624 = vmatmul.mubr.msk.f32.vlgmr.msra.gmra.mxu0 %vm959_vm4, %v3068_v15 }
0x1285   : > { %v4603_v58 = vpop.f32.mrf.mxu0  ;;  %4615 = vmatprep.mubr.msk.f32.mxu1 %vm4853_vm0, %v4852_v34  ;;  %4626 = vmatprep.mubr.msk.f32.mxu0 %vm4853_vm0, %v4852_v34 }
0x1286   : > { %4633 = vmatpush3.msra.mxu1 %v4067_v6  ;;  %4644 = vmatpush3.msra.mxu0 %v4071_v56  ;;  %v4086_v56 = vld [vmem:[%s6048_s16 + $0x38] sm:$0xff]  ;;  %v4084_v58 = vld [vmem:[%s6048_s16 + $0x28] sm:$0xff] }
0x1287   : > { %v3073_v46 = vpop.f32.mrf.mxu0  ;;  %4654 = vmatprep.subr.mxu1 %v4852_v34  ;;  %4663 = vmatprep.subr.mxu0 %v4852_v34 }
0x1288   : > { %4616 = vmatmul.mubr.msk.f32.gmra.mxu1 %vm959_vm4, %v3073_v46  ;;  %4627 = vmatmul.mubr.msk.f32.gmra.mxu0 %vm959_vm4, %v3073_v46 }
0x1289   : > { %v4606_v1 = vpop.f32.mrf.mxu0  ;;  %4618 = vmatprep.mubr.msk.f32.mxu1 %vm4853_vm0, %v4852_v34  ;;  %4629 = vmatprep.mubr.msk.f32.mxu0 %vm4853_vm0, %v4852_v34 }
0x128b   : > { %v3078_v17 = vpop.f32.mrf.mxu0 }
0x128c   : > { %4619 = vmatmul.mubr.msk.f32.gmra.mxu1 %vm959_vm4, %v3078_v17  ;;  %4630 = vmatmul.mubr.msk.f32.gmra.mxu0 %vm959_vm4, %v3078_v17 }
0x128d   : > { %v4609_v10 = vpop.f32.mrf.mxu0  ;;  %4634 = vmatprep.mubr.msk.f32.mxu1 %vm4853_vm0, %v4852_v34  ;;  %4645 = vmatprep.mubr.msk.f32.mxu0 %vm4853_vm0, %v4852_v34 }
0x1290   : > { %4635 = vmatmul.mubr.msk.f32.vlgmr.msra.gmra.mxu1 %vm959_vm4, %v3068_v15  ;;  %4646 = vmatmul.mubr.msk.f32.vlgmr.msra.gmra.mxu0 %vm959_vm4, %v3068_v15 }
0x1291   : > { %4637 = vmatprep.mubr.msk.f32.mxu1 %vm4853_vm0, %v4852_v34  ;;  %4648 = vmatprep.mubr.msk.f32.mxu0 %vm4853_vm0, %v4852_v34 }
0x1292   : > { %4664 = vmatpush3.msra.mxu0 %v4086_v56  ;;  %v3778_v56 = vld [vmem:[%s6054_s22 + $0x8] sm:$0xff] }
0x1293   : > { %4665 = vmatprep.subr.mxu0 %v4852_v34 }
0x1294   : > { %4638 = vmatmul.mubr.msk.f32.gmra.mxu1 %vm959_vm4, %v3073_v46  ;;  %4649 = vmatmul.mubr.msk.f32.gmra.mxu0 %vm959_vm4, %v3073_v46  ;;  %v4083_v46 = vld [vmem:[%s6048_s16 + $0x20] sm:$0xff] }
0x1295   : > { %4640 = vmatprep.mubr.msk.f32.mxu1 %vm4853_vm0, %v4852_v34  ;;  %4651 = vmatprep.mubr.msk.f32.mxu0 %vm4853_vm0, %v4852_v34 }
0x1298   : > { %4641 = vmatmul.mubr.msk.f32.gmra.mxu1 %vm959_vm4, %v3078_v17  ;;  %4652 = vmatmul.mubr.msk.f32.gmra.mxu0 %vm959_vm4, %v3078_v17 }
0x1299   : > { %4660 = vmatprep.mubr.msk.f32.mxu1 %vm4853_vm0, %v4852_v34  ;;  %4671 = vmatprep.mubr.msk.f32.mxu0 %vm4853_vm0, %v4852_v34 }
0x1344   : > { %v3159_v18 = vpop.f32.mrf.mxu1  ;;  %v3244_v41 = vpop.f32.mrf.mxu0 }
0x1345   : > { %v3173_v57 = vmul.f32 %v3159_v18, %v5497_v3  ;;  %v3258_v53 = vmul.f32 %v5502_v4, %v3244_v41  ;;  %v4081_v41 = vld [vmem:[%s6046_s14 + $0x1] ss:$0 sm:$0xff] }
0x1346   : > { %v4614_v19 = vpop.f32.mrf.mxu1  ;;  %v4625_v20 = vpop.f32.mrf.mxu0 }
0x1347   : > { %v3261_v32 = vadd.f32 %v3258_v53, %v3173_v57  ;;  %v4082_v20 = vld [vmem:[%s6047_s15 + $0x1] ss:$0 sm:$0xff] }
0x1348   : > { %v3164_v21 = vpop.f32.mrf.mxu1  ;;  %v3249_v24 = vpop.f32.mrf.mxu0 }
0x1349   : > { %v3174_v2 = vmul.f32 %v3164_v21, %v5477_v54  ;;  %v3259_v39 = vmul.f32 %v5482_v55, %v3249_v24 }
0x134a   : > { %v4617_v25 = vpop.f32.mrf.mxu1  ;;  %v4628_v26 = vpop.f32.mrf.mxu0 }
0x134b   : > { %v3262_v52 = vadd.f32 %v3259_v39, %v3174_v2  ;;  %v4097_v25 = vld [vmem:[%s6050_s18 + $0x78] sm:$0xff]  ;;  %v4096_v26 = vld [vmem:[%s6050_s18 + $0x70] sm:$0xff] }
0x134c   : > { %v3169_v28 = vpop.f32.mrf.mxu1  ;;  %v3254_v30 = vpop.f32.mrf.mxu0 }
0x134d   : > { %v3175_v43 = vmul.f32 %v3169_v28, %v5487_v59  ;;  %v3260_v33 = vmul.f32 %v5492_v60, %v3254_v30  ;;  %v4095_v28 = vld [vmem:[%s6050_s18 + $0x68] sm:$0xff]  ;;  %v4094_v30 = vld [vmem:[%s6050_s18 + $0x60] sm:$0xff] }
0x134e   : > { %v4620_v31 = vpop.f32.mrf.mxu1  ;;  %v4631_v36 = vpop.f32.mrf.mxu0 }
0x134f   : > { %v3263_v35 = vadd.f32 %v3260_v33, %v3175_v43  ;;  %v4093_v31 = vld [vmem:[%s6050_s18 + $0x58] sm:$0xff]  ;;  %v4092_v36 = vld [vmem:[%s6050_s18 + $0x50] sm:$0xff] }
0x1350   : > { %v3332_v23 = vpop.f32.mrf.mxu1  ;;  %v3420_v37 = vpop.f32.mrf.mxu0 }
0x1351   : > { %v3346_v54 = vmul.f32 %v5516_v14, %v3332_v23  ;;  %v4091_v23 = vld [vmem:[%s6050_s18 + $0x48] sm:$0xff] }
0x1352   : > { %v4636_v61 = vpop.f32.mrf.mxu1  ;;  %v4647_v0 = vpop.f32.mrf.mxu0 }
0x1353   : > { %v3349_v3 = vadd.f32 %v3346_v54, %v3261_v32  ;;  %v4088_v61 = vld [vmem:[%s6049_s17 + $0x1] ss:$0 sm:$0xff] }
0x1354   : > { %v3337_v38 = vpop.f32.mrf.mxu1  ;;  %v3425_v27 = vpop.f32.mrf.mxu0 }
0x1355   : > { %v3347_v49 = vmul.f32 %v5507_v8, %v3337_v38  ;;  %v3435_v4 = vmul.f32 %v5536_v29, %v3425_v27  ;;  %v3434_v8 = vmul.f32 %v5542_v42, %v3420_v37  ;;  %v4090_v37 = vld [vmem:[%s6050_s18 + $0x40] sm:$0xff] }
0x1356   : > { %v4639_v45 = vpop.f32.mrf.mxu1  ;;  %v4650_v47 = vpop.f32.mrf.mxu0 }
0x1357   : > { %v3350_v60 = vadd.f32 %v3347_v49, %v3262_v52  ;;  %v3437_v14 = vadd.f32 %v3434_v8, %v3349_v3 }
0x1358   : > { %v3342_v50 = vpop.f32.mrf.mxu1  ;;  %v3430_v51 = vpop.f32.mrf.mxu0 }
0x1359   : > { %v3348_v55 = vmul.f32 %v5521_v16, %v3342_v50  ;;  %v3436_v48 = vmul.f32 %v5529_v22, %v3430_v51  ;;  %v3438_v12 = vadd.f32 %v3435_v4, %v3350_v60  ;;  %v4078_v22 = vld [vmem:[%s6045_s13 + $0x1] ss:$0 sm:$0xff] }
0x135a   : > { %v4642_v63 = vpop.f32.mrf.mxu1  ;;  %v4653_v59 = vpop.f32.mrf.mxu0 }
0x135b   : > { %v3351_v7 = vadd.f32 %v3348_v55, %v3263_v35 }
0x135d   : > { %v3439_v11 = vadd.f32 %v3436_v48, %v3351_v7 }
0x135f   : > { %4655 = vmatpush3.msk.msra.mxu1 %vm854_vm1, %v3439_v11 }
0x1360   : > { %4656 = vmatprep.subr.mxu1 %v4852_v34 }
0x1361   : > { %4657 = vmatpush3.msra.mxu1 %v3438_v12 }
0x1362   : > { %4658 = vmatprep.subr.mxu1 %v4852_v34 }
0x1363   : > { %4659 = vmatpush3.msra.mxu1 %v3437_v14  ;;  %v4100_v14 = vld [vmem:[%s6051_s19 + $0x1] ss:$0 sm:$0xff] }
0x1364   : > { %4661 = vmatmul.mubr.msk.f32.vlgmr.msra.gmra.mxu1 %vm1540_vm5, %v5551_v62  ;;  %4674 = vmatprep.subr.mxu1 %v4852_v34 }
0x1365   : > { %4690 = vmatprep.mubr.msk.f32.mxu1 %vm4853_vm0, %v4852_v34  ;;  %4675 = vmatpush3.msra.mxu1 %v4097_v25 }
0x1366   : > { %4676 = vmatprep.subr.mxu1 %v4852_v34 }
0x1367   : > { %4677 = vmatpush3.msra.mxu1 %v4096_v26 }
0x1368   : > { %4678 = vmatprep.subr.mxu1 %v4852_v34 }
0x1369   : > { %4679 = vmatpush3.msra.mxu1 %v4095_v28 }
0x136a   : > { %4680 = vmatprep.subr.mxu1 %v4852_v34 }
0x136b   : > { %4681 = vmatpush3.msra.mxu1 %v4094_v30 }
0x136c   : > { %4682 = vmatprep.subr.mxu1 %v4852_v34 }
0x136d   : > { %4683 = vmatpush3.msra.mxu1 %v4093_v31 }
0x136e   : > { %4684 = vmatprep.subr.mxu1 %v4852_v34 }
0x136f   : > { %4685 = vmatpush3.msra.mxu1 %v4092_v36 }
0x1370   : > { %4686 = vmatprep.subr.mxu1 %v4852_v34 }
0x1371   : > { %4687 = vmatpush3.msra.mxu1 %v4091_v23 }
0x1372   : > { %4688 = vmatprep.subr.mxu1 %v4852_v34 }
0x1373   : > { %4689 = vmatpush3.msra.mxu1 %v4090_v37 }
0x1424   : > { %v3509_v16 = vpop.f32.mrf.mxu1 }
0x1425   : > { %v3513_v29 = vadd.f32 %v3509_v16, %v5636_v9  ;;  %v4085_v9 = vld [vmem:[%s6048_s16 + $0x30] sm:$0xff] }
0x1426   : > { %v4662_v42 = vpop.f32.mrf.mxu1  ;;  %4666 = vmatpush3.msra.mxu0 %v4085_v9  ;;  %v3777_v9 = vld [vmem:[%s6054_s22] sm:$0xff] }
0x1427   : > { %v5897_v44 = vadd.f32 %v4078_v22, %v3513_v29  ;;  %4667 = vmatprep.subr.mxu0 %v4852_v34 }
0x1428   : > { %4668 = vmatpush3.msra.mxu0 %v4084_v58 }
0x1429   : > { %v3527_v40 = vsel %vm930_vm3, %v5897_v44, 0.0  ;;  %4669 = vmatprep.subr.mxu0 %v4852_v34 }
0x142a   : > { %3528 = vadd.xlane.f32.xlu1 %v3527_v40  ;;  %4670 = vmatpush3.msra.mxu0 %v4083_v46 }
0x142b   : > { %4693 = vmatprep.subr.mxu0 %v4852_v34 }
0x14b3   : > { %v3529_v62 = vpop.xlane.xlu1 %3528 }
0x14b4   : > { %v3530_v13 = vmul.f32 0.03125, %v3529_v62 }
0x14b6   : > { %v3531_v5 = vsub.f32 %v5897_v44, %v3530_v13 }
0x14b8   : > { %v3532_v15 = vmul.f32 %v3531_v5, %v3531_v5 }
0x14ba   : > { %v3533_v6 = vsel %vm930_vm3, %v3532_v15, 0.0 }
0x14bb   : > { %3534 = vadd.xlane.f32.xlu0 %v3533_v6  ;;  %v3780_v6 = vld [vmem:[%s6054_s22 + $0x18] sm:$0xff] }
0x1544   : > { %v3535_v1 = vpop.xlane.xlu0 %3534 }
0x1545   : > { %v3536_v17 = vmul.f32 0.03125, %v3535_v1 }
0x1547   : > { %v3537_v10 = vadd.f32 1e-05, %v3536_v17 }
0x1549   : > { %4782 = vrsqrt.f32 %v3537_v10  ;;  %v3759_v10 = vld [vmem:[%s6052_s20] sm:$0x1] }
0x1556   : > { %v4783_v18 = vpop.eup %4782 }
0x1557   : > { %v3539_v19 = vmul.f32 %v4783_v18, %v3531_v5 }
0x1559   : > { %v3546_v21 = vmul.f32 %v4081_v41, %v3539_v19  ;;  %v3760_v41 = vld [vmem:[%s6053_s21] sm:$0x1] }
0x155b   : > { %v3553_v24 = vadd.f32 %v4082_v20, %v3546_v21 }
0x155d   : > { %4672 = vmatmul.mubr.msk.f32.vlgmr.msra.gmra.mxu0 %vm930_vm3, %v3553_v24 }
0x155e   : > { %4701 = vmatprep.mubr.msk.f32.mxu0 %vm4853_vm0, %v4852_v34  ;;  %4694 = vmatpush3.msra.mxu0 %v3780_v6 }
0x155f   : > { %4695 = vmatprep.subr.mxu0 %v4852_v34 }
0x161d   : > { %v3636_v0 = vpop.f32.mrf.mxu0 }
0x161e   : > { %v3637_v38 = vadd.f32 %v4088_v61, %v3636_v0 }
0x161f   : > { %v4673_v27 = vpop.f32.mrf.mxu0 }
0x1620   : > { %v3641_v2 = vmul.f32 0.70710677, %v3637_v38  ;;  %v3640_v4 = vmul.f32 0.5, %v3637_v38 }
0x1622   : > { %v3642_v39 = vand.u32 2147483647, %v3641_v2  ;;  %vm3662_vm9 = vcmp.lt.f32.partialorder %v3641_v2, 0.0 }
0x1624   : > { %v3643_v43 = vmul.f32 0.3275911, %v3642_v39  ;;  %v3656_v45 = vsub.f32 0.0, %v3642_v39 }
0x1626   : > { %v3644_v33 = vadd.f32 1.0, %v3643_v43  ;;  %v3657_v47 = vmul.f32 %v3656_v45, %v3642_v39 }
0x1628   : > { %4784 = vrcp.f32 %v3644_v33  ;;  %v3658_v49 = vmul.f32 1.442695, %v3657_v47 }
0x162a   : > { %4786 = vpow2.f32 %v3658_v49 }
0x1635   : > { %v4785_v57 = vpop.eup %4784 }
0x1636   : > { %v3647_v53 = vmul.f32 1.0614054, %v4785_v57 }
0x1637   : > { %v4787_v32 = vpop.eup %4786 }
0x1638   : > { %v3648_v50 = vadd.f32 -1.4531521, %v3647_v53 }
0x163a   : > { %v3649_v51 = vmul.f32 %v4785_v57, %v3648_v50 }
0x163c   : > { %v3650_v52 = vadd.f32 1.4214138, %v3649_v51 }
0x163e   : > { %v3651_v35 = vmul.f32 %v4785_v57, %v3650_v52 }
0x1640   : > { %v3652_v54 = vadd.f32 -0.28449672, %v3651_v35 }
0x1642   : > { %v3653_v55 = vmul.f32 %v4785_v57, %v3652_v54 }
0x1644   : > { %v3654_v63 = vadd.f32 0.2548296, %v3653_v55 }
0x1646   : > { %v3655_v59 = vmul.f32 %v4785_v57, %v3654_v63 }
0x1648   : > { %v3660_v60 = vmul.f32 %v4787_v32, %v3655_v59 }
0x164a   : > { %v3661_v7 = vsub.f32 1.0, %v3660_v60 }
0x164c   : > { %v3663_v48 = vsub.f32 0.0, %v3661_v7 }
0x164e   : > { %v3664_v3 = vsel %vm3662_vm9, %v3663_v48, %v3661_v7 }
0x164f   : > { %v3665_v11 = vadd.f32 1.0, %v3664_v3 }
0x1651   : > { %v3666_v8 = vmul.f32 %v3665_v11, %v3640_v4 }
0x1653   : > { %4691 = vmatmul.mubr.msk.f32.vlgmr.msra.gmra.mxu1 %vm2279_vm8, %v3666_v8 }
0x1713   : > { %v3745_v12 = vpop.f32.mrf.mxu1 }
0x1714   : > { %v3749_v16 = vadd.f32 %v3745_v12, %v5897_v44  ;;  %v3779_v44 = vld [vmem:[%s6054_s22 + $0x10] sm:$0xff] }
0x1715   : > { %v4692_v22 = vpop.f32.mrf.mxu1  ;;  %4696 = vmatpush3.msra.mxu0 %v3779_v44 }
0x1716   : > { %v3758_v29 = vadd.f32 %v4100_v14, %v3749_v16  ;;  %4697 = vmatprep.subr.mxu0 %v4852_v34 }
0x1717   : > { %4698 = vmatpush3.msra.mxu0 %v3778_v56 }
0x1718   : > { %v3762_v42 = vsel %vm3761_vm10, %v3758_v29, 0.0  ;;  %4699 = vmatprep.subr.mxu0 %v4852_v34  ;;  %v3781_v34 = vld [vmem:[%s6108_s27] sm:$0x1] }
0x1719   : > { %3763 = vadd.xlane.f32.xlu0 %v3762_v42  ;;  %4700 = vmatpush3.msra.mxu0 %v3777_v9 }
0x17a2   : > { %v3764_v40 = vpop.xlane.xlu0 %3763 }
0x17a3   : > { %v3765_v62 = vmul.f32 0.03125, %v3764_v40 }
0x17a5   : > { %v3766_v13 = vsub.f32 %v3758_v29, %v3765_v62 }
0x17a7   : > { %v3767_v5 = vmul.f32 %v3766_v13, %v3766_v13 }
0x17a9   : > { %v3768_v15 = vsel %vm3761_vm10, %v3767_v5, 0.0 }
0x17aa   : > { %3769 = vadd.xlane.f32.xlu1 %v3768_v15 }
0x1833   : > { %v3770_v58 = vpop.xlane.xlu1 %3769 }
0x1834   : > { %v3771_v46 = vmul.f32 0.03125, %v3770_v58 }
0x1836   : > { %v3772_v1 = vadd.f32 1e-05, %v3771_v46 }
0x1838   : > { %4788 = vrsqrt.f32 %v3772_v1 }
0x1845   : > { %v4789_v17 = vpop.eup %4788 }
0x1846   : > { %v3774_v18 = vmul.f32 %v4789_v17, %v3766_v13 }
0x1848   : > { %v3775_v19 = vmul.f32 %v3774_v18, %v3759_v10 }
0x184a   : > { %v3776_v20 = vadd.f32 %v3775_v19, %v3760_v41 }
0x184c   : > { %4702 = vmatmul.mubr.msk.f32.vlgmr.msra.gmra.mxu0 %vm930_vm3, %v3776_v20 }
0x190c   : > { %v3851_v21 = vpop.f32.mrf.mxu0 }
0x190d   : > { %v3852_v24 = vadd.f32 %v3851_v21, %v3781_v34 }
0x190e   : > { %v4703_v25 = vpop.f32.mrf.mxu0 }
0x190f   : > { %3856 = vst.msk [vmem:[%s729_s1] sm:$0x1] %vm3855_vm11, %v3852_v24 }
0x1910   : > { %4803 = shalt.err (!%p4800_p3)
}
0x1911   : > { %s4804_s1 = scalar_lea.hbm %s5997_s7, 16  ;;  %s4808_s29 = scalar_lea.hbm %s6110_s4, 32 }
0x1912   : > { %p4805_p4 = scmp.ne.s32.totalorder %s5997_s7, %s4804_s1  ;;  %p4809_p9 = scmp.lt.s32.totalorder %s5997_s7, %s6110_s4 }
0x1913   : > { %p4810_p10 = scmp.lt.s32.totalorder %s4808_s29, %s4804_s1 }
0x1914   : > { %p4806_p7 = pnand %p4805_p4, %p5020_p5 }
0x1915   : > { %p4811_p11 = por %p4810_p10, %p4809_p9 }
0x1916   : > { %p4807_p8 = pneg %p4806_p7 }
0x1918   : > { %p4812_p12 = pnand %p4811_p11, %p4807_p8 }
0x191a   : > { %4815 = shalt.err (!%p4812_p12)
}
0x191b   : > { %4704 = dma.vmem_to_hbm [thread:$0]  (%p5020_p5), %s3871_s2, 16, %s5997_s7, %s3858_s9  }
0x191c PF: > { %s6111_s10 = sld [smem:[#allocation7_spill]] }
0x191d   : > { %s6112_s28 = sld [smem:[#allocation5_spill]] }
0x1922   : > { %p4710_p13 = scmp.ge.s32.totalorder %s6111_s10, 2 }
0x1923   : > { %s3882_s5 = sand.u32 1, %s6112_s28  }
0x1924   : > { %p4707_p0 = pnand %p4710_p13, %p5024_p6  ;;  %s3883_s0 = scalar_lea.sflag [#allocation3], %s3882_s5 }
0x1926   : > { %p4708_p1 = pneg %p4707_p0 }
0x1928   : > { %4833 = dma.done.wait (%p4708_p1), %s3883_s0, 16  }
0x1929   : > { %4835 = vsyncadd (%p4708_p1), %s3883_s0, 4294967280  ;;  %s6114_s28 = sld [smem:[#allocation8_spill]]  ;;  %s6117_s5 = smov %s4842_s26 }
0x192a   : > { %s6115_s1 = sld [smem:[#allocation6_spill]] }
0x192b   : > { %s6116_s27 = sld [smem:[#allocation9_spill]] }
0x192f   : > { %p34_p2 = scmp.ge.s32.totalorder %s6114_s28, 4  }
0x1930   : > { %s6118_s26 = smov %s6115_s1 }
0x1931   :  { %36 = sbr.rel (!%p34_p2) target bundleno = 17 (0x11), region = 180 }
0x1936   :  { %3887 = vsyncpa [#allocation3], 1 }
0x1937   :  { %3889 = vsyncpa [#allocation3 + $0x1], 1 }

</bundles_post_ra>
